<compile_context>
chip_gen: v7x
topology: tpu7x:2x2x1
jax: 0.10.0
libtpu: 0.0.40
codegen_flags: <defaults>
</compile_context>

<pallas_src>
import functools

import jax
import jax.numpy as jnp
from jax.experimental import pallas as pl
from jax.experimental.pallas import tpu as pltpu

BN_EPS = 1e-5
_VMEM_LIMIT = 32 * 1024 * 1024      # safe on v5e/v6e (128 MiB) and v7x (64 MiB)

DEC_KEYS = ["w1a", "w1b", "b1", "w2", "b2", "w3", "b3"]
ENC_KEYS = ["w1", "b1", "g1", "be1",
            "w2", "b2", "g2", "be2",
            "w3", "b3", "g3", "be3",
            "w4", "b4", "g4", "be4",
            "wf1", "bf1", "gf1", "bef1",
            "wf2", "bf2", "gf2", "bef2",
            "wf3", "bf3"]


def _round_up(n, m):
    return ((n + m - 1) // m) * m


# ---------------------------------------------------------------------------
# Shared math (used verbatim by the kernel and by the pure-JAX reference).
# Parameter containers are "indexable" objects: Pallas Refs inside the kernel
# (loaded lazily at point of use) or plain jnp arrays in the reference.
# ---------------------------------------------------------------------------
def _relu(x):
    return jnp.maximum(x, 0.0)


def _bf16_dot(a, w):
    return jnp.dot(a.astype(jnp.bfloat16), w.astype(jnp.bfloat16),
                   preferred_element_type=jnp.float32)


def _bn_train(z, gamma, beta):
    """Training-mode BatchNorm1d (biased variance, two-pass / centred)."""
    n = float(z.shape[0])
    mean = jnp.sum(z, axis=0, keepdims=True) / n
    d = z - mean
    var = jnp.sum(d * d, axis=0, keepdims=True) / n
    return d * jax.lax.rsqrt(var + BN_EPS) * gamma + beta


def _make_sel(B, n_grp, point_dim, out_pad):
    """sel[d, r, j] = 1 iff column j of the decoder output holds coordinate d of
    the point that row r = b*n_grp + p of the encoder corresponds to."""
    R = B * n_grp
    r = jnp.arange(R, dtype=jnp.int32)[:, None]
    j = jnp.arange(out_pad, dtype=jnp.int32)[None, :]
    p = r % n_grp
    return jnp.stack([(j == p * point_dim + d).astype(jnp.float32)
                      for d in range(point_dim)], axis=0)


def _step_math(z_pad, carry, dec, enc, sel, *, B, n_grp, point_dim):
    """One autoregressive step: MLP_Decoder then Decoder_condtional_x."""
    # ---- MLP_Decoder: fc1 -> relu -> fc2 -> relu -> final -------------------
    h = _relu(_bf16_dot(z_pad, dec["w1a"][...])
              + _bf16_dot(carry, dec["w1b"][...]) + dec["b1"][...])
    h = _relu(_bf16_dot(h, dec["w2"][...]) + dec["b2"][...])
    xo = _bf16_dot(h, dec["w3"][...]) + dec["b3"][...]            # (B, out_pad)

    # ---- Decoder_condtional_x (PointNet encoder) ----------------------------
    out_pad = xo.shape[1]
    # Replicate each batch row n_grp times: row r <-> point (b=r//n_grp, p=r%n_grp)
    xr = jnp.concatenate(
        [jnp.broadcast_to(xo[b:b + 1, :], (n_grp, out_pad)) for b in range(B)],
        axis=0)                                                   # (R, out_pad)
    # conv1 (1x1 conv, K=point_dim): exact f32 VPU FMAs; sel masks pick each
    # row's own point coordinates out of the lane-dense decoder output.
    w1 = enc["w1"][...]                                           # (point_dim, 128)
    z1 = enc["b1"][...]                                           # (1, 128)
    for d in range(point_dim):
        coord_d = jnp.sum(xr * sel[d], axis=1, keepdims=True)     # (R, 1) exact pick
        z1 = z1 + coord_d * w1[d:d + 1, :]
    h = _relu(_bn_train(z1, enc["g1"][...], enc["be1"][...]))
    h = _relu(_bn_train(_bf16_dot(h, enc["w2"][...]) + enc["b2"][...],
                        enc["g2"][...], enc["be2"][...]))
    h = _relu(_bn_train(_bf16_dot(h, enc["w3"][...]) + enc["b3"][...],
                        enc["g3"][...], enc["be3"][...]))
    h4 = _bn_train(_bf16_dot(h, enc["w4"][...]) + enc["b4"][...],
                   enc["g4"][...], enc["be4"][...])               # (R, 512), no ReLU
    # max over the n_grp points of each batch element
    pooled = jnp.concatenate(
        [jnp.max(h4[b * n_grp:(b + 1) * n_grp, :], axis=0, keepdims=True)
         for b in range(B)], axis=0)                              # (B, 512)
    h = _relu(_bn_train(_bf16_dot(pooled, enc["wf1"][...]) + enc["bf1"][...],
                        enc["gf1"][...], enc["bef1"][...]))
    h = _relu(_bn_train(_bf16_dot(h, enc["wf2"][...]) + enc["bf2"][...],
                        enc["gf2"][...], enc["bef2"][...]))
    m = _bf16_dot(h, enc["wf3"][...]) + enc["bf3"][...]           # (B, zpad); pad cols == 0
    return xo, m


# ---------------------------------------------------------------------------
# Fused kernel: the whole autoregressive forward in one pallas_call.
# ---------------------------------------------------------------------------
def _fused_kernel(z_ref, sel_ref, *args, B, n_grp, point_dim):
    nd, ne = len(DEC_KEYS), len(ENC_KEYS)
    dec = {k: args[i].at[0] for i, k in enumerate(DEC_KEYS)}    # per-step weight block
    enc = {k: args[nd + i] for i, k in enumerate(ENC_KEYS)}     # VMEM-resident weights
    x_ref = args[nd + ne]
    carry_ref = args[nd + ne + 1]

    step = pl.program_id(0)

    @pl.when(step == 0)
    def _():
        carry_ref[...] = jnp.zeros_like(carry_ref)

    xo, m = _step_math(z_ref[...], carry_ref[...], dec, enc, sel_ref,
                       B=B, n_grp=n_grp, point_dim=point_dim)
    x_ref[0] = xo                                   # lane-dense (B, out_pad) slab
    carry_ref[...] = carry_ref[...] + m             # z_append recurrence


def autoregressive_forward(z, params, *, n_point, point_dim, point_group):
    B, zdim = z.shape
    n_grp = n_point // point_group
    enc, dec = params["enc"], params["dec"]
    zpad = enc["wf3"].shape[1]
    out_pad = dec["w3"].shape[2]
    out_dim = n_grp * point_dim

    z_pad = jnp.zeros((B, zpad), jnp.float32).at[:, :zdim].set(z)
    sel = _make_sel(B, n_grp, point_dim, out_pad)

    dec_arrays = [dec[k] for k in DEC_KEYS]
    enc_arrays = [enc[k] for k in ENC_KEYS]

    in_specs = [
        pl.BlockSpec((B, zpad), lambda c: (0, 0)),
        pl.BlockSpec(sel.shape, lambda c: (0, 0, 0)),
    ]
    # per-step decoder weight blocks, selected by the grid index
    in_specs += [
        pl.BlockSpec((1,) + a.shape[1:],
                     lambda c, _n=(a.ndim - 1): (c,) + (0,) * _n)
        for a in dec_arrays
    ]
    # encoder weights: constant index_map -> DMA'd once, resident across steps
    in_specs += [
        pl.BlockSpec(a.shape, lambda c, _n=a.ndim: (0,) * _n)
        for a in enc_arrays
    ]

    out = pl.pallas_call(
        functools.partial(_fused_kernel, B=B, n_grp=n_grp, point_dim=point_dim),
        grid=(point_group,),
        in_specs=in_specs,
        out_specs=pl.BlockSpec((1, B, out_pad), lambda c: (c, 0, 0)),
        out_shape=jax.ShapeDtypeStruct((point_group, B, out_pad), jnp.float32),
        scratch_shapes=[pltpu.VMEM((B, zpad), jnp.float32)],     # latent carry
        compiler_params=pltpu.CompilerParams(
            dimension_semantics=("arbitrary",),
            vmem_limit_bytes=_VMEM_LIMIT),
    )(z_pad, sel, *dec_arrays, *enc_arrays)

    x = out[:, :, :out_dim]                                      # (PG, B, out_dim)
    return jnp.transpose(x, (1, 0, 2)).reshape(B, n_point, point_dim)


# ---------------------------------------------------------------------------
# Pure-JAX reference (identical math via _step_math) for the sanity check.
# ---------------------------------------------------------------------------
def autoregressive_reference(z, params, *, n_point, point_dim, point_group):
    B, zdim = z.shape
    n_grp = n_point // point_group
    enc, dec = params["enc"], params["dec"]
    zpad = enc["wf3"].shape[1]
    out_pad = dec["w3"].shape[2]
    out_dim = n_grp * point_dim

    z_pad = jnp.zeros((B, zpad), jnp.float32).at[:, :zdim].set(z)
    sel = _make_sel(B, n_grp, point_dim, out_pad)
    carry = jnp.zeros((B, zpad), jnp.float32)

    xs = []
    for c in range(point_group):
        dec_c = {k: dec[k][c] for k in DEC_KEYS}
        xo, m = _step_math(z_pad, carry, dec_c, enc, sel,
                           B=B, n_grp=n_grp, point_dim=point_dim)
        carry = carry + m
        xs.append(xo[:, :out_dim].reshape(B, n_grp, point_dim))
    return jnp.concatenate(xs, axis=1)


# ---------------------------------------------------------------------------
# Deterministic parameter construction (weights padded to 128-lane multiples;
# matmul weights stored bf16, biases / BN params / conv1 kept f32).
# ---------------------------------------------------------------------------
def make_params(key, zdim, n_point, point_dim, point_group):
    n_grp = n_point // point_group
    out_dim = n_grp * point_dim
    out_pad = _round_up(out_dim, 128)
    zpad = _round_up(zdim, 128)
    keys = iter(jax.random.split(key, 512))

    def w_f32(cin, cout, scale=0.1):
        return scale * jax.random.normal(next(keys), (cin, cout), jnp.float32)

    def bias(cout, scale=0.05):
        return scale * jax.random.normal(next(keys), (1, cout), jnp.float32)

    def bn(c):
        g = 1.0 + 0.05 * jax.random.normal(next(keys), (1, c), jnp.float32)
        be = 0.05 * jax.random.normal(next(keys), (1, c), jnp.float32)
        return g, be

    enc = {}
    enc["w1"] = w_f32(point_dim, 128)          # conv1 runs on the VPU (tiny K), keep f32
    enc["b1"] = bias(128)
    enc["g1"], enc["be1"] = bn(128)
    enc["w2"] = w_f32(128, 128).astype(jnp.bfloat16); enc["b2"] = bias(128)
    enc["g2"], enc["be2"] = bn(128)
    enc["w3"] = w_f32(128, 256).astype(jnp.bfloat16); enc["b3"] = bias(256)
    enc["g3"], enc["be3"] = bn(256)
    enc["w4"] = w_f32(256, 512).astype(jnp.bfloat16); enc["b4"] = bias(512)
    enc["g4"], enc["be4"] = bn(512)
    enc["wf1"] = w_f32(512, 256).astype(jnp.bfloat16); enc["bf1"] = bias(256)
    enc["gf1"], enc["bef1"] = bn(256)
    enc["wf2"] = w_f32(256, 128).astype(jnp.bfloat16); enc["bf2"] = bias(128)
    enc["gf2"], enc["bef2"] = bn(128)
    wf3 = w_f32(128, zdim)
    bf3 = bias(zdim)
    enc["wf3"] = (jnp.zeros((128, zpad), jnp.float32)
                  .at[:, :zdim].set(wf3).astype(jnp.bfloat16))   # pad cols exactly 0
    enc["bf3"] = jnp.zeros((1, zpad), jnp.float32).at[:, :zdim].set(bf3)

    w1a, w1b, b1s, w2s, b2s, w3s, b3s = [], [], [], [], [], [], []
    for g_i in range(point_group):
        wa = jnp.zeros((zpad, 256), jnp.float32).at[:zdim].set(w_f32(zdim, 256))
        if g_i == 0:
            wb = jnp.zeros((zpad, 256), jnp.float32)   # decoder 0 only sees z
        else:
            wb = jnp.zeros((zpad, 256), jnp.float32).at[:zdim].set(w_f32(zdim, 256))
        w1a.append(wa.astype(jnp.bfloat16))
        w1b.append(wb.astype(jnp.bfloat16))
        b1s.append(bias(256))
        w2s.append(w_f32(256, 256).astype(jnp.bfloat16))
        b2s.append(bias(256))
        wf = w_f32(256, out_dim)
        bf = bias(out_dim)
        w3s.append(jnp.zeros((256, out_pad), jnp.float32)
                   .at[:, :out_dim].set(wf).astype(jnp.bfloat16))
        b3s.append(jnp.zeros((1, out_pad), jnp.float32).at[:, :out_dim].set(bf))

    dec = {"w1a": jnp.stack(w1a), "w1b": jnp.stack(w1b), "b1": jnp.stack(b1s),
           "w2": jnp.stack(w2s), "b2": jnp.stack(b2s),
           "w3": jnp.stack(w3s), "b3": jnp.stack(b3s)}

    return {"enc": enc, "dec": dec}


if __name__ == "__main__":
    B, ZDIM, N_POINT, POINT_DIM, POINT_GROUP = 2, 32, 64, 3, 8

    key = jax.random.PRNGKey(0)
    kz, kp = jax.random.split(key)
    z = jax.random.normal(kz, (B, ZDIM), jnp.float32)
    params = make_params(kp, ZDIM, N_POINT, POINT_DIM, POINT_GROUP)

    fwd = jax.jit(functools.partial(autoregressive_forward,
                                    n_point=N_POINT, point_dim=POINT_DIM,
                                    point_group=POINT_GROUP))
    ref = jax.jit(functools.partial(autoregressive_reference,
                                    n_point=N_POINT, point_dim=POINT_DIM,
                                    point_group=POINT_GROUP))

    x = jax.block_until_ready(fwd(z, params))
    x_ref = jax.block_until_ready(ref(z, params))

    assert x.shape == (B, N_POINT, POINT_DIM), x.shape
    assert bool(jnp.all(jnp.isfinite(x))), "non-finite output"
    max_err = float(jnp.max(jnp.abs(x - x_ref)))
    assert jnp.allclose(x, x_ref, atol=2e-2, rtol=2e-2), (
        f"mismatch vs reference, max abs err = {max_err}")

    print("KERNEL_OK")
</pallas_src>

<mosaic_0001>
module attributes {stable_mosaic.version = 11 : i64} {
  func.func @_fused_kernel(%arg0: i32, %arg1: memref<2x128xf32, #tpu.memory_space<vmem>>, %arg2: memref<3x16x128xf32, #tpu.memory_space<vmem>>, %arg3: memref<1x128x256xbf16, #tpu.memory_space<vmem>>, %arg4: memref<1x128x256xbf16, #tpu.memory_space<vmem>>, %arg5: memref<1x1x256xf32, #tpu.memory_space<vmem>>, %arg6: memref<1x256x256xbf16, #tpu.memory_space<vmem>>, %arg7: memref<1x1x256xf32, #tpu.memory_space<vmem>>, %arg8: memref<1x256x128xbf16, #tpu.memory_space<vmem>>, %arg9: memref<1x1x128xf32, #tpu.memory_space<vmem>>, %arg10: memref<3x128xf32, #tpu.memory_space<vmem>>, %arg11: memref<1x128xf32, #tpu.memory_space<vmem>>, %arg12: memref<1x128xf32, #tpu.memory_space<vmem>>, %arg13: memref<1x128xf32, #tpu.memory_space<vmem>>, %arg14: memref<128x128xbf16, #tpu.memory_space<vmem>>, %arg15: memref<1x128xf32, #tpu.memory_space<vmem>>, %arg16: memref<1x128xf32, #tpu.memory_space<vmem>>, %arg17: memref<1x128xf32, #tpu.memory_space<vmem>>, %arg18: memref<128x256xbf16, #tpu.memory_space<vmem>>, %arg19: memref<1x256xf32, #tpu.memory_space<vmem>>, %arg20: memref<1x256xf32, #tpu.memory_space<vmem>>, %arg21: memref<1x256xf32, #tpu.memory_space<vmem>>, %arg22: memref<256x512xbf16, #tpu.memory_space<vmem>>, %arg23: memref<1x512xf32, #tpu.memory_space<vmem>>, %arg24: memref<1x512xf32, #tpu.memory_space<vmem>>, %arg25: memref<1x512xf32, #tpu.memory_space<vmem>>, %arg26: memref<512x256xbf16, #tpu.memory_space<vmem>>, %arg27: memref<1x256xf32, #tpu.memory_space<vmem>>, %arg28: memref<1x256xf32, #tpu.memory_space<vmem>>, %arg29: memref<1x256xf32, #tpu.memory_space<vmem>>, %arg30: memref<256x128xbf16, #tpu.memory_space<vmem>>, %arg31: memref<1x128xf32, #tpu.memory_space<vmem>>, %arg32: memref<1x128xf32, #tpu.memory_space<vmem>>, %arg33: memref<1x128xf32, #tpu.memory_space<vmem>>, %arg34: memref<128x128xbf16, #tpu.memory_space<vmem>>, %arg35: memref<1x128xf32, #tpu.memory_space<vmem>>, %arg36: memref<1x2x128xf32, #tpu.memory_space<vmem>>, %arg37: memref<2x128xf32, #tpu.memory_space<vmem>>) attributes {dimension_semantics = [#tpu.dimension_semantics<arbitrary>], iteration_bounds = array<i64: 8>, scalar_prefetch = 0 : i64, scratch_operands = 1 : i64, tpu.core_type = #tpu.core_type<tc>, window_params = [{pipeline_mode = #tpu.pipeline_mode<synchronous>, transform_indices = @transform_0, window_bounds = array<i64: 2, 128>}, {pipeline_mode = #tpu.pipeline_mode<synchronous>, transform_indices = @transform_1, window_bounds = array<i64: 3, 16, 128>}, {transform_indices = @transform_2, window_bounds = array<i64: 1, 128, 256>}, {transform_indices = @transform_3, window_bounds = array<i64: 1, 128, 256>}, {transform_indices = @transform_4, window_bounds = array<i64: 1, 1, 256>}, {transform_indices = @transform_5, window_bounds = array<i64: 1, 256, 256>}, {transform_indices = @transform_6, window_bounds = array<i64: 1, 1, 256>}, {transform_indices = @transform_7, window_bounds = array<i64: 1, 256, 128>}, {transform_indices = @transform_8, window_bounds = array<i64: 1, 1, 128>}, {pipeline_mode = #tpu.pipeline_mode<synchronous>, transform_indices = @transform_9, window_bounds = array<i64: 3, 128>}, {pipeline_mode = #tpu.pipeline_mode<synchronous>, transform_indices = @transform_10, window_bounds = array<i64: 1, 128>}, {pipeline_mode = #tpu.pipeline_mode<synchronous>, transform_indices = @transform_11, window_bounds = array<i64: 1, 128>}, {pipeline_mode = #tpu.pipeline_mode<synchronous>, transform_indices = @transform_12, window_bounds = array<i64: 1, 128>}, {pipeline_mode = #tpu.pipeline_mode<synchronous>, transform_indices = @transform_13, window_bounds = array<i64: 128, 128>}, {pipeline_mode = #tpu.pipeline_mode<synchronous>, transform_indices = @transform_14, window_bounds = array<i64: 1, 128>}, {pipeline_mode = #tpu.pipeline_mode<synchronous>, transform_indices = @transform_15, window_bounds = array<i64: 1, 128>}, {pipeline_mode = #tpu.pipeline_mode<synchronous>, transform_indices = @transform_16, window_bounds = array<i64: 1, 128>}, {pipeline_mode = #tpu.pipeline_mode<synchronous>, transform_indices = @transform_17, window_bounds = array<i64: 128, 256>}, {pipeline_mode = #tpu.pipeline_mode<synchronous>, transform_indices = @transform_18, window_bounds = array<i64: 1, 256>}, {pipeline_mode = #tpu.pipeline_mode<synchronous>, transform_indices = @transform_19, window_bounds = array<i64: 1, 256>}, {pipeline_mode = #tpu.pipeline_mode<synchronous>, transform_indices = @transform_20, window_bounds = array<i64: 1, 256>}, {pipeline_mode = #tpu.pipeline_mode<synchronous>, transform_indices = @transform_21, window_bounds = array<i64: 256, 512>}, {pipeline_mode = #tpu.pipeline_mode<synchronous>, transform_indices = @transform_22, window_bounds = array<i64: 1, 512>}, {pipeline_mode = #tpu.pipeline_mode<synchronous>, transform_indices = @transform_23, window_bounds = array<i64: 1, 512>}, {pipeline_mode = #tpu.pipeline_mode<synchronous>, transform_indices = @transform_24, window_bounds = array<i64: 1, 512>}, {pipeline_mode = #tpu.pipeline_mode<synchronous>, transform_indices = @transform_25, window_bounds = array<i64: 512, 256>}, {pipeline_mode = #tpu.pipeline_mode<synchronous>, transform_indices = @transform_26, window_bounds = array<i64: 1, 256>}, {pipeline_mode = #tpu.pipeline_mode<synchronous>, transform_indices = @transform_27, window_bounds = array<i64: 1, 256>}, {pipeline_mode = #tpu.pipeline_mode<synchronous>, transform_indices = @transform_28, window_bounds = array<i64: 1, 256>}, {pipeline_mode = #tpu.pipeline_mode<synchronous>, transform_indices = @transform_29, window_bounds = array<i64: 256, 128>}, {pipeline_mode = #tpu.pipeline_mode<synchronous>, transform_indices = @transform_30, window_bounds = array<i64: 1, 128>}, {pipeline_mode = #tpu.pipeline_mode<synchronous>, transform_indices = @transform_31, window_bounds = array<i64: 1, 128>}, {pipeline_mode = #tpu.pipeline_mode<synchronous>, transform_indices = @transform_32, window_bounds = array<i64: 1, 128>}, {pipeline_mode = #tpu.pipeline_mode<synchronous>, transform_indices = @transform_33, window_bounds = array<i64: 128, 128>}, {pipeline_mode = #tpu.pipeline_mode<synchronous>, transform_indices = @transform_34, window_bounds = array<i64: 1, 128>}, {transform_indices = @transform_35, window_bounds = array<i64: 1, 2, 128>}]} {
    %c0_i32 = arith.constant 0 : i32
    %0 = arith.cmpi eq, %arg0, %c0_i32 : i32
    %1 = arith.extui %0 : i1 to i32
    %c0_i32_0 = arith.constant 0 : i32
    %2 = arith.cmpi ne, %1, %c0_i32_0 : i32
    scf.if %2 {
      %cst_142 = arith.constant 0.000000e+00 : f32
      %269 = vector.broadcast %cst_142 : f32 to vector<2x128xf32>
      %c0_143 = arith.constant 0 : index
      %c0_144 = arith.constant 0 : index
      %270 = vector.load %arg37[%c0_143, %c0_144] : memref<2x128xf32, #tpu.memory_space<vmem>>, vector<2x128xf32>
      tpu.vector_store %arg37[%c0_143, %c0_144], %269 {strides = array<i32>} : memref<2x128xf32, #tpu.memory_space<vmem>>, vector<2x128xf32>,
    } else {
    }
    %c0 = arith.constant 0 : index
    %c0_1 = arith.constant 0 : index
    %3 = vector.load %arg1[%c0, %c0_1] : memref<2x128xf32, #tpu.memory_space<vmem>>, vector<2x128xf32>
    %c0_2 = arith.constant 0 : index
    %c0_3 = arith.constant 0 : index
    %4 = vector.load %arg37[%c0_2, %c0_3] : memref<2x128xf32, #tpu.memory_space<vmem>>, vector<2x128xf32>
    %c0_4 = arith.constant 0 : index
    %c0_5 = arith.constant 0 : index
    %c0_6 = arith.constant 0 : index
    %5 = vector.load %arg3[%c0_4, %c0_5, %c0_6] : memref<1x128x256xbf16, #tpu.memory_space<vmem>>, vector<1x128x256xbf16>
    %6 = vector.shape_cast %5 : vector<1x128x256xbf16> to vector<128x256xbf16>
    %7 = arith.truncf %3 : vector<2x128xf32> to vector<2x128xbf16>
    %cst = arith.constant dense<0.000000e+00> : vector<2x256xf32>
    %8 = tpu.matmul %7, %6, %cst {dimension_numbers = #tpu.dot_dimension_numbers<[1], [0], [0], [1], [0, 0, 1, 1], [], []>} : vector<2x128xbf16>, vector<128x256xbf16>, vector<2x256xf32> -> vector<2x256xf32>
    %c0_7 = arith.constant 0 : index
    %c0_8 = arith.constant 0 : index
    %c0_9 = arith.constant 0 : index
    %9 = vector.load %arg4[%c0_7, %c0_8, %c0_9] : memref<1x128x256xbf16, #tpu.memory_space<vmem>>, vector<1x128x256xbf16>
    %10 = vector.shape_cast %9 : vector<1x128x256xbf16> to vector<128x256xbf16>
    %11 = arith.truncf %4 : vector<2x128xf32> to vector<2x128xbf16>
    %cst_10 = arith.constant dense<0.000000e+00> : vector<2x256xf32>
    %12 = tpu.matmul %11, %10, %cst_10 {dimension_numbers = #tpu.dot_dimension_numbers<[1], [0], [0], [1], [0, 0, 1, 1], [], []>} : vector<2x128xbf16>, vector<128x256xbf16>, vector<2x256xf32> -> vector<2x256xf32>
    %13 = arith.addf %8, %12 : vector<2x256xf32>
    %c0_11 = arith.constant 0 : index
    %c0_12 = arith.constant 0 : index
    %c0_13 = arith.constant 0 : index
    %14 = vector.load %arg5[%c0_11, %c0_12, %c0_13] : memref<1x1x256xf32, #tpu.memory_space<vmem>>, vector<1x1x256xf32>
    %15 = vector.shape_cast %14 : vector<1x1x256xf32> to vector<1x256xf32>
    %16 = vector.broadcast %15 : vector<1x256xf32> to vector<2x256xf32>
    %17 = arith.addf %13, %16 : vector<2x256xf32>
    %cst_14 = arith.constant 0.000000e+00 : f32
    %18 = vector.broadcast %cst_14 : f32 to vector<2x256xf32>
    %19 = arith.maximumf %17, %18 : vector<2x256xf32>
    %c0_15 = arith.constant 0 : index
    %c0_16 = arith.constant 0 : index
    %c0_17 = arith.constant 0 : index
    %20 = vector.load %arg6[%c0_15, %c0_16, %c0_17] : memref<1x256x256xbf16, #tpu.memory_space<vmem>>, vector<1x256x256xbf16>
    %21 = vector.shape_cast %20 : vector<1x256x256xbf16> to vector<256x256xbf16>
    %22 = arith.truncf %19 : vector<2x256xf32> to vector<2x256xbf16>
    %cst_18 = arith.constant dense<0.000000e+00> : vector<2x256xf32>
    %23 = tpu.matmul %22, %21, %cst_18 {dimension_numbers = #tpu.dot_dimension_numbers<[1], [0], [0], [1], [0, 0, 1, 1], [], []>} : vector<2x256xbf16>, vector<256x256xbf16>, vector<2x256xf32> -> vector<2x256xf32>
    %c0_19 = arith.constant 0 : index
    %c0_20 = arith.constant 0 : index
    %c0_21 = arith.constant 0 : index
    %24 = vector.load %arg7[%c0_19, %c0_20, %c0_21] : memref<1x1x256xf32, #tpu.memory_space<vmem>>, vector<1x1x256xf32>
    %25 = vector.shape_cast %24 : vector<1x1x256xf32> to vector<1x256xf32>
    %26 = vector.broadcast %25 : vector<1x256xf32> to vector<2x256xf32>
    %27 = arith.addf %23, %26 : vector<2x256xf32>
    %cst_22 = arith.constant 0.000000e+00 : f32
    %28 = vector.broadcast %cst_22 : f32 to vector<2x256xf32>
    %29 = arith.maximumf %27, %28 : vector<2x256xf32>
    %c0_23 = arith.constant 0 : index
    %c0_24 = arith.constant 0 : index
    %c0_25 = arith.constant 0 : index
    %30 = vector.load %arg8[%c0_23, %c0_24, %c0_25] : memref<1x256x128xbf16, #tpu.memory_space<vmem>>, vector<1x256x128xbf16>
    %31 = vector.shape_cast %30 : vector<1x256x128xbf16> to vector<256x128xbf16>
    %32 = arith.truncf %29 : vector<2x256xf32> to vector<2x256xbf16>
    %cst_26 = arith.constant dense<0.000000e+00> : vector<2x128xf32>
    %33 = tpu.matmul %32, %31, %cst_26 {dimension_numbers = #tpu.dot_dimension_numbers<[1], [0], [0], [1], [0, 0, 1, 1], [], []>} : vector<2x256xbf16>, vector<256x128xbf16>, vector<2x128xf32> -> vector<2x128xf32>
    %c0_27 = arith.constant 0 : index
    %c0_28 = arith.constant 0 : index
    %c0_29 = arith.constant 0 : index
    %34 = vector.load %arg9[%c0_27, %c0_28, %c0_29] : memref<1x1x128xf32, #tpu.memory_space<vmem>>, vector<1x1x128xf32>
    %35 = vector.shape_cast %34 : vector<1x1x128xf32> to vector<1x128xf32>
    %36 = vector.broadcast %35 : vector<1x128xf32> to vector<2x128xf32>
    %37 = arith.addf %33, %36 : vector<2x128xf32>
    %38 = vector.extract_strided_slice %37 {offsets = [0, 0], sizes = [1, 128], strides = [1, 1]} : vector<2x128xf32> to vector<1x128xf32>
    %39 = vector.shape_cast %38 : vector<1x128xf32> to vector<1x128xf32>
    %40 = vector.broadcast %39 : vector<1x128xf32> to vector<8x128xf32>
    %41 = vector.extract_strided_slice %37 {offsets = [1, 0], sizes = [1, 128], strides = [1, 1]} : vector<2x128xf32> to vector<1x128xf32>
    %42 = vector.shape_cast %41 : vector<1x128xf32> to vector<1x128xf32>
    %43 = vector.broadcast %42 : vector<1x128xf32> to vector<8x128xf32>
    %44 = tpu.concatenate %40, %43 in 0 : vector<8x128xf32>, vector<8x128xf32> -> vector<16x128xf32>
    %c0_30 = arith.constant 0 : index
    %c0_31 = arith.constant 0 : index
    %45 = vector.load %arg10[%c0_30, %c0_31] : memref<3x128xf32, #tpu.memory_space<vmem>>, vector<3x128xf32>
    %c0_32 = arith.constant 0 : index
    %c0_33 = arith.constant 0 : index
    %46 = vector.load %arg11[%c0_32, %c0_33] : memref<1x128xf32, #tpu.memory_space<vmem>>, vector<1x128xf32>
    %c0_34 = arith.constant 0 : index
    %c0_35 = arith.constant 0 : index
    %c0_36 = arith.constant 0 : index
    %47 = vector.load %arg2[%c0_34, %c0_35, %c0_36] : memref<3x16x128xf32, #tpu.memory_space<vmem>>, vector<1x16x128xf32>
    %48 = vector.shape_cast %47 : vector<1x16x128xf32> to vector<16x128xf32>
    %49 = arith.mulf %44, %48 : vector<16x128xf32>
    %cst_37 = arith.constant dense<0.000000e+00> : vector<16xf32>
    %50 = vector.multi_reduction <add>, %49, %cst_37 [1] : vector<16x128xf32> to vector<16xf32>
    %51 = vector.shape_cast %50 : vector<16xf32> to vector<16x1xf32>
    %52 = vector.extract_strided_slice %45 {offsets = [0, 0], sizes = [1, 128], strides = [1, 1]} : vector<3x128xf32> to vector<1x128xf32>
    %53 = vector.broadcast %51 : vector<16x1xf32> to vector<16x128xf32>
    %54 = vector.broadcast %52 : vector<1x128xf32> to vector<16x128xf32>
    %55 = arith.mulf %53, %54 : vector<16x128xf32>
    %56 = vector.broadcast %46 : vector<1x128xf32> to vector<16x128xf32>
    %57 = arith.addf %56, %55 : vector<16x128xf32>
    %c1 = arith.constant 1 : index
    %c0_38 = arith.constant 0 : index
    %c0_39 = arith.constant 0 : index
    %58 = vector.load %arg2[%c1, %c0_38, %c0_39] : memref<3x16x128xf32, #tpu.memory_space<vmem>>, vector<1x16x128xf32>
    %59 = vector.shape_cast %58 : vector<1x16x128xf32> to vector<16x128xf32>
    %60 = arith.mulf %44, %59 : vector<16x128xf32>
    %cst_40 = arith.constant dense<0.000000e+00> : vector<16xf32>
    %61 = vector.multi_reduction <add>, %60, %cst_40 [1] : vector<16x128xf32> to vector<16xf32>
    %62 = vector.shape_cast %61 : vector<16xf32> to vector<16x1xf32>
    %63 = vector.extract_strided_slice %45 {offsets = [1, 0], sizes = [1, 128], strides = [1, 1]} : vector<3x128xf32> to vector<1x128xf32>
    %64 = vector.broadcast %62 : vector<16x1xf32> to vector<16x128xf32>
    %65 = vector.broadcast %63 : vector<1x128xf32> to vector<16x128xf32>
    %66 = arith.mulf %64, %65 : vector<16x128xf32>
    %67 = arith.addf %57, %66 : vector<16x128xf32>
    %c2 = arith.constant 2 : index
    %c0_41 = arith.constant 0 : index
    %c0_42 = arith.constant 0 : index
    %68 = vector.load %arg2[%c2, %c0_41, %c0_42] : memref<3x16x128xf32, #tpu.memory_space<vmem>>, vector<1x16x128xf32>
    %69 = vector.shape_cast %68 : vector<1x16x128xf32> to vector<16x128xf32>
    %70 = arith.mulf %44, %69 : vector<16x128xf32>
    %cst_43 = arith.constant dense<0.000000e+00> : vector<16xf32>
    %71 = vector.multi_reduction <add>, %70, %cst_43 [1] : vector<16x128xf32> to vector<16xf32>
    %72 = vector.shape_cast %71 : vector<16xf32> to vector<16x1xf32>
    %73 = vector.extract_strided_slice %45 {offsets = [2, 0], sizes = [1, 128], strides = [1, 1]} : vector<3x128xf32> to vector<1x128xf32>
    %74 = vector.broadcast %72 : vector<16x1xf32> to vector<16x128xf32>
    %75 = vector.broadcast %73 : vector<1x128xf32> to vector<16x128xf32>
    %76 = arith.mulf %74, %75 : vector<16x128xf32>
    %77 = arith.addf %67, %76 : vector<16x128xf32>
    %c0_44 = arith.constant 0 : index
    %c0_45 = arith.constant 0 : index
    %78 = vector.load %arg12[%c0_44, %c0_45] : memref<1x128xf32, #tpu.memory_space<vmem>>, vector<1x128xf32>
    %c0_46 = arith.constant 0 : index
    %c0_47 = arith.constant 0 : index
    %79 = vector.load %arg13[%c0_46, %c0_47] : memref<1x128xf32, #tpu.memory_space<vmem>>, vector<1x128xf32>
    %cst_48 = arith.constant dense<0.000000e+00> : vector<128xf32>
    %80 = vector.multi_reduction <add>, %77, %cst_48 [0] : vector<16x128xf32> to vector<128xf32>
    %81 = vector.shape_cast %80 : vector<128xf32> to vector<1x128xf32>
    %cst_49 = arith.constant 1.600000e+01 : f32
    %82 = vector.broadcast %cst_49 : f32 to vector<1x128xf32>
    %83 = arith.divf %81, %82 : vector<1x128xf32>
    %84 = vector.broadcast %83 : vector<1x128xf32> to vector<16x128xf32>
    %85 = arith.subf %77, %84 : vector<16x128xf32>
    %86 = arith.mulf %85, %85 : vector<16x128xf32>
    %cst_50 = arith.constant dense<0.000000e+00> : vector<128xf32>
    %87 = vector.multi_reduction <add>, %86, %cst_50 [0] : vector<16x128xf32> to vector<128xf32>
    %88 = vector.shape_cast %87 : vector<128xf32> to vector<1x128xf32>
    %cst_51 = arith.constant 1.600000e+01 : f32
    %89 = vector.broadcast %cst_51 : f32 to vector<1x128xf32>
    %90 = arith.divf %88, %89 : vector<1x128xf32>
    %cst_52 = arith.constant 9.99999974E-6 : f32
    %91 = vector.broadcast %cst_52 : f32 to vector<1x128xf32>
    %92 = arith.addf %90, %91 : vector<1x128xf32>
    %93 = math.rsqrt %92 : vector<1x128xf32>
    %94 = vector.broadcast %93 : vector<1x128xf32> to vector<16x128xf32>
    %95 = arith.mulf %85, %94 : vector<16x128xf32>
    %96 = vector.broadcast %78 : vector<1x128xf32> to vector<16x128xf32>
    %97 = arith.mulf %95, %96 : vector<16x128xf32>
    %98 = vector.broadcast %79 : vector<1x128xf32> to vector<16x128xf32>
    %99 = arith.addf %97, %98 : vector<16x128xf32>
    %cst_53 = arith.constant 0.000000e+00 : f32
    %100 = vector.broadcast %cst_53 : f32 to vector<16x128xf32>
    %101 = arith.maximumf %99, %100 : vector<16x128xf32>
    %c0_54 = arith.constant 0 : index
    %c0_55 = arith.constant 0 : index
    %102 = vector.load %arg14[%c0_54, %c0_55] : memref<128x128xbf16, #tpu.memory_space<vmem>>, vector<128x128xbf16>
    %103 = arith.truncf %101 : vector<16x128xf32> to vector<16x128xbf16>
    %cst_56 = arith.constant dense<0.000000e+00> : vector<16x128xf32>
    %104 = tpu.matmul %103, %102, %cst_56 {dimension_numbers = #tpu.dot_dimension_numbers<[1], [0], [0], [1], [0, 0, 1, 1], [], []>} : vector<16x128xbf16>, vector<128x128xbf16>, vector<16x128xf32> -> vector<16x128xf32>
    %c0_57 = arith.constant 0 : index
    %c0_58 = arith.constant 0 : index
    %105 = vector.load %arg15[%c0_57, %c0_58] : memref<1x128xf32, #tpu.memory_space<vmem>>, vector<1x128xf32>
    %106 = vector.broadcast %105 : vector<1x128xf32> to vector<16x128xf32>
    %107 = arith.addf %104, %106 : vector<16x128xf32>
    %c0_59 = arith.constant 0 : index
    %c0_60 = arith.constant 0 : index
    %108 = vector.load %arg16[%c0_59, %c0_60] : memref<1x128xf32, #tpu.memory_space<vmem>>, vector<1x128xf32>
    %c0_61 = arith.constant 0 : index
    %c0_62 = arith.constant 0 : index
    %109 = vector.load %arg17[%c0_61, %c0_62] : memref<1x128xf32, #tpu.memory_space<vmem>>, vector<1x128xf32>
    %cst_63 = arith.constant dense<0.000000e+00> : vector<128xf32>
    %110 = vector.multi_reduction <add>, %107, %cst_63 [0] : vector<16x128xf32> to vector<128xf32>
    %111 = vector.shape_cast %110 : vector<128xf32> to vector<1x128xf32>
    %cst_64 = arith.constant 1.600000e+01 : f32
    %112 = vector.broadcast %cst_64 : f32 to vector<1x128xf32>
    %113 = arith.divf %111, %112 : vector<1x128xf32>
    %114 = vector.broadcast %113 : vector<1x128xf32> to vector<16x128xf32>
    %115 = arith.subf %107, %114 : vector<16x128xf32>
    %116 = arith.mulf %115, %115 : vector<16x128xf32>
    %cst_65 = arith.constant dense<0.000000e+00> : vector<128xf32>
    %117 = vector.multi_reduction <add>, %116, %cst_65 [0] : vector<16x128xf32> to vector<128xf32>
    %118 = vector.shape_cast %117 : vector<128xf32> to vector<1x128xf32>
    %cst_66 = arith.constant 1.600000e+01 : f32
    %119 = vector.broadcast %cst_66 : f32 to vector<1x128xf32>
    %120 = arith.divf %118, %119 : vector<1x128xf32>
    %cst_67 = arith.constant 9.99999974E-6 : f32
    %121 = vector.broadcast %cst_67 : f32 to vector<1x128xf32>
    %122 = arith.addf %120, %121 : vector<1x128xf32>
    %123 = math.rsqrt %122 : vector<1x128xf32>
    %124 = vector.broadcast %123 : vector<1x128xf32> to vector<16x128xf32>
    %125 = arith.mulf %115, %124 : vector<16x128xf32>
    %126 = vector.broadcast %108 : vector<1x128xf32> to vector<16x128xf32>
    %127 = arith.mulf %125, %126 : vector<16x128xf32>
    %128 = vector.broadcast %109 : vector<1x128xf32> to vector<16x128xf32>
    %129 = arith.addf %127, %128 : vector<16x128xf32>
    %cst_68 = arith.constant 0.000000e+00 : f32
    %130 = vector.broadcast %cst_68 : f32 to vector<16x128xf32>
    %131 = arith.maximumf %129, %130 : vector<16x128xf32>
    %c0_69 = arith.constant 0 : index
    %c0_70 = arith.constant 0 : index
    %132 = vector.load %arg18[%c0_69, %c0_70] : memref<128x256xbf16, #tpu.memory_space<vmem>>, vector<128x256xbf16>
    %133 = arith.truncf %131 : vector<16x128xf32> to vector<16x128xbf16>
    %cst_71 = arith.constant dense<0.000000e+00> : vector<16x256xf32>
    %134 = tpu.matmul %133, %132, %cst_71 {dimension_numbers = #tpu.dot_dimension_numbers<[1], [0], [0], [1], [0, 0, 1, 1], [], []>} : vector<16x128xbf16>, vector<128x256xbf16>, vector<16x256xf32> -> vector<16x256xf32>
    %c0_72 = arith.constant 0 : index
    %c0_73 = arith.constant 0 : index
    %135 = vector.load %arg19[%c0_72, %c0_73] : memref<1x256xf32, #tpu.memory_space<vmem>>, vector<1x256xf32>
    %136 = vector.broadcast %135 : vector<1x256xf32> to vector<16x256xf32>
    %137 = arith.addf %134, %136 : vector<16x256xf32>
    %c0_74 = arith.constant 0 : index
    %c0_75 = arith.constant 0 : index
    %138 = vector.load %arg20[%c0_74, %c0_75] : memref<1x256xf32, #tpu.memory_space<vmem>>, vector<1x256xf32>
    %c0_76 = arith.constant 0 : index
    %c0_77 = arith.constant 0 : index
    %139 = vector.load %arg21[%c0_76, %c0_77] : memref<1x256xf32, #tpu.memory_space<vmem>>, vector<1x256xf32>
    %cst_78 = arith.constant dense<0.000000e+00> : vector<256xf32>
    %140 = vector.multi_reduction <add>, %137, %cst_78 [0] : vector<16x256xf32> to vector<256xf32>
    %141 = vector.shape_cast %140 : vector<256xf32> to vector<1x256xf32>
    %cst_79 = arith.constant 1.600000e+01 : f32
    %142 = vector.broadcast %cst_79 : f32 to vector<1x256xf32>
    %143 = arith.divf %141, %142 : vector<1x256xf32>
    %144 = vector.broadcast %143 : vector<1x256xf32> to vector<16x256xf32>
    %145 = arith.subf %137, %144 : vector<16x256xf32>
    %146 = arith.mulf %145, %145 : vector<16x256xf32>
    %cst_80 = arith.constant dense<0.000000e+00> : vector<256xf32>
    %147 = vector.multi_reduction <add>, %146, %cst_80 [0] : vector<16x256xf32> to vector<256xf32>
    %148 = vector.shape_cast %147 : vector<256xf32> to vector<1x256xf32>
    %cst_81 = arith.constant 1.600000e+01 : f32
    %149 = vector.broadcast %cst_81 : f32 to vector<1x256xf32>
    %150 = arith.divf %148, %149 : vector<1x256xf32>
    %cst_82 = arith.constant 9.99999974E-6 : f32
    %151 = vector.broadcast %cst_82 : f32 to vector<1x256xf32>
    %152 = arith.addf %150, %151 : vector<1x256xf32>
    %153 = math.rsqrt %152 : vector<1x256xf32>
    %154 = vector.broadcast %153 : vector<1x256xf32> to vector<16x256xf32>
    %155 = arith.mulf %145, %154 : vector<16x256xf32>
    %156 = vector.broadcast %138 : vector<1x256xf32> to vector<16x256xf32>
    %157 = arith.mulf %155, %156 : vector<16x256xf32>
    %158 = vector.broadcast %139 : vector<1x256xf32> to vector<16x256xf32>
    %159 = arith.addf %157, %158 : vector<16x256xf32>
    %cst_83 = arith.constant 0.000000e+00 : f32
    %160 = vector.broadcast %cst_83 : f32 to vector<16x256xf32>
    %161 = arith.maximumf %159, %160 : vector<16x256xf32>
    %c0_84 = arith.constant 0 : index
    %c0_85 = arith.constant 0 : index
    %162 = vector.load %arg22[%c0_84, %c0_85] : memref<256x512xbf16, #tpu.memory_space<vmem>>, vector<256x512xbf16>
    %163 = arith.truncf %161 : vector<16x256xf32> to vector<16x256xbf16>
    %cst_86 = arith.constant dense<0.000000e+00> : vector<16x512xf32>
    %164 = tpu.matmul %163, %162, %cst_86 {dimension_numbers = #tpu.dot_dimension_numbers<[1], [0], [0], [1], [0, 0, 1, 1], [], []>} : vector<16x256xbf16>, vector<256x512xbf16>, vector<16x512xf32> -> vector<16x512xf32>
    %c0_87 = arith.constant 0 : index
    %c0_88 = arith.constant 0 : index
    %165 = vector.load %arg23[%c0_87, %c0_88] : memref<1x512xf32, #tpu.memory_space<vmem>>, vector<1x512xf32>
    %166 = vector.broadcast %165 : vector<1x512xf32> to vector<16x512xf32>
    %167 = arith.addf %164, %166 : vector<16x512xf32>
    %c0_89 = arith.constant 0 : index
    %c0_90 = arith.constant 0 : index
    %168 = vector.load %arg24[%c0_89, %c0_90] : memref<1x512xf32, #tpu.memory_space<vmem>>, vector<1x512xf32>
    %c0_91 = arith.constant 0 : index
    %c0_92 = arith.constant 0 : index
    %169 = vector.load %arg25[%c0_91, %c0_92] : memref<1x512xf32, #tpu.memory_space<vmem>>, vector<1x512xf32>
    %cst_93 = arith.constant dense<0.000000e+00> : vector<512xf32>
    %170 = vector.multi_reduction <add>, %167, %cst_93 [0] : vector<16x512xf32> to vector<512xf32>
    %171 = vector.shape_cast %170 : vector<512xf32> to vector<1x512xf32>
    %cst_94 = arith.constant 1.600000e+01 : f32
    %172 = vector.broadcast %cst_94 : f32 to vector<1x512xf32>
    %173 = arith.divf %171, %172 : vector<1x512xf32>
    %174 = vector.broadcast %173 : vector<1x512xf32> to vector<16x512xf32>
    %175 = arith.subf %167, %174 : vector<16x512xf32>
    %176 = arith.mulf %175, %175 : vector<16x512xf32>
    %cst_95 = arith.constant dense<0.000000e+00> : vector<512xf32>
    %177 = vector.multi_reduction <add>, %176, %cst_95 [0] : vector<16x512xf32> to vector<512xf32>
    %178 = vector.shape_cast %177 : vector<512xf32> to vector<1x512xf32>
    %cst_96 = arith.constant 1.600000e+01 : f32
    %179 = vector.broadcast %cst_96 : f32 to vector<1x512xf32>
    %180 = arith.divf %178, %179 : vector<1x512xf32>
    %cst_97 = arith.constant 9.99999974E-6 : f32
    %181 = vector.broadcast %cst_97 : f32 to vector<1x512xf32>
    %182 = arith.addf %180, %181 : vector<1x512xf32>
    %183 = math.rsqrt %182 : vector<1x512xf32>
    %184 = vector.broadcast %183 : vector<1x512xf32> to vector<16x512xf32>
    %185 = arith.mulf %175, %184 : vector<16x512xf32>
    %186 = vector.broadcast %168 : vector<1x512xf32> to vector<16x512xf32>
    %187 = arith.mulf %185, %186 : vector<16x512xf32>
    %188 = vector.broadcast %169 : vector<1x512xf32> to vector<16x512xf32>
    %189 = arith.addf %187, %188 : vector<16x512xf32>
    %190 = vector.extract_strided_slice %189 {offsets = [0, 0], sizes = [8, 512], strides = [1, 1]} : vector<16x512xf32> to vector<8x512xf32>
    %cst_98 = arith.constant dense<0xFF800000> : vector<512xf32>
    %191 = vector.multi_reduction <maximumf>, %190, %cst_98 [0] : vector<8x512xf32> to vector<512xf32>
    %192 = vector.shape_cast %191 : vector<512xf32> to vector<1x512xf32>
    %193 = vector.extract_strided_slice %189 {offsets = [8, 0], sizes = [8, 512], strides = [1, 1]} : vector<16x512xf32> to vector<8x512xf32>
    %cst_99 = arith.constant dense<0xFF800000> : vector<512xf32>
    %194 = vector.multi_reduction <maximumf>, %193, %cst_99 [0] : vector<8x512xf32> to vector<512xf32>
    %195 = vector.shape_cast %194 : vector<512xf32> to vector<1x512xf32>
    %196 = tpu.concatenate %192, %195 in 0 : vector<1x512xf32>, vector<1x512xf32> -> vector<2x512xf32>
    %c0_100 = arith.constant 0 : index
    %c0_101 = arith.constant 0 : index
    %197 = vector.load %arg26[%c0_100, %c0_101] : memref<512x256xbf16, #tpu.memory_space<vmem>>, vector<512x256xbf16>
    %198 = arith.truncf %196 : vector<2x512xf32> to vector<2x512xbf16>
    %cst_102 = arith.constant dense<0.000000e+00> : vector<2x256xf32>
    %199 = tpu.matmul %198, %197, %cst_102 {dimension_numbers = #tpu.dot_dimension_numbers<[1], [0], [0], [1], [0, 0, 1, 1], [], []>} : vector<2x512xbf16>, vector<512x256xbf16>, vector<2x256xf32> -> vector<2x256xf32>
    %c0_103 = arith.constant 0 : index
    %c0_104 = arith.constant 0 : index
    %200 = vector.load %arg27[%c0_103, %c0_104] : memref<1x256xf32, #tpu.memory_space<vmem>>, vector<1x256xf32>
    %201 = vector.broadcast %200 : vector<1x256xf32> to vector<2x256xf32>
    %202 = arith.addf %199, %201 : vector<2x256xf32>
    %c0_105 = arith.constant 0 : index
    %c0_106 = arith.constant 0 : index
    %203 = vector.load %arg28[%c0_105, %c0_106] : memref<1x256xf32, #tpu.memory_space<vmem>>, vector<1x256xf32>
    %c0_107 = arith.constant 0 : index
    %c0_108 = arith.constant 0 : index
    %204 = vector.load %arg29[%c0_107, %c0_108] : memref<1x256xf32, #tpu.memory_space<vmem>>, vector<1x256xf32>
    %cst_109 = arith.constant dense<0.000000e+00> : vector<256xf32>
    %205 = vector.multi_reduction <add>, %202, %cst_109 [0] : vector<2x256xf32> to vector<256xf32>
    %206 = vector.shape_cast %205 : vector<256xf32> to vector<1x256xf32>
    %cst_110 = arith.constant 2.000000e+00 : f32
    %207 = vector.broadcast %cst_110 : f32 to vector<1x256xf32>
    %208 = arith.divf %206, %207 : vector<1x256xf32>
    %209 = vector.broadcast %208 : vector<1x256xf32> to vector<2x256xf32>
    %210 = arith.subf %202, %209 : vector<2x256xf32>
    %211 = arith.mulf %210, %210 : vector<2x256xf32>
    %cst_111 = arith.constant dense<0.000000e+00> : vector<256xf32>
    %212 = vector.multi_reduction <add>, %211, %cst_111 [0] : vector<2x256xf32> to vector<256xf32>
    %213 = vector.shape_cast %212 : vector<256xf32> to vector<1x256xf32>
    %cst_112 = arith.constant 2.000000e+00 : f32
    %214 = vector.broadcast %cst_112 : f32 to vector<1x256xf32>
    %215 = arith.divf %213, %214 : vector<1x256xf32>
    %cst_113 = arith.constant 9.99999974E-6 : f32
    %216 = vector.broadcast %cst_113 : f32 to vector<1x256xf32>
    %217 = arith.addf %215, %216 : vector<1x256xf32>
    %218 = math.rsqrt %217 : vector<1x256xf32>
    %219 = vector.broadcast %218 : vector<1x256xf32> to vector<2x256xf32>
    %220 = arith.mulf %210, %219 : vector<2x256xf32>
    %221 = vector.broadcast %203 : vector<1x256xf32> to vector<2x256xf32>
    %222 = arith.mulf %220, %221 : vector<2x256xf32>
    %223 = vector.broadcast %204 : vector<1x256xf32> to vector<2x256xf32>
    %224 = arith.addf %222, %223 : vector<2x256xf32>
    %cst_114 = arith.constant 0.000000e+00 : f32
    %225 = vector.broadcast %cst_114 : f32 to vector<2x256xf32>
    %226 = arith.maximumf %224, %225 : vector<2x256xf32>
    %c0_115 = arith.constant 0 : index
    %c0_116 = arith.constant 0 : index
    %227 = vector.load %arg30[%c0_115, %c0_116] : memref<256x128xbf16, #tpu.memory_space<vmem>>, vector<256x128xbf16>
    %228 = arith.truncf %226 : vector<2x256xf32> to vector<2x256xbf16>
    %cst_117 = arith.constant dense<0.000000e+00> : vector<2x128xf32>
    %229 = tpu.matmul %228, %227, %cst_117 {dimension_numbers = #tpu.dot_dimension_numbers<[1], [0], [0], [1], [0, 0, 1, 1], [], []>} : vector<2x256xbf16>, vector<256x128xbf16>, vector<2x128xf32> -> vector<2x128xf32>
    %c0_118 = arith.constant 0 : index
    %c0_119 = arith.constant 0 : index
    %230 = vector.load %arg31[%c0_118, %c0_119] : memref<1x128xf32, #tpu.memory_space<vmem>>, vector<1x128xf32>
    %231 = vector.broadcast %230 : vector<1x128xf32> to vector<2x128xf32>
    %232 = arith.addf %229, %231 : vector<2x128xf32>
    %c0_120 = arith.constant 0 : index
    %c0_121 = arith.constant 0 : index
    %233 = vector.load %arg32[%c0_120, %c0_121] : memref<1x128xf32, #tpu.memory_space<vmem>>, vector<1x128xf32>
    %c0_122 = arith.constant 0 : index
    %c0_123 = arith.constant 0 : index
    %234 = vector.load %arg33[%c0_122, %c0_123] : memref<1x128xf32, #tpu.memory_space<vmem>>, vector<1x128xf32>
    %cst_124 = arith.constant dense<0.000000e+00> : vector<128xf32>
    %235 = vector.multi_reduction <add>, %232, %cst_124 [0] : vector<2x128xf32> to vector<128xf32>
    %236 = vector.shape_cast %235 : vector<128xf32> to vector<1x128xf32>
    %cst_125 = arith.constant 2.000000e+00 : f32
    %237 = vector.broadcast %cst_125 : f32 to vector<1x128xf32>
    %238 = arith.divf %236, %237 : vector<1x128xf32>
    %239 = vector.broadcast %238 : vector<1x128xf32> to vector<2x128xf32>
    %240 = arith.subf %232, %239 : vector<2x128xf32>
    %241 = arith.mulf %240, %240 : vector<2x128xf32>
    %cst_126 = arith.constant dense<0.000000e+00> : vector<128xf32>
    %242 = vector.multi_reduction <add>, %241, %cst_126 [0] : vector<2x128xf32> to vector<128xf32>
    %243 = vector.shape_cast %242 : vector<128xf32> to vector<1x128xf32>
    %cst_127 = arith.constant 2.000000e+00 : f32
    %244 = vector.broadcast %cst_127 : f32 to vector<1x128xf32>
    %245 = arith.divf %243, %244 : vector<1x128xf32>
    %cst_128 = arith.constant 9.99999974E-6 : f32
    %246 = vector.broadcast %cst_128 : f32 to vector<1x128xf32>
    %247 = arith.addf %245, %246 : vector<1x128xf32>
    %248 = math.rsqrt %247 : vector<1x128xf32>
    %249 = vector.broadcast %248 : vector<1x128xf32> to vector<2x128xf32>
    %250 = arith.mulf %240, %249 : vector<2x128xf32>
    %251 = vector.broadcast %233 : vector<1x128xf32> to vector<2x128xf32>
    %252 = arith.mulf %250, %251 : vector<2x128xf32>
    %253 = vector.broadcast %234 : vector<1x128xf32> to vector<2x128xf32>
    %254 = arith.addf %252, %253 : vector<2x128xf32>
    %cst_129 = arith.constant 0.000000e+00 : f32
    %255 = vector.broadcast %cst_129 : f32 to vector<2x128xf32>
    %256 = arith.maximumf %254, %255 : vector<2x128xf32>
    %c0_130 = arith.constant 0 : index
    %c0_131 = arith.constant 0 : index
    %257 = vector.load %arg34[%c0_130, %c0_131] : memref<128x128xbf16, #tpu.memory_space<vmem>>, vector<128x128xbf16>
    %258 = arith.truncf %256 : vector<2x128xf32> to vector<2x128xbf16>
    %cst_132 = arith.constant dense<0.000000e+00> : vector<2x128xf32>
    %259 = tpu.matmul %258, %257, %cst_132 {dimension_numbers = #tpu.dot_dimension_numbers<[1], [0], [0], [1], [0, 0, 1, 1], [], []>} : vector<2x128xbf16>, vector<128x128xbf16>, vector<2x128xf32> -> vector<2x128xf32>
    %c0_133 = arith.constant 0 : index
    %c0_134 = arith.constant 0 : index
    %260 = vector.load %arg35[%c0_133, %c0_134] : memref<1x128xf32, #tpu.memory_space<vmem>>, vector<1x128xf32>
    %261 = vector.broadcast %260 : vector<1x128xf32> to vector<2x128xf32>
    %262 = arith.addf %259, %261 : vector<2x128xf32>
    %c0_135 = arith.constant 0 : index
    %c0_136 = arith.constant 0 : index
    %c0_137 = arith.constant 0 : index
    %263 = vector.load %arg36[%c0_135, %c0_136, %c0_137] : memref<1x2x128xf32, #tpu.memory_space<vmem>>, vector<1x2x128xf32>
    %264 = vector.shape_cast %263 : vector<1x2x128xf32> to vector<2x128xf32>
    %265 = vector.shape_cast %37 : vector<2x128xf32> to vector<1x2x128xf32>
    tpu.vector_store %arg36[%c0_135, %c0_136, %c0_137], %265 {strides = array<i32>} : memref<1x2x128xf32, #tpu.memory_space<vmem>>, vector<1x2x128xf32>,
    %c0_138 = arith.constant 0 : index
    %c0_139 = arith.constant 0 : index
    %266 = vector.load %arg37[%c0_138, %c0_139] : memref<2x128xf32, #tpu.memory_space<vmem>>, vector<2x128xf32>
    %267 = arith.addf %266, %262 : vector<2x128xf32>
    %c0_140 = arith.constant 0 : index
    %c0_141 = arith.constant 0 : index
    %268 = vector.load %arg37[%c0_140, %c0_141] : memref<2x128xf32, #tpu.memory_space<vmem>>, vector<2x128xf32>
    tpu.vector_store %arg37[%c0_140, %c0_141], %267 {strides = array<i32>} : memref<2x128xf32, #tpu.memory_space<vmem>>, vector<2x128xf32>,
    return
  }
  func.func @transform_0(%arg0: i32) -> (i32, i32) {
    %c0_i32 = arith.constant 0 : i32
    %c0_i32_0 = arith.constant 0 : i32
    %c0_i32_1 = arith.constant 0 : i32
    return %c0_i32, %c0_i32_0 : i32, i32
  }
  func.func @transform_1(%arg0: i32) -> (i32, i32, i32) {
    %c0_i32 = arith.constant 0 : i32
    %c0_i32_0 = arith.constant 0 : i32
    %c0_i32_1 = arith.constant 0 : i32
    %c0_i32_2 = arith.constant 0 : i32
    return %c0_i32, %c0_i32_0, %c0_i32_1 : i32, i32, i32
  }
  func.func @transform_2(%arg0: i32) -> (i32, i32, i32) {
    %c0_i32 = arith.constant 0 : i32
    %c0_i32_0 = arith.constant 0 : i32
    %c0_i32_1 = arith.constant 0 : i32
    return %arg0, %c0_i32, %c0_i32_0 : i32, i32, i32
  }
  func.func @transform_3(%arg0: i32) -> (i32, i32, i32) {
    %c0_i32 = arith.constant 0 : i32
    %c0_i32_0 = arith.constant 0 : i32
    %c0_i32_1 = arith.constant 0 : i32
    return %arg0, %c0_i32, %c0_i32_0 : i32, i32, i32
  }
  func.func @transform_4(%arg0: i32) -> (i32, i32, i32) {
    %c0_i32 = arith.constant 0 : i32
    %c0_i32_0 = arith.constant 0 : i32
    %c0_i32_1 = arith.constant 0 : i32
    return %arg0, %c0_i32, %c0_i32_0 : i32, i32, i32
  }
  func.func @transform_5(%arg0: i32) -> (i32, i32, i32) {
    %c0_i32 = arith.constant 0 : i32
    %c0_i32_0 = arith.constant 0 : i32
    %c0_i32_1 = arith.constant 0 : i32
    return %arg0, %c0_i32, %c0_i32_0 : i32, i32, i32
  }
  func.func @transform_6(%arg0: i32) -> (i32, i32, i32) {
    %c0_i32 = arith.constant 0 : i32
    %c0_i32_0 = arith.constant 0 : i32
    %c0_i32_1 = arith.constant 0 : i32
    return %arg0, %c0_i32, %c0_i32_0 : i32, i32, i32
  }
  func.func @transform_7(%arg0: i32) -> (i32, i32, i32) {
    %c0_i32 = arith.constant 0 : i32
    %c0_i32_0 = arith.constant 0 : i32
    %c0_i32_1 = arith.constant 0 : i32
    return %arg0, %c0_i32, %c0_i32_0 : i32, i32, i32
  }
  func.func @transform_8(%arg0: i32) -> (i32, i32, i32) {
    %c0_i32 = arith.constant 0 : i32
    %c0_i32_0 = arith.constant 0 : i32
    %c0_i32_1 = arith.constant 0 : i32
    return %arg0, %c0_i32, %c0_i32_0 : i32, i32, i32
  }
  func.func @transform_9(%arg0: i32) -> (i32, i32) {
    %c0_i32 = arith.constant 0 : i32
    %c0_i32_0 = arith.constant 0 : i32
    %c0_i32_1 = arith.constant 0 : i32
    return %c0_i32, %c0_i32_0 : i32, i32
  }
  func.func @transform_10(%arg0: i32) -> (i32, i32) {
    %c0_i32 = arith.constant 0 : i32
    %c0_i32_0 = arith.constant 0 : i32
    %c0_i32_1 = arith.constant 0 : i32
    return %c0_i32, %c0_i32_0 : i32, i32
  }
  func.func @transform_11(%arg0: i32) -> (i32, i32) {
    %c0_i32 = arith.constant 0 : i32
    %c0_i32_0 = arith.constant 0 : i32
    %c0_i32_1 = arith.constant 0 : i32
    return %c0_i32, %c0_i32_0 : i32, i32
  }
  func.func @transform_12(%arg0: i32) -> (i32, i32) {
    %c0_i32 = arith.constant 0 : i32
    %c0_i32_0 = arith.constant 0 : i32
    %c0_i32_1 = arith.constant 0 : i32
    return %c0_i32, %c0_i32_0 : i32, i32
  }
  func.func @transform_13(%arg0: i32) -> (i32, i32) {
    %c0_i32 = arith.constant 0 : i32
    %c0_i32_0 = arith.constant 0 : i32
    %c0_i32_1 = arith.constant 0 : i32
    return %c0_i32, %c0_i32_0 : i32, i32
  }
  func.func @transform_14(%arg0: i32) -> (i32, i32) {
    %c0_i32 = arith.constant 0 : i32
    %c0_i32_0 = arith.constant 0 : i32
    %c0_i32_1 = arith.constant 0 : i32
    return %c0_i32, %c0_i32_0 : i32, i32
  }
  func.func @transform_15(%arg0: i32) -> (i32, i32) {
    %c0_i32 = arith.constant 0 : i32
    %c0_i32_0 = arith.constant 0 : i32
    %c0_i32_1 = arith.constant 0 : i32
    return %c0_i32, %c0_i32_0 : i32, i32
  }
  func.func @transform_16(%arg0: i32) -> (i32, i32) {
    %c0_i32 = arith.constant 0 : i32
    %c0_i32_0 = arith.constant 0 : i32
    %c0_i32_1 = arith.constant 0 : i32
    return %c0_i32, %c0_i32_0 : i32, i32
  }
  func.func @transform_17(%arg0: i32) -> (i32, i32) {
    %c0_i32 = arith.constant 0 : i32
    %c0_i32_0 = arith.constant 0 : i32
    %c0_i32_1 = arith.constant 0 : i32
    return %c0_i32, %c0_i32_0 : i32, i32
  }
  func.func @transform_18(%arg0: i32) -> (i32, i32) {
    %c0_i32 = arith.constant 0 : i32
    %c0_i32_0 = arith.constant 0 : i32
    %c0_i32_1 = arith.constant 0 : i32
    return %c0_i32, %c0_i32_0 : i32, i32
  }
  func.func @transform_19(%arg0: i32) -> (i32, i32) {
    %c0_i32 = arith.constant 0 : i32
    %c0_i32_0 = arith.constant 0 : i32
    %c0_i32_1 = arith.constant 0 : i32
    return %c0_i32, %c0_i32_0 : i32, i32
  }
  func.func @transform_20(%arg0: i32) -> (i32, i32) {
    %c0_i32 = arith.constant 0 : i32
    %c0_i32_0 = arith.constant 0 : i32
    %c0_i32_1 = arith.constant 0 : i32
    return %c0_i32, %c0_i32_0 : i32, i32
  }
  func.func @transform_21(%arg0: i32) -> (i32, i32) {
    %c0_i32 = arith.constant 0 : i32
    %c0_i32_0 = arith.constant 0 : i32
    %c0_i32_1 = arith.constant 0 : i32
    return %c0_i32, %c0_i32_0 : i32, i32
  }
  func.func @transform_22(%arg0: i32) -> (i32, i32) {
    %c0_i32 = arith.constant 0 : i32
    %c0_i32_0 = arith.constant 0 : i32
    %c0_i32_1 = arith.constant 0 : i32
    return %c0_i32, %c0_i32_0 : i32, i32
  }
  func.func @transform_23(%arg0: i32) -> (i32, i32) {
    %c0_i32 = arith.constant 0 : i32
    %c0_i32_0 = arith.constant 0 : i32
    %c0_i32_1 = arith.constant 0 : i32
    return %c0_i32, %c0_i32_0 : i32, i32
  }
  func.func @transform_24(%arg0: i32) -> (i32, i32) {
    %c0_i32 = arith.constant 0 : i32
    %c0_i32_0 = arith.constant 0 : i32
    %c0_i32_1 = arith.constant 0 : i32
    return %c0_i32, %c0_i32_0 : i32, i32
  }
  func.func @transform_25(%arg0: i32) -> (i32, i32) {
    %c0_i32 = arith.constant 0 : i32
    %c0_i32_0 = arith.constant 0 : i32
    %c0_i32_1 = arith.constant 0 : i32
    return %c0_i32, %c0_i32_0 : i32, i32
  }
  func.func @transform_26(%arg0: i32) -> (i32, i32) {
    %c0_i32 = arith.constant 0 : i32
    %c0_i32_0 = arith.constant 0 : i32
    %c0_i32_1 = arith.constant 0 : i32
    return %c0_i32, %c0_i32_0 : i32, i32
  }
  func.func @transform_27(%arg0: i32) -> (i32, i32) {
    %c0_i32 = arith.constant 0 : i32
    %c0_i32_0 = arith.constant 0 : i32
    %c0_i32_1 = arith.constant 0 : i32
    return %c0_i32, %c0_i32_0 : i32, i32
  }
  func.func @transform_28(%arg0: i32) -> (i32, i32) {
    %c0_i32 = arith.constant 0 : i32
    %c0_i32_0 = arith.constant 0 : i32
    %c0_i32_1 = arith.constant 0 : i32
    return %c0_i32, %c0_i32_0 : i32, i32
  }
  func.func @transform_29(%arg0: i32) -> (i32, i32) {
    %c0_i32 = arith.constant 0 : i32
    %c0_i32_0 = arith.constant 0 : i32
    %c0_i32_1 = arith.constant 0 : i32
    return %c0_i32, %c0_i32_0 : i32, i32
  }
  func.func @transform_30(%arg0: i32) -> (i32, i32) {
    %c0_i32 = arith.constant 0 : i32
    %c0_i32_0 = arith.constant 0 : i32
    %c0_i32_1 = arith.constant 0 : i32
    return %c0_i32, %c0_i32_0 : i32, i32
  }
  func.func @transform_31(%arg0: i32) -> (i32, i32) {
    %c0_i32 = arith.constant 0 : i32
    %c0_i32_0 = arith.constant 0 : i32
    %c0_i32_1 = arith.constant 0 : i32
    return %c0_i32, %c0_i32_0 : i32, i32
  }
  func.func @transform_32(%arg0: i32) -> (i32, i32) {
    %c0_i32 = arith.constant 0 : i32
    %c0_i32_0 = arith.constant 0 : i32
    %c0_i32_1 = arith.constant 0 : i32
    return %c0_i32, %c0_i32_0 : i32, i32
  }
  func.func @transform_33(%arg0: i32) -> (i32, i32) {
    %c0_i32 = arith.constant 0 : i32
    %c0_i32_0 = arith.constant 0 : i32
    %c0_i32_1 = arith.constant 0 : i32
    return %c0_i32, %c0_i32_0 : i32, i32
  }
  func.func @transform_34(%arg0: i32) -> (i32, i32) {
    %c0_i32 = arith.constant 0 : i32
    %c0_i32_0 = arith.constant 0 : i32
    %c0_i32_1 = arith.constant 0 : i32
    return %c0_i32, %c0_i32_0 : i32, i32
  }
  func.func @transform_35(%arg0: i32) -> (i32, i32, i32) {
    %c0_i32 = arith.constant 0 : i32
    %c0_i32_0 = arith.constant 0 : i32
    %c0_i32_1 = arith.constant 0 : i32
    return %arg0, %c0_i32, %c0_i32_0 : i32, i32, i32
  }
}

</mosaic_0001>

<bundles_post_ra>
// kernel: autoregressive_forward.1
= control target key start
LH: loop header
LB: loop body
LE: loop exit
PB: predicated region body
PF: predicated region fallthrough
CT: control target
= control target key end

     0   :  { %s6876_s6 = smov 1   ;;  %s6877_s10 = smov 2   ;;  %s7995_s0 = inlined_call_operand.smem [shape: u32[36], index: -1, kind: input, shape index: {}] }
   0x1   :  { %s6957_s5 = sld [smem:[%s7995_s0]]   ;;  %s6878_s14 = smov 3  }
   0x2   :  { %s6962_s9 = sld [smem:[%s7995_s0 + %s6876_s6]]   ;;  %s6879_s18 = smov 4  }
   0x3   :  { %s6967_s13 = sld [smem:[%s7995_s0 + %s6877_s10]]   ;;  %s6880_s22 = smov 5  }
   0x4   :  { %s6972_s17 = sld [smem:[%s7995_s0 + %s6878_s14]]   ;;  %s6881_s26 = smov 6  }
   0x5   :  { %s6977_s21 = sld [smem:[%s7995_s0 + %s6879_s18]]   ;;  %s6882_s30 = smov 7  }
   0x6   :  { %s6982_s25 = sld [smem:[%s7995_s0 + %s6880_s22]]   ;;  %s6883_s4 = smov 8  }
   0x7   :  { %8050 = sst [smem:[#allocation61_spill]] %s6957_s5  ;;  %s6884_s10 = smov 9  }
   0x8   :  { %8051 = sst [smem:[#allocation62_spill]] %s6962_s9  ;;  %s6885_s15 = smov 10  }
   0x9   :  { %8052 = sst [smem:[#allocation63_spill]] %s6967_s13  ;;  %s6886_s20 = smov 11  }
   0xa   :  { %8053 = sst [smem:[#allocation64_spill]] %s6972_s17  ;;  %s6888_s1 = smov 13  }
   0xb   :  { %8054 = sst [smem:[#allocation65_spill]] %s6977_s21  ;;  %s6889_s7 = smov 14  }
   0xc   :  { %8055 = sst [smem:[#allocation66_spill]] %s6982_s25  ;;  %s6891_s22 = smov 16  }
   0xd   :  { %s6987_s29 = sld [smem:[%s7995_s0 + %s6881_s26]]   ;;  %s6887_s26 = smov 12  }
   0xe   :  { %s6992_s3 = sld [smem:[%s7995_s0 + %s6882_s30]]   ;;  %s6892_s28 = smov 17  }
   0xf   :  { %s6997_s8 = sld [smem:[%s7995_s0 + %s6883_s4]]  }
  0x10   :  { %s7002_s14 = sld [smem:[%s7995_s0 + %s6884_s10]]  }
  0x11   :  { %s7007_s19 = sld [smem:[%s7995_s0 + %s6885_s15]]   ;;  %s6890_s15 = smov 15  }
  0x12   :  { %s7012_s24 = sld [smem:[%s7995_s0 + %s6886_s20]]  }
  0x13   :  { %s7017_s30 = sld [smem:[%s7995_s0 + %s6887_s26]]  }
  0x14   :  { %8056 = sst [smem:[#allocation67_spill]] %s6992_s3 }
  0x15   :  { %8057 = sst [smem:[#allocation68_spill]] %s6997_s8 }
  0x16   :  { %8058 = sst [smem:[#allocation69_spill]] %s7002_s14 }
  0x17   :  { %8059 = sst [smem:[#allocation70_spill]] %s7007_s19 }
  0x18   :  { %8060 = sst [smem:[#allocation71_spill]] %s7012_s24 }
  0x19   :  { %8061 = sst [smem:[#allocation72_spill]] %s7017_s30 }
  0x1a   :  { %s7022_s6 = sld [smem:[%s7995_s0 + %s6888_s1]]  }
  0x1b   :  { %s7027_s12 = sld [smem:[%s7995_s0 + %s6889_s7]]   ;;  %s6893_s7 = smov 18  }
  0x1c   :  { %s7032_s20 = sld [smem:[%s7995_s0 + %s6890_s15]]   ;;  %s6894_s15 = smov 19  }
  0x1d   :  { %s7037_s27 = sld [smem:[%s7995_s0 + %s6891_s22]]   ;;  %s6895_s22 = smov 20  }
  0x1e   :  { %s7042_s4 = sld [smem:[%s7995_s0 + %s6892_s28]]   ;;  %s6896_s28 = smov 21  }
  0x1f   :  { %s7047_s19 = sld [smem:[%s7995_s0 + %s6893_s7]]   ;;  %s6897_s7 = smov 22  }
  0x20   :  { %8062 = sst [smem:[#allocation73_spill]] %s7022_s6 }
  0x21   :  { %8063 = sst [smem:[#allocation74_spill]] %s7027_s12 }
  0x22   :  { %8064 = sst [smem:[#allocation75_spill]] %s7032_s20 }
  0x23   :  { %8065 = sst [smem:[#allocation76_spill]] %s7037_s27 }
  0x24   :  { %8066 = sst [smem:[#allocation77_spill]] %s7042_s4 }
  0x25   :  { %8067 = sst [smem:[#allocation78_spill]] %s7047_s19 }
  0x26   :  { %s7052_s6 = sld [smem:[%s7995_s0 + %s6894_s15]]   ;;  %s6898_s15 = smov 23  }
  0x27   :  { %s7057_s9 = sld [smem:[%s7995_s0 + %s6895_s22]]   ;;  %s6899_s22 = smov 24  }
  0x28   :  { %s7062_s4 = sld [smem:[%s7995_s0 + %s6896_s28]]   ;;  %s6900_s28 = smov 25  }
  0x29   :  { %s7067_s5 = sld [smem:[%s7995_s0 + %s6897_s7]]   ;;  %s6901_s7 = smov 26  }
  0x2a   :  { %s7072_s21 = sld [smem:[%s7995_s0 + %s6898_s15]]   ;;  %s6902_s15 = smov 27  }
  0x2b   :  { %s7077_s8 = sld [smem:[%s7995_s0 + %s6899_s22]]   ;;  %s6903_s22 = smov 28  }
  0x2c   :  { %8068 = sst [smem:[#allocation79_spill]] %s7052_s6 }
  0x2d   :  { %8069 = sst [smem:[#allocation80_spill]] %s7057_s9 }
  0x2e   :  { %8070 = sst [smem:[#allocation81_spill]] %s7062_s4 }
  0x2f   :  { %8071 = sst [smem:[#allocation82_spill]] %s7067_s5 }
  0x30   :  { %8072 = sst [smem:[#allocation83_spill]] %s7072_s21 }
  0x31   :  { %8073 = sst [smem:[#allocation84_spill]] %s7077_s8 }
  0x32   :  { %s7082_s3 = sld [smem:[%s7995_s0 + %s6900_s28]]   ;;  %s6904_s28 = smov 29  }
  0x33   :  { %s7087_s25 = sld [smem:[%s7995_s0 + %s6901_s7]]   ;;  %s6905_s7 = smov 30  }
  0x34   :  { %s7092_s13 = sld [smem:[%s7995_s0 + %s6902_s15]]   ;;  %s6906_s15 = smov 31  }
  0x35   :  { %s7097_s21 = sld [smem:[%s7995_s0 + %s6903_s22]]   ;;  %s6907_s22 = smov 32  }
  0x36   :  { %s7107_s4 = sld [smem:[%s7995_s0 + %s6905_s7]]   ;;  %s6909_s7 = smov 34  }
  0x37   :  { %s7117_s6 = sld [smem:[%s7995_s0 + %s6907_s22]]  }
  0x38   :  { %8074 = sst [smem:[#allocation85_spill]] %s7082_s3 }
  0x39   :  { %8075 = sst [smem:[#allocation86_spill]] %s7087_s25 }
  0x3a   :  { %8076 = sst [smem:[#allocation87_spill]] %s7092_s13 }
  0x3b   :  { %8077 = sst [smem:[#allocation88_spill]] %s7097_s21 }
  0x3c   :  { %s7102_s3 = sld [smem:[%s7995_s0 + %s6904_s28]]   ;;  %s6908_s28 = smov 33  }
  0x3d   :  { %8079 = sst [smem:[#allocation90_spill]] %s7107_s4 }
  0x3e   :  { %s7112_s13 = sld [smem:[%s7995_s0 + %s6906_s15]]   ;;  %s6910_s15 = smov 35  }
  0x3f   :  { %8081 = sst [smem:[#allocation92_spill]] %s7117_s6 }
  0x40   :  { %s7127_s27 = sld [smem:[%s7995_s0 + %s6909_s7]]  }
  0x42   :  { %8078 = sst [smem:[#allocation89_spill]] %s7102_s3 }
  0x43   :  { %s7122_s3 = sld [smem:[%s7995_s0 + %s6908_s28]]  }
  0x44   :  { %8080 = sst [smem:[#allocation91_spill]] %s7112_s13 }
  0x45   :  { %s7132_s13 = sld [smem:[%s7995_s0 + %s6910_s15]]  }
  0x49   :  { %8082 = sst [smem:[#allocation93_spill]] %s7122_s3 }
  0x4b   :  { %8083 = sst [smem:[#allocation94_spill]] %s7132_s13 }
  0x4c   :  { %76 = vsyncpa [#allocation4], 0 }
  0x4d   :  { %78 = vsyncpa [#allocation4 + $0x1], 0 }
  0x4e   :  { %79 = vsyncpa [#allocation6], 0 }
  0x4f   :  { %81 = vsyncpa [#allocation6 + $0x1], 0 }
  0x50   :  { %82 = vsyncpa [#allocation9], 0 }
  0x51   :  { %84 = vsyncpa [#allocation9 + $0x1], 0 }
  0x52   :  { %85 = vsyncpa [#allocation12], 0 }
  0x53   :  { %86 = vsyncpa [#allocation15], 0 }
  0x54   :  { %87 = vsyncpa [#allocation18], 0 }
  0x55   :  { %88 = vsyncpa [#allocation21], 0 }
  0x56   :  { %89 = vsyncpa [#allocation24], 0 }
  0x57   :  { %90 = vsyncpa [#allocation27], 0 }
  0x58   :  { %91 = vsyncpa [#allocation30], 0 }
  0x59   :  { %92 = vsyncpa [#allocation33], 0 }
  0x5a   :  { %93 = vsyncpa [#allocation36], 0 }
  0x5b   :  { %94 = vsyncpa [#allocation39], 0 }
  0x5c   :  { %95 = vsyncpa [#allocation42], 0 }
  0x5d   :  { %96 = vsyncpa [#allocation45], 0  ;;  %s7134_s0 = smov 0   ;;  %s7136_s22 = smov 0  }
  0x5e   :  { %s7138_s23 = smov 0   ;;  %s7140_s26 = smov 0  }
  0x5f LB: > { %s8084_s3 = sld [smem:[#allocation93_spill]]  ;;  %s8085_s24 = sld [smem:[#allocation71_spill]]  ;;  %s6870_s23 = sphi %s7138_s23, %s8169_s23   ;;  %s6866_s22 = sphi %s7136_s22, %s8168_s22   ;;  %s6862_s0 = sphi %s7134_s0, %s8167_s0   ;;  %s6874_s26 = sphi %s7140_s26, %s8170_s26  }
  0x60   : > { %s8086_s12 = sld [smem:[#allocation74_spill]]  ;;  %s8087_s30 = sld [smem:[#allocation72_spill]] }
  0x61   : > { %s8088_s25 = sld [smem:[#allocation86_spill]]  ;;  %s8089_s17 = sld [smem:[#allocation64_spill]] }
  0x62   : > { %s8090_s21 = sld [smem:[#allocation88_spill]]  ;;  %s8091_s20 = sld [smem:[#allocation75_spill]] }
  0x63   : > { %s8092_s19 = sld [smem:[#allocation78_spill]]  ;;  %s8093_s14 = sld [smem:[#allocation69_spill]] }
  0x64   : > { %s8094_s9 = sld [smem:[#allocation80_spill]]  ;;  %s8095_s8 = sld [smem:[#allocation84_spill]] }
  0x65   : > { %s8096_s6 = sld [smem:[#allocation92_spill]]  ;;  %s8097_s5 = sld [smem:[#allocation82_spill]] }
  0x66   : > { %s8098_s4 = sld [smem:[#allocation90_spill]]  ;;  %s6911_s28 = smov [#allocation11]  }
  0x67   : > { %s922_s1 = sshll.u32 %s6911_s28, 4  ;;  %s7155_s2 = sadd.s32 4294967295, %s6874_s26   ;;  %s7161_s1 = int_to_ptr.vmem [resolvable:$true] %s922_s1 }
  0x68   : > { %p4815_p0 = scmp.ge.s32.totalorder %s6874_s26, 1  ;;  %p8011_p1 = scmp.eq.s32.totalorder %s7155_s2, 0 }
  0x69   : > { %p903_p2 = scmp.lt.s32.totalorder %s6874_s26, 9  ;;  %s6912_s10 = smov [#allocation14]  }
  0x6a   : > { %s947_s11 = sshll.u32 %s6912_s10, 4  ;;  %s6913_s15 = smov [#allocation17]   ;;  %s7169_s11 = int_to_ptr.vmem [resolvable:$true] %s947_s11 }
  0x6b   : > { %p7163_p4 = pnand %p4815_p0, %p903_p2  ;;  %s972_s16 = sshll.u32 %s6913_s15, 4  ;;  %s7177_s16 = int_to_ptr.vmem [resolvable:$true] %s972_s16 }
  0x6c   : > { %s6914_s28 = smov [#allocation20]  }
  0x6d   : > { %s8099_s7 = scalar_select %p7163_p4, 1, 0 }
  0x6e   : > { %p5375_p5 = pneg %p7163_p4  ;;  %s7179_s13 = sshll.u32 %s6914_s28, 4  ;;  %s998_s13 = int_to_ptr.vmem [resolvable:$true] %s7179_s13 }
  0x6f   : > { %8100 = sst [smem:[#allocation95_spill]] %s8099_s7  ;;  %s5990_s7 = scalar_lea.hbm %s8093_s14, 64 }
  0x70   : > { %p7173_p6 = pnand %p5375_p5, %p8011_p1  ;;  %p5991_p7 = scmp.ne.s32.totalorder %s8093_s14, %s5990_s7 }
  0x71   : > { %p5997_p11 = scmp.lt.u32.totalorder %s5990_s7, %s8093_s14 }
  0x72   : > { %s8101_s18 = scalar_select %p7173_p6, 1, 0 }
  0x73   : > { %p7185_p8 = pneg %p7173_p6 }
  0x75   : > { %s8102_s10 = scalar_select %p7185_p8, 1, 0 }
  0x76   : > { %p5993_p9 = pnand %p7185_p8, %p5991_p7 }
  0x78   : > { %p5994_p10 = pneg %p5993_p9 }
  0x7a   : > { %p5999_p12 = pnand %p5997_p11, %p5994_p10 }
  0x7c   : > { %6002 = shalt.err (!%p5999_p12)
}
  0x7d   : > { %s6003_s15 = scalar_lea.vmem %s7161_s1, 64  ;;  %p6011_p5 = scmp.lt.s32.totalorder %s7161_s1, %s7161_s1 }
  0x7e   : > { %p6004_p13 = scmp.ne.s32.totalorder %s7161_s1, %s6003_s15  ;;  %p6012_p3 = scmp.lt.s32.totalorder %s6003_s15, %s6003_s15 }
  0x80   : > { %p6006_p0 = pnand %p6004_p13, %p7185_p8  ;;  %p6013_p1 = por %p6012_p3, %p6011_p5 }
  0x82   : > { %p6007_p2 = pneg %p6006_p0 }
  0x84   : > { %p6014_p4 = pnand %p6013_p1, %p6007_p2 }
  0x86   : > { %6017 = shalt.err (!%p6014_p4)
}
  0x87   : > { %5378 = dma.hbm_to_vmem [thread:$0]  (!%p7173_p6), %s8093_s14, 64, %s7161_s1, [#allocation12]  }
  0x88   : > { %s6018_s7 = scalar_lea.hbm %s8087_s30, 16 }
  0x89   : > { %p6019_p7 = scmp.ne.s32.totalorder %s8087_s30, %s6018_s7  ;;  %p6025_p11 = scmp.lt.u32.totalorder %s6018_s7, %s8087_s30 }
  0x8b   : > { %p6021_p9 = pnand %p6019_p7, %p7185_p8 }
  0x8d   : > { %p6022_p10 = pneg %p6021_p9 }
  0x8f   : > { %p6027_p12 = pnand %p6025_p11, %p6022_p10 }
  0x91   : > { %6030 = shalt.err (!%p6027_p12)
}
  0x92   : > { %s6031_s28 = scalar_lea.vmem %s7169_s11, 16  ;;  %s6038_s15 = scalar_lea.vmem %s7169_s11, 32 }
  0x93   : > { %p6032_p1 = scmp.ne.s32.totalorder %s7169_s11, %s6031_s28  ;;  %p6039_p13 = scmp.lt.s32.totalorder %s7169_s11, %s7169_s11 }
  0x94   : > { %p6040_p0 = scmp.lt.s32.totalorder %s6038_s15, %s6031_s28 }
  0x95   : > { %p6034_p3 = pnand %p6032_p1, %p7185_p8 }
  0x96   : > { %p6041_p2 = por %p6040_p0, %p6039_p13 }
  0x97   : > { %p6035_p4 = pneg %p6034_p3 }
  0x99   : > { %p6042_p5 = pnand %p6041_p2, %p6035_p4 }
  0x9b   : > { %6045 = shalt.err (!%p6042_p5)
}
  0x9c   : > { %5384 = dma.hbm_to_vmem [thread:$0]  (!%p7173_p6), %s8087_s30, 16, %s7169_s11, [#allocation15]  }
  0x9d   : > { %s6046_s1 = scalar_lea.hbm %s8091_s20, 16 }
  0x9e   : > { %p6047_p7 = scmp.ne.s32.totalorder %s8091_s20, %s6046_s1  ;;  %p6053_p11 = scmp.lt.u32.totalorder %s6046_s1, %s8091_s20 }
  0xa0   : > { %p6049_p9 = pnand %p6047_p7, %p7185_p8 }
  0xa2   : > { %p6050_p10 = pneg %p6049_p9 }
  0xa4   : > { %p6055_p12 = pnand %p6053_p11, %p6050_p10 }
  0xa6   : > { %6058 = shalt.err (!%p6055_p12)
}
  0xa7   : > { %s6059_s7 = scalar_lea.vmem %s7177_s16, 16  ;;  %s6066_s28 = scalar_lea.vmem %s7177_s16, 32 }
  0xa8   : > { %p6060_p1 = scmp.ne.s32.totalorder %s7177_s16, %s6059_s7  ;;  %p6067_p13 = scmp.lt.s32.totalorder %s7177_s16, %s7177_s16 }
  0xa9   : > { %p6068_p0 = scmp.lt.s32.totalorder %s6066_s28, %s6059_s7 }
  0xaa   : > { %p6062_p3 = pnand %p6060_p1, %p7185_p8 }
  0xab   : > { %p6069_p2 = por %p6068_p0, %p6067_p13 }
  0xac   : > { %p6063_p4 = pneg %p6062_p3 }
  0xae   : > { %p6070_p5 = pnand %p6069_p2, %p6063_p4 }
  0xb0   : > { %6073 = shalt.err (!%p6070_p5)
}
  0xb1   : > { %5390 = dma.hbm_to_vmem [thread:$0]  (!%p7173_p6), %s8091_s20, 16, %s7177_s16, [#allocation18]  }
  0xb2   : > { %s6915_s11 = smov [#allocation23]   ;;  %s6074_s1 = scalar_lea.hbm %s8092_s19, 32 }
  0xb3   : > { %s1019_s15 = sshll.u32 %s6915_s11, 4  ;;  %p6075_p7 = scmp.ne.s32.totalorder %s8092_s19, %s6074_s1  ;;  %s1020_s15 = int_to_ptr.vmem [resolvable:$true] %s1019_s15 }
  0xb4   : > { %p6081_p11 = scmp.lt.u32.totalorder %s6074_s1, %s8092_s19 }
  0xb5   : > { %p6077_p9 = pnand %p6075_p7, %p7185_p8 }
  0xb7   : > { %p6078_p10 = pneg %p6077_p9 }
  0xb9   : > { %p6083_p12 = pnand %p6081_p11, %p6078_p10 }
  0xbb   : > { %6086 = shalt.err (!%p6083_p12)
}
  0xbc   : > { %s6087_s7 = scalar_lea.vmem %s998_s13, 32  ;;  %p6095_p13 = scmp.lt.s32.totalorder %s998_s13, %s998_s13 }
  0xbd   : > { %p6088_p1 = scmp.ne.s32.totalorder %s998_s13, %s6087_s7  ;;  %p6096_p0 = scmp.lt.s32.totalorder %s6087_s7, %s6087_s7 }
  0xbf   : > { %p6090_p3 = pnand %p6088_p1, %p7185_p8  ;;  %p6097_p2 = por %p6096_p0, %p6095_p13 }
  0xc1   : > { %p6091_p4 = pneg %p6090_p3 }
  0xc3   : > { %p6098_p5 = pnand %p6097_p2, %p6091_p4 }
  0xc5   : > { %6101 = shalt.err (!%p6098_p5)
}
  0xc6   : > { %5396 = dma.hbm_to_vmem [thread:$0]  (!%p7173_p6), %s8092_s19, 32, %s998_s13, [#allocation21]  }
  0xc7   : > { %s6102_s16 = scalar_lea.hbm %s8094_s9, 32 }
  0xc8   : > { %p6103_p7 = scmp.ne.s32.totalorder %s8094_s9, %s6102_s16  ;;  %p6109_p11 = scmp.lt.u32.totalorder %s6102_s16, %s8094_s9 }
  0xca   : > { %p6105_p9 = pnand %p6103_p7, %p7185_p8 }
  0xcc   : > { %p6106_p10 = pneg %p6105_p9 }
  0xce   : > { %p6111_p12 = pnand %p6109_p11, %p6106_p10 }
  0xd0   : > { %6114 = shalt.err (!%p6111_p12)
}
  0xd1   : > { %s6115_s28 = scalar_lea.vmem %s1020_s15, 32  ;;  %p6123_p13 = scmp.lt.s32.totalorder %s1020_s15, %s1020_s15 }
  0xd2   : > { %p6116_p1 = scmp.ne.s32.totalorder %s1020_s15, %s6115_s28  ;;  %p6124_p0 = scmp.lt.s32.totalorder %s6115_s28, %s6115_s28 }
  0xd4   : > { %p6118_p3 = pnand %p6116_p1, %p7185_p8  ;;  %p6125_p2 = por %p6124_p0, %p6123_p13 }
  0xd6   : > { %p6119_p4 = pneg %p6118_p3 }
  0xd8   : > { %p6126_p5 = pnand %p6125_p2, %p6119_p4 }
  0xda   : > { %6129 = shalt.err (!%p6126_p5)
}
  0xdb   : > { %5402 = dma.hbm_to_vmem [thread:$0]  (!%p7173_p6), %s8094_s9, 32, %s1020_s15, [#allocation24]  }
  0xdc   : > { %s6916_s13 = smov [#allocation26]   ;;  %s6917_s1 = smov [#allocation29]  }
  0xdd   : > { %s1043_s11 = sshll.u32 %s6916_s13, 4  ;;  %s1065_s7 = sshll.u32 %s6917_s1, 4  ;;  %s1044_s11 = int_to_ptr.vmem [resolvable:$true] %s1043_s11  ;;  %s1066_s7 = int_to_ptr.vmem [resolvable:$true] %s1065_s7 }
  0xde   : > { %s6130_s16 = scalar_lea.hbm %s8097_s5, 64 }
  0xdf   : > { %p6131_p7 = scmp.ne.s32.totalorder %s8097_s5, %s6130_s16  ;;  %p6137_p11 = scmp.lt.u32.totalorder %s6130_s16, %s8097_s5 }
  0xe1   : > { %p6133_p9 = pnand %p6131_p7, %p7185_p8 }
  0xe3   : > { %p6134_p10 = pneg %p6133_p9 }
  0xe5   : > { %p6139_p12 = pnand %p6137_p11, %p6134_p10 }
  0xe7   : > { %6142 = shalt.err (!%p6139_p12)
}
  0xe8   : > { %s6143_s28 = scalar_lea.vmem %s1044_s11, 64  ;;  %p6151_p13 = scmp.lt.s32.totalorder %s1044_s11, %s1044_s11 }
  0xe9   : > { %p6144_p1 = scmp.ne.s32.totalorder %s1044_s11, %s6143_s28  ;;  %p6152_p0 = scmp.lt.s32.totalorder %s6143_s28, %s6143_s28 }
  0xeb   : > { %p6146_p3 = pnand %p6144_p1, %p7185_p8  ;;  %p6153_p2 = por %p6152_p0, %p6151_p13 }
  0xed   : > { %p6147_p4 = pneg %p6146_p3 }
  0xef   : > { %p6154_p5 = pnand %p6153_p2, %p6147_p4 }
  0xf1   : > { %6157 = shalt.err (!%p6154_p5)
}
  0xf2   : > { %5408 = dma.hbm_to_vmem [thread:$0]  (!%p7173_p6), %s8097_s5, 64, %s1044_s11, [#allocation27]  }
  0xf3   : > { %s6158_s15 = scalar_lea.hbm %s8095_s8, 64 }
  0xf4   : > { %p6159_p7 = scmp.ne.s32.totalorder %s8095_s8, %s6158_s15  ;;  %p6165_p11 = scmp.lt.u32.totalorder %s6158_s15, %s8095_s8 }
  0xf6   : > { %p6161_p9 = pnand %p6159_p7, %p7185_p8 }
  0xf8   : > { %p6162_p10 = pneg %p6161_p9 }
  0xfa   : > { %p6167_p12 = pnand %p6165_p11, %p6162_p10 }
  0xfc   : > { %6170 = shalt.err (!%p6167_p12)
}
  0xfd   : > { %s6171_s13 = scalar_lea.vmem %s1066_s7, 64  ;;  %p6179_p13 = scmp.lt.s32.totalorder %s1066_s7, %s1066_s7 }
  0xfe   : > { %p6172_p1 = scmp.ne.s32.totalorder %s1066_s7, %s6171_s13  ;;  %p6180_p0 = scmp.lt.s32.totalorder %s6171_s13, %s6171_s13 }
 0x100   : > { %p6174_p3 = pnand %p6172_p1, %p7185_p8  ;;  %p6181_p2 = por %p6180_p0, %p6179_p13 }
 0x102   : > { %p6175_p4 = pneg %p6174_p3 }
 0x104   : > { %p6182_p5 = pnand %p6181_p2, %p6175_p4 }
 0x106   : > { %6185 = shalt.err (!%p6182_p5)
}
 0x107   : > { %5414 = dma.hbm_to_vmem [thread:$0]  (!%p7173_p6), %s8095_s8, 64, %s1066_s7, [#allocation30]  }
 0x108   : > { %s6918_s11 = smov [#allocation32]   ;;  %s6919_s16 = smov [#allocation35]  }
 0x109   : > { %s1089_s1 = sshll.u32 %s6918_s11, 4  ;;  %s1111_s28 = sshll.u32 %s6919_s16, 4  ;;  %s1090_s1 = int_to_ptr.vmem [resolvable:$true] %s1089_s1  ;;  %s1112_s28 = int_to_ptr.vmem [resolvable:$true] %s1111_s28 }
 0x10a   : > { %s6186_s15 = scalar_lea.hbm %s8088_s25, 32 }
 0x10b   : > { %p6187_p7 = scmp.ne.s32.totalorder %s8088_s25, %s6186_s15  ;;  %p6193_p11 = scmp.lt.u32.totalorder %s6186_s15, %s8088_s25 }
 0x10d   : > { %p6189_p9 = pnand %p6187_p7, %p7185_p8 }
 0x10f   : > { %p6190_p10 = pneg %p6189_p9 }
 0x111   : > { %p6195_p12 = pnand %p6193_p11, %p6190_p10 }
 0x113   : > { %6198 = shalt.err (!%p6195_p12)
}
 0x114   : > { %s6199_s13 = scalar_lea.vmem %s1090_s1, 32  ;;  %p6207_p13 = scmp.lt.s32.totalorder %s1090_s1, %s1090_s1 }
 0x115   : > { %p6200_p1 = scmp.ne.s32.totalorder %s1090_s1, %s6199_s13  ;;  %p6208_p0 = scmp.lt.s32.totalorder %s6199_s13, %s6199_s13 }
 0x117   : > { %p6202_p3 = pnand %p6200_p1, %p7185_p8  ;;  %p6209_p2 = por %p6208_p0, %p6207_p13 }
 0x119   : > { %p6203_p4 = pneg %p6202_p3 }
 0x11b   : > { %p6210_p5 = pnand %p6209_p2, %p6203_p4 }
 0x11d   : > { %6213 = shalt.err (!%p6210_p5)
}
 0x11e   : > { %5420 = dma.hbm_to_vmem [thread:$0]  (!%p7173_p6), %s8088_s25, 32, %s1090_s1, [#allocation33]  }
 0x11f   : > { %s6214_s7 = scalar_lea.hbm %s8090_s21, 32 }
 0x120   : > { %p6215_p7 = scmp.ne.s32.totalorder %s8090_s21, %s6214_s7  ;;  %p6221_p11 = scmp.lt.u32.totalorder %s6214_s7, %s8090_s21 }
 0x122   : > { %p6217_p9 = pnand %p6215_p7, %p7185_p8 }
 0x124   : > { %p6218_p10 = pneg %p6217_p9 }
 0x126   : > { %p6223_p12 = pnand %p6221_p11, %p6218_p10 }
 0x128   : > { %6226 = shalt.err (!%p6223_p12)
}
 0x129   : > { %s6227_s11 = scalar_lea.vmem %s1112_s28, 32  ;;  %p6235_p13 = scmp.lt.s32.totalorder %s1112_s28, %s1112_s28 }
 0x12a   : > { %p6228_p1 = scmp.ne.s32.totalorder %s1112_s28, %s6227_s11  ;;  %p6236_p0 = scmp.lt.s32.totalorder %s6227_s11, %s6227_s11 }
 0x12c   : > { %p6230_p3 = pnand %p6228_p1, %p7185_p8  ;;  %p6237_p2 = por %p6236_p0, %p6235_p13 }
 0x12e   : > { %p6231_p4 = pneg %p6230_p3 }
 0x130   : > { %p6238_p5 = pnand %p6237_p2, %p6231_p4 }
 0x132   : > { %6241 = shalt.err (!%p6238_p5)
}
 0x133   : > { %5426 = dma.hbm_to_vmem [thread:$0]  (!%p7173_p6), %s8090_s21, 32, %s1112_s28, [#allocation36]  }
 0x134   : > { %s6920_s1 = smov [#allocation38]   ;;  %s6921_s15 = smov [#allocation41]  }
 0x135   : > { %s1135_s16 = sshll.u32 %s6920_s1, 4  ;;  %s1157_s13 = sshll.u32 %s6921_s15, 4  ;;  %s1136_s16 = int_to_ptr.vmem [resolvable:$true] %s1135_s16  ;;  %s1158_s13 = int_to_ptr.vmem [resolvable:$true] %s1157_s13 }
 0x136   : > { %s6242_s7 = scalar_lea.hbm %s8098_s4, 16 }
 0x137   : > { %p6243_p7 = scmp.ne.s32.totalorder %s8098_s4, %s6242_s7  ;;  %p6249_p11 = scmp.lt.u32.totalorder %s6242_s7, %s8098_s4 }
 0x139   : > { %p6245_p9 = pnand %p6243_p7, %p7185_p8 }
 0x13b   : > { %p6246_p10 = pneg %p6245_p9 }
 0x13d   : > { %p6251_p12 = pnand %p6249_p11, %p6246_p10 }
 0x13f   : > { %6254 = shalt.err (!%p6251_p12)
}
 0x140   : > { %s6255_s11 = scalar_lea.vmem %s1136_s16, 16  ;;  %s6262_s28 = scalar_lea.vmem %s1136_s16, 32 }
 0x141   : > { %p6256_p1 = scmp.ne.s32.totalorder %s1136_s16, %s6255_s11  ;;  %p6263_p13 = scmp.lt.s32.totalorder %s1136_s16, %s1136_s16 }
 0x142   : > { %p6264_p0 = scmp.lt.s32.totalorder %s6262_s28, %s6255_s11 }
 0x143   : > { %p6258_p3 = pnand %p6256_p1, %p7185_p8 }
 0x144   : > { %p6265_p2 = por %p6264_p0, %p6263_p13 }
 0x145   : > { %p6259_p4 = pneg %p6258_p3 }
 0x147   : > { %p6266_p5 = pnand %p6265_p2, %p6259_p4 }
 0x149   : > { %6269 = shalt.err (!%p6266_p5)
}
 0x14a   : > { %5432 = dma.hbm_to_vmem [thread:$0]  (!%p7173_p6), %s8098_s4, 16, %s1136_s16, [#allocation39]  }
 0x14b   : > { %s6270_s1 = scalar_lea.hbm %s8096_s6, 16 }
 0x14c   : > { %p6271_p7 = scmp.ne.s32.totalorder %s8096_s6, %s6270_s1  ;;  %p6277_p11 = scmp.lt.u32.totalorder %s6270_s1, %s8096_s6 }
 0x14e   : > { %p6273_p9 = pnand %p6271_p7, %p7185_p8 }
 0x150   : > { %p6274_p10 = pneg %p6273_p9 }
 0x152   : > { %p6279_p12 = pnand %p6277_p11, %p6274_p10 }
 0x154   : > { %6282 = shalt.err (!%p6279_p12)
}
 0x155   : > { %s6283_s15 = scalar_lea.vmem %s1158_s13, 16  ;;  %s6290_s7 = scalar_lea.vmem %s1158_s13, 32 }
 0x156   : > { %p6284_p1 = scmp.ne.s32.totalorder %s1158_s13, %s6283_s15  ;;  %p6291_p13 = scmp.lt.s32.totalorder %s1158_s13, %s1158_s13 }
 0x157   : > { %p6292_p0 = scmp.lt.s32.totalorder %s6290_s7, %s6283_s15 }
 0x158   : > { %p6286_p3 = pnand %p6284_p1, %p7185_p8 }
 0x159   : > { %p6293_p2 = por %p6292_p0, %p6291_p13 }
 0x15a   : > { %p6287_p4 = pneg %p6286_p3 }
 0x15c   : > { %p6294_p5 = pnand %p6293_p2, %p6287_p4 }
 0x15e   : > { %6297 = shalt.err (!%p6294_p5)
}
 0x15f   : > { %5438 = dma.hbm_to_vmem [thread:$0]  (!%p7173_p6), %s8096_s6, 16, %s1158_s13, [#allocation42]  }
 0x160   : > { %s7316_s16 = sadd.s32 1, %s6874_s26   ;;  %s151_s28 = sadd.s32 1, %s6870_s23 }
 0x161   : > { %s148_s11 = ssub.s32 %s6874_s26, %s7316_s16  ;;  %p158_p9 = scmp.ne.s32.totalorder %s6870_s23, %s6866_s22 }
 0x162   : > { %p149_p7 = scmp.eq.s32.totalorder %s148_s11, 0  ;;  %p159_p10 = scmp.eq.s32.totalorder %s6874_s26, 0 }
 0x163   : > { %p164_p11 = scmp.ne.s32.totalorder %s6866_s22, %s6862_s0  ;;  %p8104_p1 = scmp.eq.s32.totalorder %s7155_s2, 0 }
 0x164   : > { %s7327_s1 = scalar_select %p149_p7, %s6870_s23, %s151_s28  }
 0x165   : > { %p160_p12 = por %p159_p10, %p158_p9  ;;  %p7331_p3 = por %p8104_p1, %p164_p11 }
 0x166   : > { %8103 = sst [smem:[#allocation96_spill]] %s7327_s1  ;;  %p5484_p4 = scmp.lt.s32.totalorder %s6874_s26, 8 }
 0x167   : > { %s8105_s15 = scalar_select %p7331_p3, 1, 0 }
 0x168   : > { %s7337_s13 = sand.u32 1, %s6870_s23   ;;  %s7343_s11 = sshll.u32 %s6874_s26, 11 }
 0x169   : > { %s7340_s7 = sshll.u32 %s7337_s13, 7  ;;  %p7345_p13 = pnand %p5484_p4, %p160_p12 }
 0x16a   : > { %s8026_s28 = sand.u32 1, %s6874_s26   ;;  %s7352_s4 = scalar_lea.hbm %s8089_s17, %s7343_s11 }
 0x16b   : > { %s8106_s0 = scalar_select %p7345_p13, 1, 0 }
 0x16c   : > { %s1217_s5 = scalar_lea.vmem [#allocation5], %s7340_s7  ;;  %s7360_s9 = scalar_lea.sflag [#allocation6], %s8026_s28 }
 0x16d   : > { %s1224_s6 = sshll.u32 %s1217_s5, 4  ;;  %s6298_s14 = scalar_lea.hbm %s7352_s4, 2048  ;;  %s7355_s6 = int_to_ptr.vmem [resolvable:$true] %s1224_s6 }
 0x16e   : > { %p6299_p0 = scmp.ne.s32.totalorder %s7352_s4, %s6298_s14  ;;  %p7366_p2 = pneg %p7345_p13 }
 0x16f   : > { %s6303_s20 = scalar_lea.hbm %s8089_s17, 16384  ;;  %p6304_p9 = scmp.lt.u32.totalorder %s7352_s4, %s8089_s17 }
 0x170   : > { %s8107_s19 = scalar_select %p7366_p2, 1, 0 }
 0x171   : > { %p6301_p5 = pnand %p7366_p2, %p6299_p0  ;;  %p6305_p10 = scmp.lt.u32.totalorder %s6303_s20, %s6298_s14 }
 0x172   : > { %p6307_p12 = scmp.lt.u32.totalorder %s6298_s14, %s7352_s4 }
 0x173   : > { %p6302_p7 = pneg %p6301_p5  ;;  %p6306_p11 = por %p6305_p10, %p6304_p9 }
 0x175   : > { %p6308_p1 = por %p6307_p12, %p6306_p11 }
 0x177   : > { %p6309_p4 = pnand %p6308_p1, %p6302_p7 }
 0x179   : > { %6312 = shalt.err (!%p6309_p4)
}
 0x17a   : > { %s6313_s5 = scalar_lea.vmem %s7355_s6, 2048  ;;  %s6922_s28 = smov [#allocation5]  }
 0x17b   : > { %p6314_p3 = scmp.ne.s32.totalorder %s7355_s6, %s6313_s5  ;;  %s6318_s8 = sshll.u32 %s6922_s28, 4  ;;  %s6319_s8 = int_to_ptr.vmem [resolvable:$false] %s6318_s8 }
 0x17c   : > { %s6320_s21 = scalar_lea.vmem %s6319_s8, 4096  ;;  %p6321_p0 = scmp.lt.s32.totalorder %s7355_s6, %s6319_s8 }
 0x17d   : > { %p6316_p6 = pnand %p6314_p3, %p7366_p2  ;;  %p6322_p5 = scmp.lt.s32.totalorder %s6320_s21, %s6313_s5 }
 0x17f   : > { %p6317_p8 = pneg %p6316_p6  ;;  %p6323_p9 = por %p6322_p5, %p6321_p0 }
 0x181   : > { %p6324_p10 = pnand %p6323_p9, %p6317_p8 }
 0x183   : > { %6327 = shalt.err (!%p6324_p10)
}
 0x184   : > { %s8033_s14 = smov 128   ;;  %s8037_s20 = smov 8  }
 0x185   : > { %5451 = dma.hbm_to_vmem [thread:$0]  (!%p7345_p13), %s7352_s4, 2048, %s7355_s6, %s7360_s9, %s8033_s14, %s8033_s14, %s8037_s20  }
 0x186   : > { %s5163_s21 = sshll.u32 %s6874_s26, 5  ;;  %s8108_s28 = sshll.u32 %s7337_s13, 1 }
 0x187   : > { %s7391_s8 = scalar_lea.hbm %s6987_s29, %s5163_s21  ;;  %s1266_s5 = scalar_lea.vmem [#allocation8], %s8108_s28 }
 0x188   : > { %s1274_s17 = sshll.u32 %s1266_s5, 4  ;;  %s8109_s25 = sand.u32 1, %s6874_s26   ;;  %s1275_s17 = int_to_ptr.vmem [resolvable:$true] %s1274_s17 }
 0x189   : > { %s7397_s30 = scalar_lea.sflag [#allocation9], %s8109_s25  ;;  %s6328_s1 = scalar_lea.hbm %s7391_s8, 32 }
 0x18a   : > { %p6329_p6 = scmp.ne.s32.totalorder %s7391_s8, %s6328_s1  ;;  %s6333_s6 = scalar_lea.hbm %s6987_s29, 256 }
 0x18b   : > { %p6334_p7 = scmp.lt.u32.totalorder %s7391_s8, %s6987_s29  ;;  %p6335_p11 = scmp.lt.u32.totalorder %s6333_s6, %s6328_s1 }
 0x18c   : > { %p6331_p8 = pnand %p6329_p6, %p7366_p2  ;;  %p6337_p1 = scmp.lt.u32.totalorder %s6328_s1, %s7391_s8 }
 0x18d   : > { %p6336_p12 = por %p6335_p11, %p6334_p7 }
 0x18e   : > { %p6332_p3 = pneg %p6331_p8 }
 0x18f   : > { %p6338_p4 = por %p6337_p1, %p6336_p12 }
 0x191   : > { %p6339_p0 = pnand %p6338_p4, %p6332_p3 }
 0x193   : > { %6342 = shalt.err (!%p6339_p0)
}
 0x194   : > { %s6343_s4 = scalar_lea.vmem %s1275_s17, 32  ;;  %s6925_s25 = smov [#allocation8]  }
 0x195   : > { %p6344_p5 = scmp.ne.s32.totalorder %s1275_s17, %s6343_s4  ;;  %s6348_s21 = sshll.u32 %s6925_s25, 4  ;;  %s6349_s21 = int_to_ptr.vmem [resolvable:$false] %s6348_s21 }
 0x196   : > { %s6350_s28 = scalar_lea.vmem %s6349_s21, 64  ;;  %p6351_p6 = scmp.lt.s32.totalorder %s1275_s17, %s6349_s21 }
 0x197   : > { %p6346_p9 = pnand %p6344_p5, %p7366_p2  ;;  %p6352_p8 = scmp.lt.s32.totalorder %s6350_s28, %s6343_s4 }
 0x199   : > { %p6347_p10 = pneg %p6346_p9  ;;  %p6353_p13 = por %p6352_p8, %p6351_p6 }
 0x19b   : > { %p6354_p7 = pnand %p6353_p13, %p6347_p10 }
 0x19d   : > { %6357 = shalt.err (!%p6354_p7)
}
 0x19e   : > { %p8110_p11 = scmp.ne.s32.totalorder %s8106_s0, 0  ;;  %s6926_s1 = smov [#allocation13]  }
 0x19f   : > { %s936_s5 = sshll.u32 %s6926_s1, 4  ;;  %s6927_s6 = smov [#allocation16]   ;;  %s937_s5 = int_to_ptr.vmem [resolvable:$true] %s936_s5 }
 0x1a0   : > { %5457 = dma.hbm_to_vmem [thread:$0]  (!%p8110_p11), %s7391_s8, 32, %s1275_s17, %s7397_s30  }
 0x1a1   : > { %s961_s25 = sshll.u32 %s6927_s6, 4  ;;  %s6358_s14 = scalar_lea.hbm %s8085_s24, 16  ;;  %s962_s25 = int_to_ptr.vmem [resolvable:$true] %s961_s25 }
 0x1a2   : > { %p6359_p3 = scmp.ne.s32.totalorder %s8085_s24, %s6358_s14  ;;  %p8111_p12 = scmp.ne.s32.totalorder %s8102_s10, 0 }
 0x1a3   : > { %p6365_p4 = scmp.lt.u32.totalorder %s6358_s14, %s8085_s24 }
 0x1a4   : > { %p6361_p1 = pnand %p6359_p3, %p8111_p12 }
 0x1a6   : > { %p6362_p13 = pneg %p6361_p1 }
 0x1a8   : > { %p6367_p0 = pnand %p6365_p4, %p6362_p13 }
 0x1aa   : > { %6370 = shalt.err (!%p6367_p0)
}
 0x1ab   : > { %s6371_s4 = scalar_lea.vmem %s937_s5, 16  ;;  %s6378_s17 = scalar_lea.vmem %s937_s5, 32 }
 0x1ac   : > { %p6372_p5 = scmp.ne.s32.totalorder %s937_s5, %s6371_s4  ;;  %p6379_p6 = scmp.lt.s32.totalorder %s937_s5, %s937_s5 }
 0x1ad   : > { %p6380_p8 = scmp.lt.s32.totalorder %s6378_s17, %s6371_s4 }
 0x1ae   : > { %p6374_p9 = pnand %p6372_p5, %p8111_p12 }
 0x1af   : > { %p6381_p7 = por %p6380_p8, %p6379_p6 }
 0x1b0   : > { %p6375_p10 = pneg %p6374_p9 }
 0x1b2   : > { %p6382_p11 = pnand %p6381_p7, %p6375_p10 }
 0x1b4   : > { %6385 = shalt.err (!%p6382_p11)
}
 0x1b5   : > { %p8112_p2 = scmp.ne.s32.totalorder %s8101_s18, 0  ;;  %s6386_s14 = scalar_lea.hbm %s8086_s12, 16 }
 0x1b6   : > { %p6387_p3 = scmp.ne.s32.totalorder %s8086_s12, %s6386_s14  ;;  %p6393_p4 = scmp.lt.u32.totalorder %s6386_s14, %s8086_s12 }
 0x1b7   : > { %5381 = dma.hbm_to_vmem [thread:$0]  (!%p8112_p2), %s8085_s24, 16, %s937_s5, [#allocation12]  }
 0x1b8   : > { %p6389_p1 = pnand %p6387_p3, %p8111_p12 }
 0x1ba   : > { %p6390_p13 = pneg %p6389_p1 }
 0x1bc   : > { %p6395_p0 = pnand %p6393_p4, %p6390_p13 }
 0x1be   : > { %6398 = shalt.err (!%p6395_p0)
}
 0x1bf   : > { %s6399_s8 = scalar_lea.vmem %s962_s25, 16  ;;  %s6406_s21 = scalar_lea.vmem %s962_s25, 32 }
 0x1c0   : > { %p6400_p11 = scmp.ne.s32.totalorder %s962_s25, %s6399_s8  ;;  %p6407_p10 = scmp.lt.s32.totalorder %s962_s25, %s962_s25 }
 0x1c1   : > { %p6408_p6 = scmp.lt.s32.totalorder %s6406_s21, %s6399_s8 }
 0x1c2   : > { %p6402_p5 = pnand %p6400_p11, %p8111_p12 }
 0x1c3   : > { %p6409_p8 = por %p6408_p6, %p6407_p10 }
 0x1c4   : > { %p6403_p9 = pneg %p6402_p5 }
 0x1c6   : > { %p6410_p7 = pnand %p6409_p8, %p6403_p9 }
 0x1c8   : > { %6413 = shalt.err (!%p6410_p7)
}
 0x1c9   : > { %s8113_s28 = sld [smem:[#allocation76_spill]]  ;;  %s6928_s1 = smov [#allocation19]  }
 0x1ca   : > { %5387 = dma.hbm_to_vmem [thread:$0]  (!%p8112_p2), %s8086_s12, 16, %s962_s25, [#allocation15]  }
 0x1cb   : > { %s983_s5 = sshll.u32 %s6928_s1, 4  ;;  %s6929_s6 = smov [#allocation22]   ;;  %s984_s5 = int_to_ptr.vmem [resolvable:$true] %s983_s5 }
 0x1cc   : > { %s1008_s4 = sshll.u32 %s6929_s6, 4  ;;  %s1009_s4 = int_to_ptr.vmem [resolvable:$true] %s1008_s4 }
 0x1cf   : > { %s6414_s17 = scalar_lea.hbm %s8113_s28, 16 }
 0x1d0   : > { %p6415_p3 = scmp.ne.s32.totalorder %s8113_s28, %s6414_s17  ;;  %p6421_p4 = scmp.lt.u32.totalorder %s6414_s17, %s8113_s28 }
 0x1d2   : > { %p6417_p1 = pnand %p6415_p3, %p8111_p12 }
 0x1d4   : > { %p6418_p13 = pneg %p6417_p1 }
 0x1d6   : > { %p6423_p0 = pnand %p6421_p4, %p6418_p13 }
 0x1d8   : > { %6426 = shalt.err (!%p6423_p0)
}
 0x1d9   : > { %s6427_s14 = scalar_lea.vmem %s984_s5, 16  ;;  %s6434_s25 = scalar_lea.vmem %s984_s5, 32 }
 0x1da   : > { %p6428_p11 = scmp.ne.s32.totalorder %s984_s5, %s6427_s14  ;;  %p6435_p10 = scmp.lt.s32.totalorder %s984_s5, %s984_s5 }
 0x1db   : > { %p6436_p6 = scmp.lt.s32.totalorder %s6434_s25, %s6427_s14 }
 0x1dc   : > { %p6430_p5 = pnand %p6428_p11, %p8111_p12 }
 0x1dd   : > { %p6437_p8 = por %p6436_p6, %p6435_p10 }
 0x1de   : > { %p6431_p9 = pneg %p6430_p5 }
 0x1e0   : > { %p6438_p7 = pnand %p6437_p8, %p6431_p9 }
 0x1e2   : > { %6441 = shalt.err (!%p6438_p7)
}
 0x1e3   : > { %s8114_s8 = sld [smem:[#allocation79_spill]] }
 0x1e4   : > { %5393 = dma.hbm_to_vmem [thread:$0]  (!%p8112_p2), %s8113_s28, 16, %s984_s5, [#allocation18]  }
 0x1e9   : > { %s6442_s21 = scalar_lea.hbm %s8114_s8, 32 }
 0x1ea   : > { %p6443_p3 = scmp.ne.s32.totalorder %s8114_s8, %s6442_s21  ;;  %p6449_p4 = scmp.lt.u32.totalorder %s6442_s21, %s8114_s8 }
 0x1ec   : > { %p6445_p1 = pnand %p6443_p3, %p8111_p12 }
 0x1ee   : > { %p6446_p13 = pneg %p6445_p1 }
 0x1f0   : > { %p6451_p0 = pnand %p6449_p4, %p6446_p13 }
 0x1f2   : > { %6454 = shalt.err (!%p6451_p0)
}
 0x1f3   : > { %s6455_s1 = scalar_lea.vmem %s1009_s4, 32  ;;  %p6463_p10 = scmp.lt.s32.totalorder %s1009_s4, %s1009_s4 }
 0x1f4   : > { %p6456_p11 = scmp.ne.s32.totalorder %s1009_s4, %s6455_s1  ;;  %p6464_p6 = scmp.lt.s32.totalorder %s6455_s1, %s6455_s1 }
 0x1f6   : > { %p6458_p5 = pnand %p6456_p11, %p8111_p12  ;;  %p6465_p8 = por %p6464_p6, %p6463_p10 }
 0x1f8   : > { %p6459_p9 = pneg %p6458_p5 }
 0x1fa   : > { %p6466_p7 = pnand %p6465_p8, %p6459_p9 }
 0x1fc   : > { %6469 = shalt.err (!%p6466_p7)
}
 0x1fd   : > { %s8115_s5 = sld [smem:[#allocation81_spill]]  ;;  %s6930_s6 = smov [#allocation25]  }
 0x1fe   : > { %5399 = dma.hbm_to_vmem [thread:$0]  (!%p8112_p2), %s8114_s8, 32, %s1009_s4, [#allocation21]  }
 0x1ff   : > { %s1029_s17 = sshll.u32 %s6930_s6, 4  ;;  %s1030_s17 = int_to_ptr.vmem [resolvable:$true] %s1029_s17 }
 0x203   : > { %s6470_s14 = scalar_lea.hbm %s8115_s5, 8192 }
 0x204   : > { %p6471_p3 = scmp.ne.s32.totalorder %s8115_s5, %s6470_s14  ;;  %p6477_p4 = scmp.lt.u32.totalorder %s6470_s14, %s8115_s5 }
 0x206   : > { %p6473_p1 = pnand %p6471_p3, %p8111_p12 }
 0x208   : > { %p6474_p13 = pneg %p6473_p1 }
 0x20a   : > { %p6479_p0 = pnand %p6477_p4, %p6474_p13 }
 0x20c   : > { %6482 = shalt.err (!%p6479_p0)
}
 0x20d   : > { %s6483_s25 = scalar_lea.vmem %s1030_s17, 8192  ;;  %p6491_p10 = scmp.lt.s32.totalorder %s1030_s17, %s1030_s17 }
 0x20e   : > { %p6484_p11 = scmp.ne.s32.totalorder %s1030_s17, %s6483_s25  ;;  %p6492_p6 = scmp.lt.s32.totalorder %s6483_s25, %s6483_s25 }
 0x210   : > { %p6486_p5 = pnand %p6484_p11, %p8111_p12  ;;  %p6493_p8 = por %p6492_p6, %p6491_p10 }
 0x212   : > { %p6487_p9 = pneg %p6486_p5 }
 0x214   : > { %p6494_p7 = pnand %p6493_p8, %p6487_p9 }
 0x216   : > { %6497 = shalt.err (!%p6494_p7)
}
 0x217   : > { %s6931_s4 = smov 256   ;;  %s8116_s21 = sld [smem:[#allocation83_spill]] }
 0x218   : > { %s6932_s1 = smov 16   ;;  %s6933_s6 = smov [#allocation28]  }
 0x219   : > { %5405 = dma.hbm_to_vmem [thread:$0]  (!%p8112_p2), %s8115_s5, 8192, %s1030_s17, [#allocation24], %s6931_s4, %s6931_s4, %s6932_s1  }
 0x21a   : > { %s1054_s14 = sshll.u32 %s6933_s6, 4  ;;  %s6934_s20 = smov [#allocation31]   ;;  %s1055_s14 = int_to_ptr.vmem [resolvable:$true] %s1054_s14 }
 0x21b   : > { %s1075_s8 = sshll.u32 %s6934_s20, 4  ;;  %s7463_s8 = int_to_ptr.vmem [resolvable:$true] %s1075_s8 }
 0x21d   : > { %s6498_s25 = scalar_lea.hbm %s8116_s21, 64 }
 0x21e   : > { %p6499_p3 = scmp.ne.s32.totalorder %s8116_s21, %s6498_s25  ;;  %p6505_p4 = scmp.lt.u32.totalorder %s6498_s25, %s8116_s21 }
 0x220   : > { %p6501_p1 = pnand %p6499_p3, %p8111_p12 }
 0x222   : > { %p6502_p13 = pneg %p6501_p1 }
 0x224   : > { %p6507_p0 = pnand %p6505_p4, %p6502_p13 }
 0x226   : > { %6510 = shalt.err (!%p6507_p0)
}
 0x227   : > { %s6511_s12 = scalar_lea.vmem %s1055_s14, 64  ;;  %p6519_p10 = scmp.lt.s32.totalorder %s1055_s14, %s1055_s14 }
 0x228   : > { %p6512_p11 = scmp.ne.s32.totalorder %s1055_s14, %s6511_s12  ;;  %p6520_p6 = scmp.lt.s32.totalorder %s6511_s12, %s6511_s12 }
 0x22a   : > { %p6514_p5 = pnand %p6512_p11, %p8111_p12  ;;  %p6521_p8 = por %p6520_p6, %p6519_p10 }
 0x22c   : > { %p6515_p9 = pneg %p6514_p5 }
 0x22e   : > { %p6522_p7 = pnand %p6521_p8, %p6515_p9 }
 0x230   : > { %6525 = shalt.err (!%p6522_p7)
}
 0x231   : > { %s8117_s20 = sld [smem:[#allocation85_spill]] }
 0x232   : > { %5411 = dma.hbm_to_vmem [thread:$0]  (!%p8112_p2), %s8116_s21, 64, %s1055_s14, [#allocation27]  }
 0x237   : > { %s6526_s17 = scalar_lea.hbm %s8117_s20, 8192 }
 0x238   : > { %p6527_p3 = scmp.ne.s32.totalorder %s8117_s20, %s6526_s17  ;;  %p6533_p4 = scmp.lt.u32.totalorder %s6526_s17, %s8117_s20 }
 0x23a   : > { %p6529_p1 = pnand %p6527_p3, %p8111_p12 }
 0x23c   : > { %p6530_p13 = pneg %p6529_p1 }
 0x23e   : > { %p6535_p0 = pnand %p6533_p4, %p6530_p13 }
 0x240   : > { %6538 = shalt.err (!%p6535_p0)
}
 0x241   : > { %s6539_s12 = scalar_lea.vmem %s7463_s8, 8192  ;;  %p6547_p10 = scmp.lt.s32.totalorder %s7463_s8, %s7463_s8 }
 0x242   : > { %p6540_p11 = scmp.ne.s32.totalorder %s7463_s8, %s6539_s12  ;;  %p6548_p6 = scmp.lt.s32.totalorder %s6539_s12, %s6539_s12 }
 0x244   : > { %p6542_p5 = pnand %p6540_p11, %p8111_p12  ;;  %p6549_p8 = por %p6548_p6, %p6547_p10 }
 0x246   : > { %p6543_p9 = pneg %p6542_p5 }
 0x248   : > { %p6550_p7 = pnand %p6549_p8, %p6543_p9 }
 0x24a   : > { %6553 = shalt.err (!%p6550_p7)
}
 0x24b   : > { %s8118_s4 = smov 8   ;;  %s8119_s1 = smov 128  }
 0x24c   : > { %s8120_s6 = sld [smem:[#allocation87_spill]]  ;;  %s6935_s14 = smov [#allocation34]  }
 0x24d   : > { %5417 = dma.hbm_to_vmem [thread:$0]  (!%p8112_p2), %s8117_s20, 8192, %s7463_s8, [#allocation30], %s8119_s1, %s8119_s1, %s8118_s4  }
 0x24e   : > { %s1100_s25 = sshll.u32 %s6935_s14, 4  ;;  %s6936_s17 = smov [#allocation37]   ;;  %s1101_s25 = int_to_ptr.vmem [resolvable:$true] %s1100_s25 }
 0x24f   : > { %s1121_s5 = sshll.u32 %s6936_s17, 4  ;;  %s7493_s5 = int_to_ptr.vmem [resolvable:$true] %s1121_s5 }
 0x252   : > { %s6554_s12 = scalar_lea.hbm %s8120_s6, 32 }
 0x253   : > { %p6555_p3 = scmp.ne.s32.totalorder %s8120_s6, %s6554_s12  ;;  %p6561_p4 = scmp.lt.u32.totalorder %s6554_s12, %s8120_s6 }
 0x255   : > { %p6557_p1 = pnand %p6555_p3, %p8111_p12 }
 0x257   : > { %p6558_p13 = pneg %p6557_p1 }
 0x259   : > { %p6563_p0 = pnand %p6561_p4, %p6558_p13 }
 0x25b   : > { %6566 = shalt.err (!%p6563_p0)
}
 0x25c   : > { %s6567_s21 = scalar_lea.vmem %s1101_s25, 32  ;;  %p6575_p10 = scmp.lt.s32.totalorder %s1101_s25, %s1101_s25 }
 0x25d   : > { %p6568_p11 = scmp.ne.s32.totalorder %s1101_s25, %s6567_s21  ;;  %p6576_p6 = scmp.lt.s32.totalorder %s6567_s21, %s6567_s21 }
 0x25f   : > { %p6570_p5 = pnand %p6568_p11, %p8111_p12  ;;  %p6577_p8 = por %p6576_p6, %p6575_p10 }
 0x261   : > { %p6571_p9 = pneg %p6570_p5 }
 0x263   : > { %p6578_p7 = pnand %p6577_p8, %p6571_p9 }
 0x265   : > { %6581 = shalt.err (!%p6578_p7)
}
 0x266   : > { %s8121_s8 = sld [smem:[#allocation89_spill]] }
 0x267   : > { %5423 = dma.hbm_to_vmem [thread:$0]  (!%p8112_p2), %s8120_s6, 32, %s1101_s25, [#allocation33]  }
 0x26c   : > { %s6582_s14 = scalar_lea.hbm %s8121_s8, 2048 }
 0x26d   : > { %p6583_p3 = scmp.ne.s32.totalorder %s8121_s8, %s6582_s14  ;;  %p6589_p4 = scmp.lt.u32.totalorder %s6582_s14, %s8121_s8 }
 0x26f   : > { %p6585_p1 = pnand %p6583_p3, %p8111_p12 }
 0x271   : > { %p6586_p13 = pneg %p6585_p1 }
 0x273   : > { %p6591_p0 = pnand %p6589_p4, %p6586_p13 }
 0x275   : > { %6594 = shalt.err (!%p6591_p0)
}
 0x276   : > { %s6595_s21 = scalar_lea.vmem %s7493_s5, 2048  ;;  %p6603_p10 = scmp.lt.s32.totalorder %s7493_s5, %s7493_s5 }
 0x277   : > { %p6596_p11 = scmp.ne.s32.totalorder %s7493_s5, %s6595_s21  ;;  %p6604_p6 = scmp.lt.s32.totalorder %s6595_s21, %s6595_s21 }
 0x279   : > { %p6598_p5 = pnand %p6596_p11, %p8111_p12  ;;  %p6605_p8 = por %p6604_p6, %p6603_p10 }
 0x27b   : > { %p6599_p9 = pneg %p6598_p5 }
 0x27d   : > { %p6606_p7 = pnand %p6605_p8, %p6599_p9 }
 0x27f   : > { %6609 = shalt.err (!%p6606_p7)
}
 0x280   : > { %s8047_s25 = smov 64   ;;  %s8122_s17 = sld [smem:[#allocation91_spill]] }
 0x281   : > { %s8048_s12 = smov 4   ;;  %s6939_s14 = smov [#allocation40]  }
 0x282   : > { %5429 = dma.hbm_to_vmem [thread:$0]  (!%p8112_p2), %s8121_s8, 2048, %s7493_s5, [#allocation36], %s8047_s25, %s8047_s25, %s8048_s12  }
 0x283   : > { %s1146_s6 = sshll.u32 %s6939_s14, 4  ;;  %s6940_s21 = smov [#allocation43]   ;;  %s1147_s6 = int_to_ptr.vmem [resolvable:$true] %s1146_s6 }
 0x284   : > { %s1167_s20 = sshll.u32 %s6940_s21, 4  ;;  %s7523_s20 = int_to_ptr.vmem [resolvable:$true] %s1167_s20 }
 0x286   : > { %s6610_s24 = scalar_lea.hbm %s8122_s17, 16 }
 0x287   : > { %p6611_p3 = scmp.ne.s32.totalorder %s8122_s17, %s6610_s24  ;;  %p6617_p4 = scmp.lt.u32.totalorder %s6610_s24, %s8122_s17 }
 0x289   : > { %p6613_p1 = pnand %p6611_p3, %p8111_p12 }
 0x28b   : > { %p6614_p13 = pneg %p6613_p1 }
 0x28d   : > { %p6619_p0 = pnand %p6617_p4, %p6614_p13 }
 0x28f   : > { %6622 = shalt.err (!%p6619_p0)
}
 0x290   : > { %s6623_s28 = scalar_lea.vmem %s1147_s6, 16  ;;  %s6630_s5 = scalar_lea.vmem %s1147_s6, 32 }
 0x291   : > { %p6624_p11 = scmp.ne.s32.totalorder %s1147_s6, %s6623_s28  ;;  %p6631_p10 = scmp.lt.s32.totalorder %s1147_s6, %s1147_s6 }
 0x292   : > { %p6632_p6 = scmp.lt.s32.totalorder %s6630_s5, %s6623_s28 }
 0x293   : > { %p6626_p5 = pnand %p6624_p11, %p8111_p12 }
 0x294   : > { %p6633_p8 = por %p6632_p6, %p6631_p10 }
 0x295   : > { %p6627_p9 = pneg %p6626_p5 }
 0x297   : > { %p6634_p7 = pnand %p6633_p8, %p6627_p9 }
 0x299   : > { %6637 = shalt.err (!%p6634_p7)
}
 0x29a   : > { %5435 = dma.hbm_to_vmem [thread:$0]  (!%p8112_p2), %s8122_s17, 16, %s1147_s6, [#allocation39]  }
 0x29b   : > { %s6638_s24 = scalar_lea.hbm %s8084_s3, 1024 }
 0x29c   : > { %p6639_p3 = scmp.ne.s32.totalorder %s8084_s3, %s6638_s24  ;;  %p6645_p4 = scmp.lt.u32.totalorder %s6638_s24, %s8084_s3 }
 0x29e   : > { %p6641_p1 = pnand %p6639_p3, %p8111_p12 }
 0x2a0   : > { %p6642_p13 = pneg %p6641_p1 }
 0x2a2   : > { %p6647_p0 = pnand %p6645_p4, %p6642_p13 }
 0x2a4   : > { %6650 = shalt.err (!%p6647_p0)
}
 0x2a5   : > { %s6651_s28 = scalar_lea.vmem %s7523_s20, 1024  ;;  %p6659_p10 = scmp.lt.s32.totalorder %s7523_s20, %s7523_s20 }
 0x2a6   : > { %p6652_p11 = scmp.ne.s32.totalorder %s7523_s20, %s6651_s28  ;;  %p6660_p6 = scmp.lt.s32.totalorder %s6651_s28, %s6651_s28 }
 0x2a8   : > { %p6654_p5 = pnand %p6652_p11, %p8111_p12  ;;  %p6661_p8 = por %p6660_p6, %p6659_p10 }
 0x2aa   : > { %p6655_p9 = pneg %p6654_p5 }
 0x2ac   : > { %p6662_p7 = pnand %p6661_p8, %p6655_p9 }
 0x2ae   : > { %6665 = shalt.err (!%p6662_p7)
}
 0x2af   : > { %s8123_s6 = sld [smem:[#allocation63_spill]]  ;;  %s6941_s14 = smov [#allocation44]  }
 0x2b0   : > { %5441 = dma.hbm_to_vmem [thread:$0]  (!%p8112_p2), %s8084_s3, 1024, %s7523_s20, [#allocation42], %s8047_s25, %s8047_s25, %s8048_s12  }
 0x2b1   : > { %s1181_s21 = sshll.u32 %s6941_s14, 4  ;;  %s6666_s24 = scalar_lea.hbm %s7127_s27, 16  ;;  %s1182_s21 = int_to_ptr.vmem [resolvable:$true] %s1181_s21 }
 0x2b2   : > { %p6667_p3 = scmp.ne.s32.totalorder %s7127_s27, %s6666_s24  ;;  %p6673_p4 = scmp.lt.u32.totalorder %s6666_s24, %s7127_s27 }
 0x2b4   : > { %p6669_p1 = pnand %p6667_p3, %p8111_p12 }
 0x2b5   : > { %s7555_s5 = scalar_lea.hbm %s8123_s6, %s7343_s11 }
 0x2b6   : > { %p6670_p13 = pneg %p6669_p1 }
 0x2b8   : > { %p6675_p0 = pnand %p6673_p4, %p6670_p13 }
 0x2ba   : > { %6678 = shalt.err (!%p6675_p0)
}
 0x2bb   : > { %s6679_s28 = scalar_lea.vmem %s1182_s21, 16  ;;  %s6686_s20 = scalar_lea.vmem %s1182_s21, 32 }
 0x2bc   : > { %p6680_p11 = scmp.ne.s32.totalorder %s1182_s21, %s6679_s28  ;;  %p6687_p10 = scmp.lt.s32.totalorder %s1182_s21, %s1182_s21 }
 0x2bd   : > { %p6688_p6 = scmp.lt.s32.totalorder %s6686_s20, %s6679_s28 }
 0x2be   : > { %p6682_p5 = pnand %p6680_p11, %p8111_p12 }
 0x2bf   : > { %p6689_p8 = por %p6688_p6, %p6687_p10 }
 0x2c0   : > { %p6683_p9 = pneg %p6682_p5 }
 0x2c2   : > { %p6690_p7 = pnand %p6689_p8, %p6683_p9 }
 0x2c4   : > { %6693 = shalt.err (!%p6690_p7)
}
 0x2c5   : > { %5444 = dma.hbm_to_vmem [thread:$0]  (!%p8112_p2), %s7127_s27, 16, %s1182_s21, [#allocation45]  }
 0x2c6   : > { %s1196_s10 = scalar_lea.vmem [#allocation3], %s7340_s7  ;;  %s4846_s24 = sshll.u32 %s7337_s13, 8 }
 0x2c7   : > { %s1203_s14 = sshll.u32 %s1196_s10, 4  ;;  %s1193_s28 = scalar_lea.sflag [#allocation4], %s7337_s13  ;;  %s7569_s14 = int_to_ptr.vmem [resolvable:$true] %s1203_s14 }
 0x2c8   : > { %s6694_s20 = scalar_lea.hbm %s7555_s5, 2048  ;;  %p8124_p3 = scmp.ne.s32.totalorder %s8107_s19, 0 }
 0x2c9   : > { %p6695_p12 = scmp.ne.s32.totalorder %s7555_s5, %s6694_s20  ;;  %s6699_s18 = scalar_lea.hbm %s8123_s6, 16384 }
 0x2ca   : > { %p6700_p4 = scmp.lt.u32.totalorder %s7555_s5, %s8123_s6  ;;  %p6701_p0 = scmp.lt.u32.totalorder %s6699_s18, %s6694_s20 }
 0x2cb   : > { %p6697_p1 = pnand %p6695_p12, %p8124_p3  ;;  %p6703_p5 = scmp.lt.u32.totalorder %s6694_s20, %s7555_s5 }
 0x2cc   : > { %p6702_p11 = por %p6701_p0, %p6700_p4 }
 0x2cd   : > { %p6698_p13 = pneg %p6697_p1 }
 0x2ce   : > { %p6704_p9 = por %p6703_p5, %p6702_p11 }
 0x2d0   : > { %p6705_p10 = pnand %p6704_p9, %p6698_p13 }
 0x2d2   : > { %6708 = shalt.err (!%p6705_p10)
}
 0x2d3   : > { %s6709_s21 = scalar_lea.vmem %s7569_s14, 2048  ;;  %s6942_s10 = smov [#allocation3]  }
 0x2d4   : > { %p6710_p2 = scmp.ne.s32.totalorder %s7569_s14, %s6709_s21  ;;  %s6714_s25 = sshll.u32 %s6942_s10, 4  ;;  %s6715_s25 = int_to_ptr.vmem [resolvable:$false] %s6714_s25 }
 0x2d5   : > { %s6716_s12 = scalar_lea.vmem %s6715_s25, 4096  ;;  %p6717_p7 = scmp.lt.s32.totalorder %s7569_s14, %s6715_s25 }
 0x2d6   : > { %p6712_p6 = pnand %p6710_p2, %p8124_p3  ;;  %p6718_p12 = scmp.lt.s32.totalorder %s6716_s12, %s6709_s21 }
 0x2d8   : > { %p6713_p8 = pneg %p6712_p6  ;;  %p6719_p1 = por %p6718_p12, %p6717_p7 }
 0x2da   : > { %p6720_p4 = pnand %p6719_p1, %p6713_p8 }
 0x2dc   : > { %6723 = shalt.err (!%p6720_p4)
}
 0x2dd   : > { %p8125_p13 = scmp.ne.s32.totalorder %s8106_s0, 0  ;;  %s8126_s20 = sld [smem:[#allocation66_spill]] }
 0x2de   : > { %s5162_s25 = sshll.u32 %s6874_s26, 12  ;;  %s1245_s12 = scalar_lea.vmem [#allocation7], %s4846_s24 }
 0x2df   : > { %5448 = dma.hbm_to_vmem [thread:$0]  (!%p8125_p13), %s7555_s5, 2048, %s7569_s14, %s1193_s28, %s8119_s1, %s8119_s1, %s8118_s4  }
 0x2e0   : > { %s1252_s18 = sshll.u32 %s1245_s12, 4  ;;  %s7600_s18 = int_to_ptr.vmem [resolvable:$true] %s1252_s18 }
 0x2e3   : > { %s7598_s21 = scalar_lea.hbm %s8126_s20, %s5162_s25  ;;  %s6729_s3 = scalar_lea.hbm %s8126_s20, 32768 }
 0x2e4   : > { %s6724_s10 = scalar_lea.hbm %s7598_s21, 4096  ;;  %p6730_p9 = scmp.lt.u32.totalorder %s7598_s21, %s8126_s20 }
 0x2e5   : > { %p6725_p0 = scmp.ne.s32.totalorder %s7598_s21, %s6724_s10  ;;  %p6731_p10 = scmp.lt.u32.totalorder %s6729_s3, %s6724_s10 }
 0x2e6   : > { %p6733_p6 = scmp.lt.u32.totalorder %s6724_s10, %s7598_s21 }
 0x2e7   : > { %p6727_p11 = pnand %p6725_p0, %p8124_p3  ;;  %p6732_p2 = por %p6731_p10, %p6730_p9 }
 0x2e9   : > { %p6728_p5 = pneg %p6727_p11  ;;  %p6734_p8 = por %p6733_p6, %p6732_p2 }
 0x2eb   : > { %p6735_p7 = pnand %p6734_p8, %p6728_p5 }
 0x2ed   : > { %6738 = shalt.err (!%p6735_p7)
}
 0x2ee   : > { %s6739_s26 = scalar_lea.vmem %s7600_s18, 4096  ;;  %s6943_s13 = smov [#allocation7]  }
 0x2ef   : > { %p6740_p12 = scmp.ne.s32.totalorder %s7600_s18, %s6739_s26  ;;  %s6744_s5 = sshll.u32 %s6943_s13, 4  ;;  %s6745_s5 = int_to_ptr.vmem [resolvable:$false] %s6744_s5 }
 0x2f0   : > { %s6746_s14 = scalar_lea.vmem %s6745_s5, 8192  ;;  %p6747_p0 = scmp.lt.s32.totalorder %s7600_s18, %s6745_s5 }
 0x2f1   : > { %p6742_p1 = pnand %p6740_p12, %p8124_p3  ;;  %p6748_p11 = scmp.lt.s32.totalorder %s6746_s14, %s6739_s26 }
 0x2f3   : > { %p6743_p4 = pneg %p6742_p1  ;;  %p6749_p9 = por %p6748_p11, %p6747_p0 }
 0x2f5   : > { %p6750_p10 = pnand %p6749_p9, %p6743_p4 }
 0x2f7   : > { %6753 = shalt.err (!%p6750_p10)
}
 0x2f8   : > { %s8127_s3 = sld [smem:[#allocation67_spill]]  ;;  %s1285_s28 = scalar_lea.vmem [#allocation10], %s7340_s7 }
 0x2f9   : > { %5454 = dma.hbm_to_vmem [thread:$0]  (!%p8125_p13), %s7598_s21, 4096, %s7600_s18, %s7360_s9, %s8119_s1, %s8119_s1, %s8118_s4  }
 0x2fa   : > { %s1292_s25 = sshll.u32 %s1285_s28, 4  ;;  %s7628_s25 = int_to_ptr.vmem [resolvable:$true] %s1292_s25 }
 0x2fe   : > { %s7625_s24 = scalar_lea.hbm %s8127_s3, %s7343_s11  ;;  %s6759_s10 = scalar_lea.hbm %s8127_s3, 16384 }
 0x2ff   : > { %s6754_s12 = scalar_lea.hbm %s7625_s24, 2048  ;;  %p6760_p8 = scmp.lt.u32.totalorder %s7625_s24, %s8127_s3 }
 0x300   : > { %p6755_p5 = scmp.ne.s32.totalorder %s7625_s24, %s6754_s12  ;;  %p6761_p7 = scmp.lt.u32.totalorder %s6759_s10, %s6754_s12 }
 0x301   : > { %p6763_p1 = scmp.lt.u32.totalorder %s6754_s12, %s7625_s24 }
 0x302   : > { %p6757_p2 = pnand %p6755_p5, %p8124_p3  ;;  %p6762_p12 = por %p6761_p7, %p6760_p8 }
 0x304   : > { %p6758_p6 = pneg %p6757_p2  ;;  %p6764_p4 = por %p6763_p1, %p6762_p12 }
 0x306   : > { %p6765_p0 = pnand %p6764_p4, %p6758_p6 }
 0x308   : > { %6768 = shalt.err (!%p6765_p0)
}
 0x309   : > { %s6769_s9 = scalar_lea.vmem %s7628_s25, 2048  ;;  %s6944_s7 = smov [#allocation10]  }
 0x30a   : > { %p6770_p11 = scmp.ne.s32.totalorder %s7628_s25, %s6769_s9  ;;  %s6774_s11 = sshll.u32 %s6944_s7, 4  ;;  %s6775_s11 = int_to_ptr.vmem [resolvable:$false] %s6774_s11 }
 0x30b   : > { %s6776_s4 = scalar_lea.vmem %s6775_s11, 4096  ;;  %p6777_p5 = scmp.lt.s32.totalorder %s7628_s25, %s6775_s11 }
 0x30c   : > { %p6772_p9 = pnand %p6770_p11, %p8124_p3  ;;  %p6778_p2 = scmp.lt.s32.totalorder %s6776_s4, %s6769_s9 }
 0x30e   : > { %p6773_p10 = pneg %p6772_p9  ;;  %p6779_p8 = por %p6778_p2, %p6777_p5 }
 0x310   : > { %p6780_p7 = pnand %p6779_p8, %p6773_p10 }
 0x312   : > { %6783 = shalt.err (!%p6780_p7)
}
 0x313   : > { %s8128_s1 = smov 4   ;;  %s8129_s18 = smov 64  }
 0x314   : > { %5460 = dma.hbm_to_vmem [thread:$0]  (!%p8125_p13), %s7625_s24, 2048, %s7628_s25, %s7397_s30, %s8129_s18, %s8129_s18, %s8128_s1  }
 0x315   : > { %s8130_s19 = sld [smem:[#allocation95_spill]] }
 0x31b   : > { %p8131_p3 = scmp.ne.s32.totalorder %s8130_s19, 0 }
 0x31c   : > { %s1312_s21 = sand.u32 (!%p8131_p3), 1, %s6866_s22   ;;  %p8132_p6 = scmp.ne.s32.totalorder (!%p8131_p3), %s8105_s15, 0 }
 0x31d   : > { %1310 = sbr.rel (%p8131_p3) target bundleno = 3439 (0xd6f), region = 160  ;;  %s4856_s26 = sshll.u32 (!%p8131_p3), %s1312_s21, 7 }
 0x31e   : > { %s1313_s13 = scalar_lea.sflag (!%p8131_p3), [#allocation4], %s1312_s21  ;;  %s7654_s5 = scalar_lea.vmem (!%p8131_p3), [#allocation3], %s4856_s26 }
 0x324   : > { %6801 = dma.done.wait (%p8132_p6), %s1313_s13, 2048  }
 0x325   : > { %6803 = vsyncadd (%p8132_p6), %s1313_s13, 4294965248  ;;  %s1321_s0 = sand.u32 1, %s7155_s2   ;;  %s7661_s30 = scalar_lea.vmem [#allocation5], %s4856_s26 }
 0x326   : > { %s1322_s14 = scalar_lea.sflag [#allocation6], %s1321_s0 }
 0x327   : > { %6805 = dma.done.wait (%p8132_p6), %s1322_s14, 6144  }
 0x328   : > { %6807 = vsyncadd (%p8132_p6), %s1322_s14, 4294961152  ;;  %s4858_s24 = sshll.u32 %s1312_s21, 8  ;;  %s4859_s28 = sshll.u32 %s1312_s21, 1 }
 0x329   : > { %s7667_s25 = scalar_lea.vmem [#allocation7], %s4858_s24  ;;  %s1340_s12 = scalar_lea.sflag [#allocation9], %s1321_s0 }
 0x32a   : > { %s7669_s10 = scalar_lea.vmem [#allocation8], %s4859_s28 }
 0x32b   : > { %6809 = dma.done.wait (%p8132_p6), %s1340_s12, 2080  }
 0x32c   : > { %6811 = vsyncadd (%p8132_p6), %s1340_s12, 4294965216  ;;  %s7675_s9 = scalar_lea.vmem [#allocation10], %s4856_s26  ;;  %p8133_p13 = scmp.eq.s32.totalorder %s7155_s2, 0 }
 0x32e   : > { %6813 = dma.done.wait (%p8133_p13), [#allocation12], 80   ;;  %p8134_p12 = pmov %p8133_p13 }
 0x330   : > { %6815 = vsyncadd (%p8134_p12), [#allocation12], 4294967216  ;;  %p8135_p1 = pmov %p8134_p12 }
 0x332   : > { %6817 = dma.done.wait (%p8135_p1), [#allocation15], 32   ;;  %p8136_p4 = pmov %p8135_p1 }
 0x333   : > { %p8137_p0 = pmov %p8135_p1 }
 0x334   : > { %6819 = vsyncadd (%p8136_p4), [#allocation15], 4294967264 }
 0x335   : > { %6821 = dma.done.wait (%p8137_p0), [#allocation18], 32   ;;  %p8138_p11 = pmov %p8137_p0 }
 0x336   : > { %p8139_p9 = pmov %p8137_p0 }
 0x337   : > { %6823 = vsyncadd (%p8138_p11), [#allocation18], 4294967264 }
 0x338   : > { %6825 = dma.done.wait (%p8139_p9), [#allocation21], 64   ;;  %p8140_p10 = pmov %p8137_p0 }
 0x339   : > { %p8141_p5 = pmov %p8137_p0 }
 0x33a   : > { %6827 = vsyncadd (%p8140_p10), [#allocation21], 4294967232 }
 0x33b   : > { %6829 = dma.done.wait (%p8141_p5), [#allocation24], 8224   ;;  %p8142_p2 = pmov %p8137_p0 }
 0x33c   : > { %p8143_p8 = pmov %p8137_p0 }
 0x33d   : > { %6831 = vsyncadd (%p8142_p2), [#allocation24], 4294959072 }
 0x33e   : > { %6833 = dma.done.wait (%p8143_p8), [#allocation27], 128   ;;  %p8144_p7 = pmov %p8137_p0 }
 0x33f   : > { %p8145_p3 = pmov %p8137_p0 }
 0x340   : > { %6835 = vsyncadd (%p8144_p7), [#allocation27], 4294967168 }
 0x341   : > { %6837 = dma.done.wait (%p8145_p3), [#allocation30], 8256   ;;  %p8146_p6 = pmov %p8137_p0 }
 0x342   : > { %p8147_p13 = pmov %p8137_p0 }
 0x343   : > { %6839 = vsyncadd (%p8146_p6), [#allocation30], 4294959040 }
 0x344   : > { %6841 = dma.done.wait (%p8147_p13), [#allocation33], 64   ;;  %p8148_p12 = pmov %p8137_p0 }
 0x345   : > { %p8149_p1 = pmov %p8137_p0 }
 0x346   : > { %6843 = vsyncadd (%p8148_p12), [#allocation33], 4294967232 }
 0x347   : > { %6845 = dma.done.wait (%p8149_p1), [#allocation36], 2080   ;;  %p8150_p4 = pmov %p8137_p0 }
 0x349   : > { %6847 = vsyncadd (%p8150_p4), [#allocation36], 4294965216 }
 0x34a   : > { %6849 = dma.done.wait (%p8137_p0), [#allocation39], 32   ;;  %p8151_p11 = pmov %p8137_p0 }
 0x34b   : > { %p8152_p9 = pmov %p8137_p0 }
 0x34c   : > { %6851 = vsyncadd (%p8151_p11), [#allocation39], 4294967264 }
 0x34d   : > { %6853 = dma.done.wait (%p8152_p9), [#allocation42], 1040   ;;  %p8153_p10 = pmov %p8137_p0 }
 0x34e   : > { %p8154_p5 = pmov %p8137_p0 }
 0x34f   : > { %6855 = vsyncadd (%p8153_p10), [#allocation42], 4294966256 }
 0x350   : > { %6857 = dma.done.wait (%p8154_p5), [#allocation45], 16   ;;  %p8155_p2 = pmov %p8137_p0 }
 0x351   : > { %s8156_s15 = sld [smem:[#allocation68_spill]]  ;;  %s8157_s7 = sld [smem:[#allocation65_spill]] }
 0x352   : > { %6859 = vsyncadd (%p8155_p2), [#allocation45], 4294967280  ;;  %s8158_s11 = sld [smem:[#allocation94_spill]]  ;;  %p1557_p8 = scmp.lt.s32.totalorder %s7155_s2, 7 }
 0x353   : > { %p8159_p7 = scmp.ne.s32.totalorder %s7155_s2, 0 }
 0x354   : > { %s7727_s4 = scalar_select %p1557_p8, %s7155_s2, 7 }
 0x355   : > { %1572 = sbr.rel (%p8159_p7) target bundleno = 860 (0x35c), region = 276  ;;  %v6945_v0 = vmov (!%p8159_p7), 0.0  }
 0x356   : > { %s4884_s1 = sshll.u32 %s7727_s4, 1  ;;  %1573 = vst [vmem:[#allocation2] sm:$0x3] (!%p8159_p7), %v6945_v0 }
 0x357   : > { %s1563_s18 = scalar_lea.vmem %s8156_s15, %s7727_s4  ;;  %s7733_s19 = scalar_lea.vmem %s8157_s7, %s4884_s1 }
 0x358   : > { %s7736_s21 = scalar_lea.vmem %s8158_s11, %s4884_s1 }
 0x35c PF: > { %v5608_v1 = vld [vmem:[%s7661_s30 + $0x4] ss:$8 sps:$4 sm:$0xff]   ;;  %v6946_v3 = vmov 0   ;;  %v5612_v4 = vld [vmem:[%s7661_s30] ss:$8 sps:$4 sm:$0xff]   ;;  %s8160_s2 = sld [smem:[#allocation61_spill]] }
 0x35d   : > { %v5610_v2 = vld [vmem:[%s7654_s5 + $0x4] ss:$8 sps:$4 sm:$0xff]   ;;  %1722 = vmatprep.mubr.bf16.mxu0 %v6946_v3  ;;  %1843 = vmatprep.mubr.bf16.mxu1 %v6946_v3  ;;  %v5613_v5 = vld [vmem:[%s7654_s5] ss:$8 sps:$4 sm:$0xff]   ;;  %v5614_v6 = vld [vmem:[%s7661_s30 + $0x14] ss:$8 sps:$4 sm:$0xff]  }
 0x35e   : > { %1690 = vmatprep.subr.bf16.mxu0 %v5608_v1  ;;  %1811 = vmatprep.subr.bf16.mxu1 %v5610_v2  ;;  %v5616_v7 = vld [vmem:[%s7654_s5 + $0x14] ss:$8 sps:$4 sm:$0xff]   ;;  %v5618_v8 = vld [vmem:[%s7661_s30 + $0x10] ss:$8 sps:$4 sm:$0xff]   ;;  %v5620_v10 = vld [vmem:[%s7661_s30 + $0x24] ss:$8 sps:$4 sm:$0xff]  }
 0x35f   : > { %1691 = vmatpush1.bf16.msra.mxu0 %v5612_v4  ;;  %1812 = vmatpush1.bf16.msra.mxu1 %v5613_v5  ;;  %v5619_v9 = vld [vmem:[%s7654_s5 + $0x10] ss:$8 sps:$4 sm:$0xff]   ;;  %v5622_v11 = vld [vmem:[%s7654_s5 + $0x24] ss:$8 sps:$4 sm:$0xff]   ;;  %v5624_v12 = vld [vmem:[%s7661_s30 + $0x20] ss:$8 sps:$4 sm:$0xff]  }
 0x360   : > { %1692 = vmatprep.subr.bf16.mxu0 %v5614_v6  ;;  %1813 = vmatprep.subr.bf16.mxu1 %v5616_v7  ;;  %v5625_v13 = vld [vmem:[%s7654_s5 + $0x20] ss:$8 sps:$4 sm:$0xff]   ;;  %v5626_v14 = vld [vmem:[%s7661_s30 + $0x34] ss:$8 sps:$4 sm:$0xff]   ;;  %v5630_v16 = vld [vmem:[%s7661_s30 + $0x30] ss:$8 sps:$4 sm:$0xff]  }
 0x361   : > { %v5628_v15 = vld [vmem:[%s7654_s5 + $0x34] ss:$8 sps:$4 sm:$0xff]   ;;  %v5631_v17 = vld [vmem:[%s7654_s5 + $0x30] ss:$8 sps:$4 sm:$0xff]   ;;  %v5632_v18 = vld [vmem:[%s7661_s30 + $0x44] ss:$8 sps:$4 sm:$0xff]  }
 0x362   : > { %v5634_v19 = vld [vmem:[%s7654_s5 + $0x44] ss:$8 sps:$4 sm:$0xff]   ;;  %v5636_v20 = vld [vmem:[%s7661_s30 + $0x40] ss:$8 sps:$4 sm:$0xff]   ;;  %v5638_v22 = vld [vmem:[%s7661_s30 + $0x54] ss:$8 sps:$4 sm:$0xff]  }
 0x363   : > { %1693 = vmatpush1.bf16.msra.mxu0 %v5618_v8  ;;  %1814 = vmatpush1.bf16.msra.mxu1 %v5619_v9  ;;  %v5637_v21 = vld [vmem:[%s7654_s5 + $0x40] ss:$8 sps:$4 sm:$0xff]   ;;  %v5640_v23 = vld [vmem:[%s7654_s5 + $0x54] ss:$8 sps:$4 sm:$0xff]   ;;  %v5642_v24 = vld [vmem:[%s7661_s30 + $0x50] ss:$8 sps:$4 sm:$0xff]  }
 0x364   : > { %1694 = vmatprep.subr.bf16.mxu0 %v5620_v10  ;;  %1815 = vmatprep.subr.bf16.mxu1 %v5622_v11  ;;  %v5643_v25 = vld [vmem:[%s7654_s5 + $0x50] ss:$8 sps:$4 sm:$0xff]   ;;  %v5644_v26 = vld [vmem:[%s7661_s30 + $0x64] ss:$8 sps:$4 sm:$0xff]   ;;  %v5648_v28 = vld [vmem:[%s7661_s30 + $0x60] ss:$8 sps:$4 sm:$0xff]  }
 0x365   : > { %v5646_v27 = vld [vmem:[%s7654_s5 + $0x64] ss:$8 sps:$4 sm:$0xff]   ;;  %v5649_v29 = vld [vmem:[%s7654_s5 + $0x60] ss:$8 sps:$4 sm:$0xff]   ;;  %v5650_v30 = vld [vmem:[%s7661_s30 + $0x74] ss:$8 sps:$4 sm:$0xff]  }
 0x366   : > { %v5652_v31 = vld [vmem:[%s7654_s5 + $0x74] ss:$8 sps:$4 sm:$0xff]   ;;  %v5654_v32 = vld [vmem:[%s7661_s30 + $0x70] ss:$8 sps:$4 sm:$0xff]   ;;  %v5658_v36 = vld [vmem:[%s7667_s25 + $0x4] ss:$8 sps:$4 sm:$0xff]  }
 0x367   : > { %1695 = vmatpush1.bf16.msra.mxu0 %v5624_v12  ;;  %1816 = vmatpush1.bf16.msra.mxu1 %v5625_v13  ;;  %v5655_v33 = vld [vmem:[%s7654_s5 + $0x70] ss:$8 sps:$4 sm:$0xff]   ;;  %v1575_v34 = vld [vmem:[#allocation2] sm:$0x3]  ;;  %v5656_v39 = vld [vmem:[%s7667_s25] ss:$8 sps:$4 sm:$0xff]  }
 0x368   : > { %1696 = vmatprep.subr.bf16.mxu0 %v5626_v14  ;;  %1817 = vmatprep.subr.bf16.mxu1 %v5628_v15  ;;  %v1574_v35 = vld [vmem:[%s8160_s2] sm:$0x3]  ;;  %v1609_v37 = vpack.c.bf16 %v1575_v34, %v1575_v34  ;;  %v5659_v41 = vld [vmem:[%s7667_s25 + $0x10] ss:$8 sps:$4 sm:$0xff]   ;;  %v5664_v42 = vld [vmem:[%s7667_s25 + $0x24] ss:$8 sps:$4 sm:$0xff]  }
 0x369   : > { %v1592_v38 = vpack.c.bf16 %v1574_v35, %v1574_v35  ;;  %v5661_v40 = vld [vmem:[%s7667_s25 + $0x14] ss:$8 sps:$4 sm:$0xff]   ;;  %v5662_v43 = vld [vmem:[%s7667_s25 + $0x20] ss:$8 sps:$4 sm:$0xff]   ;;  %v5665_v45 = vld [vmem:[%s7667_s25 + $0x30] ss:$8 sps:$4 sm:$0xff]  }
 0x36a   : > { %v5667_v44 = vld [vmem:[%s7667_s25 + $0x34] ss:$8 sps:$4 sm:$0xff]   ;;  %v5670_v46 = vld [vmem:[%s7667_s25 + $0x44] ss:$8 sps:$4 sm:$0xff]   ;;  %v5668_v47 = vld [vmem:[%s7667_s25 + $0x40] ss:$8 sps:$4 sm:$0xff]  }
 0x36b   : > { %1697 = vmatpush1.bf16.msra.mxu0 %v5630_v16  ;;  %1818 = vmatpush1.bf16.msra.mxu1 %v5631_v17  ;;  %v5673_v48 = vld [vmem:[%s7667_s25 + $0x54] ss:$8 sps:$4 sm:$0xff]   ;;  %v5671_v49 = vld [vmem:[%s7667_s25 + $0x50] ss:$8 sps:$4 sm:$0xff]   ;;  %v5676_v50 = vld [vmem:[%s7667_s25 + $0x64] ss:$8 sps:$4 sm:$0xff]  }
 0x36c   : > { %1698 = vmatprep.subr.bf16.mxu0 %v5632_v18  ;;  %1819 = vmatprep.subr.bf16.mxu1 %v5634_v19  ;;  %v5674_v51 = vld [vmem:[%s7667_s25 + $0x60] ss:$8 sps:$4 sm:$0xff]   ;;  %v5679_v52 = vld [vmem:[%s7667_s25 + $0x74] ss:$8 sps:$4 sm:$0xff]   ;;  %v5677_v53 = vld [vmem:[%s7667_s25 + $0x70] ss:$8 sps:$4 sm:$0xff]   ;;  %v1854_v19 = vlaneseq }
 0x36d   : > { %v5682_v54 = vld [vmem:[%s7667_s25 + $0x84] ss:$8 sps:$4 sm:$0xff]   ;;  %v5680_v55 = vld [vmem:[%s7667_s25 + $0x80] ss:$8 sps:$4 sm:$0xff]   ;;  %v5685_v56 = vld [vmem:[%s7667_s25 + $0x94] ss:$8 sps:$4 sm:$0xff]  }
 0x36e   : > { %v5683_v57 = vld [vmem:[%s7667_s25 + $0x90] ss:$8 sps:$4 sm:$0xff]   ;;  %v5688_v58 = vld [vmem:[%s7667_s25 + $0xa4] ss:$8 sps:$4 sm:$0xff]   ;;  %v5686_v59 = vld [vmem:[%s7667_s25 + $0xa0] ss:$8 sps:$4 sm:$0xff]  }
 0x36f   : > { %1699 = vmatpush1.bf16.msra.mxu0 %v5636_v20  ;;  %1820 = vmatpush1.bf16.msra.mxu1 %v5637_v21  ;;  %v5691_v60 = vld [vmem:[%s7667_s25 + $0xb4] ss:$8 sps:$4 sm:$0xff]   ;;  %v5689_v61 = vld [vmem:[%s7667_s25 + $0xb0] ss:$8 sps:$4 sm:$0xff]   ;;  %v5694_v62 = vld [vmem:[%s7667_s25 + $0xc4] ss:$8 sps:$4 sm:$0xff]  }
 0x370   : > { %1700 = vmatprep.subr.bf16.mxu0 %v5638_v22  ;;  %1821 = vmatprep.subr.bf16.mxu1 %v5640_v23  ;;  %v5692_v63 = vld [vmem:[%s7667_s25 + $0xc0] ss:$8 sps:$4 sm:$0xff]   ;;  %v5697_v0 = vld [vmem:[%s7667_s25 + $0xd4] ss:$8 sps:$4 sm:$0xff]   ;;  %v5695_v1 = vld [vmem:[%s7667_s25 + $0xd0] ss:$8 sps:$4 sm:$0xff]  }
 0x371   : > { %v5700_v2 = vld [vmem:[%s7667_s25 + $0xe4] ss:$8 sps:$4 sm:$0xff]   ;;  %v5698_v4 = vld [vmem:[%s7667_s25 + $0xe0] ss:$8 sps:$4 sm:$0xff]   ;;  %v5703_v5 = vld [vmem:[%s7667_s25 + $0xf4] ss:$8 sps:$4 sm:$0xff]  }
 0x372   : > { %v5701_v6 = vld [vmem:[%s7667_s25 + $0xf0] ss:$8 sps:$4 sm:$0xff]   ;;  %v5704_v7 = vld [vmem:[%s7675_s9 + $0x40] sm:$0xff]   ;;  %v5710_v13 = vld [vmem:[%s7675_s9 + $0x58] sm:$0xff]   ;;  %v7819_v20 = vshrl.u32 %v1854_v19, 7  ;;  %s8162_s13 = sld [smem:[#allocation62_spill]] }
 0x373   : > { %1701 = vmatpush1.bf16.msra.mxu0 %v5642_v24  ;;  %1822 = vmatpush1.bf16.msra.mxu1 %v5643_v25  ;;  %v5705_v8 = vld [vmem:[%s7675_s9] sm:$0xff]   ;;  %v5706_v9 = vld [vmem:[%s7675_s9 + $0x48] sm:$0xff]   ;;  %v5708_v11 = vld [vmem:[%s7675_s9 + $0x50] sm:$0xff]   ;;  %s8163_s5 = sld [smem:[#allocation73_spill]]  ;;  %s8164_s0 = sld [smem:[#allocation70_spill]]  ;;  %vm6948_vm0 = vmmov 0  }
 0x374   : > { %1702 = vmatprep.subr.bf16.mxu0 %v5644_v26  ;;  %1823 = vmatprep.subr.bf16.mxu1 %v5646_v27  ;;  %v5707_v10 = vld [vmem:[%s7675_s9 + $0x8] sm:$0xff]   ;;  %v5709_v12 = vld [vmem:[%s7675_s9 + $0x10] sm:$0xff]   ;;  %v5711_v14 = vld [vmem:[%s7675_s9 + $0x18] sm:$0xff]   ;;  %v7822_v21 = vsub.s32 0, %v7819_v20  ;;  %v7826_v23 = vsub.s32 1, %v7819_v20  ;;  %s8165_s14 = sld [smem:[#allocation77_spill]] }
 0x375   : > { %v5712_v15 = vld [vmem:[%s7675_s9 + $0x60] sm:$0xff]   ;;  %v5714_v17 = vld [vmem:[%s7675_s9 + $0x68] sm:$0xff]   ;;  %v1852_v22 = vld [vmem:[%s7733_s19] sm:$0x3]  ;;  %vm3496_vm1 = vcmask 1040384   ;;  %vm3985_vm2 = vcmask 1041408  }
 0x376   : > { %v5713_v16 = vld [vmem:[%s7675_s9 + $0x20] sm:$0xff]   ;;  %v5715_v18 = vld [vmem:[%s7675_s9 + $0x28] sm:$0xff]   ;;  %v1857_v24 = vrot.slane %v1852_v22, %v7822_v21  ;;  %v1861_v27 = vrot.slane %v1852_v22, %v7826_v23 }
 0x377   : > { %1703 = vmatpush1.bf16.msra.mxu0 %v5648_v28  ;;  %1824 = vmatpush1.bf16.msra.mxu1 %v5649_v29 }
 0x378   : > { %1704 = vmatprep.subr.bf16.mxu0 %v5650_v30  ;;  %1825 = vmatprep.subr.bf16.mxu1 %v5652_v31 }
 0x379   : > { %v5722_v19 = vld [vmem:[%s8163_s5 + $0x10] sm:$0xff]   ;;  %v5723_v22 = vld [vmem:[%s8163_s5 + $0x18] sm:$0xff]  }
 0x37b   : > { %1705 = vmatpush1.bf16.msra.mxu0 %v5654_v32  ;;  %1826 = vmatpush1.bf16.msra.mxu1 %v5655_v33 }
 0x37c   : > { %2074 = vmatprep.subr.bf16.mxu0 %v5658_v36  ;;  %5165 = vmatprep.subr.bf16.mxu1 %v5704_v7 }
 0x37e   : > { %1723 = vmatmul.mubr.bf16.vlgmr.msra.gmra.mrb[0].mxu0 %v1609_v37  ;;  %1844 = vmatmul.mubr.bf16.vlgmr.msra.gmra.mrb[0].mxu1 %v1592_v38 }
 0x37f   : > { %2075 = vmatpush1.bf16.msra.mxu0 %v5656_v39  ;;  %5166 = vmatpush3.bf16.msra.mxu1 %v5705_v8  ;;  %v4970_v8 = vld [vmem:[%s8162_s13 + $0x18] sm:$0xff] }
 0x380   : > { %2076 = vmatprep.subr.bf16.mxu0 %v5661_v40  ;;  %5167 = vmatprep.subr.bf16.mxu1 %v5706_v9  ;;  %v2305_v9 = vld [vmem:[%s8162_s13 + $0x8] sm:$0xff] }
 0x383   : > { %2077 = vmatpush1.bf16.msra.mxu0 %v5659_v41  ;;  %5168 = vmatpush3.bf16.msra.mxu1 %v5707_v10 }
 0x384   : > { %2078 = vmatprep.subr.bf16.mxu0 %v5664_v42  ;;  %5169 = vmatprep.subr.bf16.mxu1 %v5708_v11  ;;  %v5716_v42 = vld [vmem:[%s7675_s9 + $0x70] sm:$0xff]  }
 0x387   : > { %2079 = vmatpush1.bf16.msra.mxu0 %v5662_v43  ;;  %5170 = vmatpush3.bf16.msra.mxu1 %v5709_v12  ;;  %v5717_v43 = vld [vmem:[%s7675_s9 + $0x30] sm:$0xff]   ;;  %v4972_v12 = vld [vmem:[%s8162_s13 + $0x28] sm:$0xff] }
 0x388   : > { %2080 = vmatprep.subr.bf16.mxu0 %v5667_v44  ;;  %5171 = vmatprep.subr.bf16.mxu1 %v5710_v13  ;;  %v5718_v44 = vld [vmem:[%s7675_s9 + $0x78] sm:$0xff]  }
 0x389   : > { %v4971_v13 = vld [vmem:[%s8162_s13 + $0x20] sm:$0xff] }
 0x38b   : > { %2081 = vmatpush1.bf16.msra.mxu0 %v5665_v45  ;;  %5172 = vmatpush3.bf16.msra.mxu1 %v5711_v14  ;;  %v5719_v45 = vld [vmem:[%s7675_s9 + $0x38] sm:$0xff]  }
 0x38c   : > { %2082 = vmatprep.subr.bf16.mxu0 %v5670_v46  ;;  %5173 = vmatprep.subr.bf16.mxu1 %v5712_v15  ;;  %v1902_v46 = vld [vmem:[%s7669_s10] sm:$0x3] }
 0x38f   : > { %2083 = vmatpush1.bf16.msra.mxu0 %v5668_v47  ;;  %5174 = vmatpush3.bf16.msra.mxu1 %v5713_v16  ;;  %v1907_v47 = vrot.slane %v1902_v46, %v7822_v21  ;;  %v5720_v16 = vld [vmem:[%s8163_s5] sm:$0xff]  }
 0x390   : > { %2084 = vmatprep.subr.bf16.mxu0 %v5673_v48  ;;  %5175 = vmatprep.subr.bf16.mxu1 %v5714_v17  ;;  %v1911_v48 = vrot.slane %v1902_v46, %v7826_v23  ;;  %v6947_v17 = vmov 0.0  }
 0x393   : > { %2085 = vmatpush1.bf16.msra.mxu0 %v5671_v49  ;;  %5176 = vmatpush3.bf16.msra.mxu1 %v5715_v18  ;;  %v5721_v18 = vld [vmem:[%s8163_s5 + $0x8] sm:$0xff]  }
 0x394   : > { %2086 = vmatprep.subr.bf16.mxu0 %v5676_v50  ;;  %5177 = vmatprep.subr.bf16.mxu1 %v5716_v42 }
 0x397   : > { %2087 = vmatpush1.bf16.msra.mxu0 %v5674_v51  ;;  %5178 = vmatpush3.bf16.msra.mxu1 %v5717_v43 }
 0x398   : > { %2088 = vmatprep.subr.bf16.mxu0 %v5679_v52  ;;  %5179 = vmatprep.subr.bf16.mxu1 %v5718_v44 }
 0x39b   : > { %2089 = vmatpush1.bf16.msra.mxu0 %v5677_v53  ;;  %5180 = vmatpush3.bf16.msra.mxu1 %v5719_v45 }
 0x39c   : > { %2090 = vmatprep.subr.bf16.mxu0 %v5682_v54  ;;  %5227 = vmatprep.subr.bf16.mxu1 %v6947_v17 }
 0x39f   : > { %2091 = vmatpush1.bf16.msra.mxu0 %v5680_v55 }
 0x3a0   : > { %2092 = vmatprep.subr.bf16.mxu0 %v5685_v56 }
 0x3a3   : > { %2093 = vmatpush1.bf16.msra.mxu0 %v5683_v57 }
 0x3a4   : > { %2094 = vmatprep.subr.bf16.mxu0 %v5688_v58 }
 0x3a7   : > { %2095 = vmatpush1.bf16.msra.mxu0 %v5686_v59  ;;  %v4951_v59 = vld [vmem:[%s1563_s18] ss:$0 sm:$0xff] }
 0x3a8   : > { %2096 = vmatprep.subr.bf16.mxu0 %v5691_v60 }
 0x3ab   : > { %2097 = vmatpush1.bf16.msra.mxu0 %v5689_v61 }
 0x3ac   : > { %2098 = vmatprep.subr.bf16.mxu0 %v5694_v62 }
 0x3af   : > { %2099 = vmatpush1.bf16.msra.mxu0 %v5692_v63 }
 0x3b0   : > { %2100 = vmatprep.subr.bf16.mxu0 %v5697_v0 }
 0x3b3   : > { %2101 = vmatpush1.bf16.msra.mxu0 %v5695_v1  ;;  %v4969_v1 = vld [vmem:[%s8162_s13 + $0x10] sm:$0xff] }
 0x3b4   : > { %2102 = vmatprep.subr.bf16.mxu0 %v5700_v2  ;;  %v2304_v2 = vld [vmem:[%s8162_s13] sm:$0xff] }
 0x3b7   : > { %2103 = vmatpush1.bf16.msra.mxu0 %v5698_v4 }
 0x3b8   : > { %2104 = vmatprep.subr.bf16.mxu0 %v5703_v5 }
 0x3bb   : > { %2105 = vmatpush1.bf16.msra.mxu0 %v5701_v6 }
 0x451   : > { %v1724_v25 = vpop.f32.mrb[0].mxu0  ;;  %v1845_v26 = vpop.f32.mrb[0].mxu1 }
 0x452   : > { %v1846_v28 = vadd.f32 %v1845_v26, %v1724_v25  ;;  %v1726_v29 = vpop.f32.mrb[1].mxu0  ;;  %v1847_v30 = vpop.f32.mrb[1].mxu1  ;;  %v5725_v25 = vld [vmem:[%s8163_s5 + $0x28] sm:$0xff]   ;;  %v5726_v26 = vld [vmem:[%s8163_s5 + $0x30] sm:$0xff]  }
 0x453   : > { %v1848_v31 = vadd.f32 %v1847_v30, %v1726_v29  ;;  %v1728_v32 = vpop.f32.mrb[2].mxu0  ;;  %v1849_v33 = vpop.f32.mrb[2].mxu1 }
 0x454   : > { %v1864_v34 = vadd.f32 %v1857_v24, %v1846_v28  ;;  %v1729_v35 = vpop.f32.mrb[3].mxu0  ;;  %v1850_v36 = vpop.f32.mrb[3].mxu1  ;;  %v5724_v24 = vld [vmem:[%s8163_s5 + $0x20] sm:$0xff]   ;;  %v7870_v33 = vsub.s32 2, %v7819_v20 }
 0x455   : > { %v1865_v37 = vadd.f32 %v1861_v27, %v1848_v31  ;;  %v5727_v27 = vld [vmem:[%s8163_s5 + $0x38] sm:$0xff]   ;;  %v2302_v28 = vld [vmem:[#allocation11] sm:$0x7] }
 0x456   : > { %v1866_v38 = vmax.f32 %v1864_v34, 0.0  ;;  %v2315_v29 = vrot.slane %v2302_v28, %v7822_v21  ;;  %v4968_v34 = vld [vmem:[%s8164_s0] ss:$0 sm:$0xff]  ;;  %v2338_v35 = vrot.slane %v2302_v28, %v7826_v23 }
 0x457   : > { %v1867_v39 = vmax.f32 %v1865_v37, 0.0 }
 0x458   : > { %v1900_v41 = vpack.c.bf16 %v1866_v38, %v1866_v38 }
 0x459   : > { %v1901_v40 = vpack.c.bf16 %v1867_v39, %v1867_v39 }
 0x45b   : > { %2106 = vmatprep.mubr.bf16.mxu0 %v1901_v40  ;;  %v2355_v40 = vrot.slane %v2302_v28, %v7870_v33  ;;  %v5731_v28 = vld [vmem:[%s8165_s14 + $0x10] ss:$8 sps:$4 sm:$0xff]  }
 0x45c   : > { %2107 = vmatmul.mubr.bf16.vlgmr.msra.gmra.mrb[4].mxu0 %v1900_v41 }
 0x45d   : > { %2703 = vmatprep.mubr.bf16.mxu0 %v6946_v3 }
 0x52f   : > { %v2108_v49 = vpop.f32.mrb[4].mxu0 }
 0x530   : > { %v2109_v50 = vadd.f32 %v2108_v49, %v1907_v47  ;;  %v2110_v51 = vpop.f32.mrb[5].mxu0 }
 0x531   : > { %v2111_v52 = vadd.f32 %v2110_v51, %v1911_v48  ;;  %v2112_v3 = vpop.f32.mrb[6].mxu0 }
 0x532   : > { %v2115_v53 = vmax.f32 %v2109_v50, 0.0  ;;  %v2113_v54 = vpop.f32.mrb[7].mxu0 }
 0x533   : > { %v2116_v55 = vmax.f32 %v2111_v52, 0.0 }
 0x534   : > { %v2149_v57 = vpack.c.bf16 %v2115_v53, %v2115_v53 }
 0x535   : > { %v2150_v56 = vpack.c.bf16 %v2116_v55, %v2116_v55 }
 0x537   : > { %2286 = vmatprep.mubr.bf16.mxu1 %v2150_v56 }
 0x538   : > { %2287 = vmatmul.mubr.bf16.vlgmr.msra.gmra.mrb[4].mxu1 %v2149_v57 }
 0x539   : > { %5228 = vmatpush3.bf16.msra.mxu1 %v5720_v16  ;;  %5243 = vmatprep.mubr.msk.bf16.mxu1 %vm6948_vm0, %v6947_v17 }
 0x53a   : > { %5229 = vmatprep.subr.bf16.mxu1 %v6947_v17 }
 0x53d   : > { %5230 = vmatpush3.bf16.msra.mxu1 %v5721_v18 }
 0x53e   : > { %5231 = vmatprep.subr.bf16.mxu1 %v6947_v17 }
 0x541   : > { %5232 = vmatpush3.bf16.msra.mxu1 %v5722_v19 }
 0x542   : > { %5233 = vmatprep.subr.bf16.mxu1 %v6947_v17 }
 0x545   : > { %5234 = vmatpush3.bf16.msra.mxu1 %v5723_v22 }
 0x546   : > { %5235 = vmatprep.subr.bf16.mxu1 %v6947_v17 }
 0x549   : > { %5236 = vmatpush3.bf16.msra.mxu1 %v5724_v24 }
 0x54a   : > { %5237 = vmatprep.subr.bf16.mxu1 %v6947_v17 }
 0x54d   : > { %5238 = vmatpush3.bf16.msra.mxu1 %v5725_v25  ;;  %v5730_v25 = vld [vmem:[%s8165_s14 + $0x4] ss:$8 sps:$4 sm:$0xff]  }
 0x54e   : > { %5239 = vmatprep.subr.bf16.mxu1 %v6947_v17  ;;  %2671 = vmatprep.subr.bf16.mxu0 %v5730_v25  ;;  %v5755_v25 = vld [vmem:[#allocation25 + $0x8] ss:$16 sps:$4 sm:$0xff]  }
 0x551   : > { %5240 = vmatpush3.bf16.msra.mxu1 %v5726_v26  ;;  %v5728_v26 = vld [vmem:[%s8165_s14] ss:$8 sps:$4 sm:$0xff]  }
 0x552   : > { %5241 = vmatprep.subr.bf16.mxu1 %v6947_v17  ;;  %2672 = vmatpush1.bf16.msra.mxu0 %v5728_v26  ;;  %v5760_v26 = vld [vmem:[#allocation25 + $0x24] ss:$16 sps:$4 sm:$0xff]  }
 0x555   : > { %5242 = vmatpush3.bf16.msra.mxu1 %v5727_v27  ;;  %v5733_v27 = vld [vmem:[%s8165_s14 + $0x14] ss:$8 sps:$4 sm:$0xff]  }
 0x556   : > { %2673 = vmatprep.subr.bf16.mxu0 %v5733_v27  ;;  %v5763_v27 = vld [vmem:[#allocation25 + $0x2c] ss:$16 sps:$4 sm:$0xff]  }
 0x557   : > { %2674 = vmatpush1.bf16.msra.mxu0 %v5731_v28  ;;  %v5758_v28 = vld [vmem:[#allocation25 + $0x20] ss:$16 sps:$4 sm:$0xff]  }
 0x60b   : > { %v5181_v58 = vpop.f32.mrb[4].mxu1 }
 0x60c   : > { %v5182_v60 = vpop.f32.mrb[5].mxu1 }
 0x60d   : > { %v5183_v61 = vadd.f32 %v5182_v60, %v5181_v58  ;;  %v5184_v62 = vpop.f32.mrb[6].mxu1 }
 0x60e   : > { %v5185_v63 = vpop.f32.mrb[7].mxu1 }
 0x60f   : > { %v2289_v0 = vadd.f32 %v5183_v61, %v4951_v59 }
 0x611   : > { %4384 = vst [vmem:[%s7736_s21] sm:$0x3] %v2289_v0  ;;  %v2297_v4 = vrot.slane %v2289_v0, %v7822_v21  ;;  %v2301_v7 = vrot.slane %v2289_v0, %v7826_v23 }
 0x613   : > { %v2329_v5 = vmul.f32 %v4969_v1, %v2297_v4  ;;  %v2306_v6 = vmul.f32 %v2304_v2, %v2297_v4  ;;  %v2330_v10 = vmul.f32 %v4970_v8, %v2301_v7  ;;  %v2307_v11 = vmul.f32 %v2305_v9, %v2301_v7 }
 0x614   : > { %v2347_v14 = vmul.f32 %v4972_v12, %v2301_v7  ;;  %v2346_v15 = vmul.f32 %v4971_v13, %v2297_v4  ;;  %v4974_v13 = vld [vmem:[#allocation14] ss:$0 sm:$0xff] }
 0x615   : > { %2331 = vadd.xlane.f32.xlu1 %v2329_v5  ;;  %2308 = vadd.xlane.f32.xlu0 %v2306_v6 }
 0x619   : > { %2333 = vadd.xlane.f32.xlu1 %v2330_v10  ;;  %2310 = vadd.xlane.f32.xlu0 %v2307_v11  ;;  %v4973_v10 = vld [vmem:[#allocation13] ss:$0 sm:$0xff] }
 0x61d   : > { %2350 = vadd.xlane.f32.xlu1 %v2347_v14  ;;  %2348 = vadd.xlane.f32.xlu0 %v2346_v15 }
 0x6a2   : > { %v2332_v30 = vpop.xlane.xlu1 %2331  ;;  %v2309_v31 = vpop.xlane.xlu0 %2308 }
 0x6a3   : > { %v2316_v32 = vmul.f32 %v2315_v29, %v2309_v31  ;;  %v2339_v41 = vmul.f32 %v2338_v35, %v2332_v30  ;;  %v5734_v30 = vld [vmem:[%s8165_s14 + $0x20] ss:$8 sps:$4 sm:$0xff]   ;;  %v5739_v31 = vld [vmem:[%s8165_s14 + $0x34] ss:$8 sps:$4 sm:$0xff]  }
 0x6a5   : > { %v2324_v38 = vadd.f32 %v4968_v34, %v2316_v32  ;;  %v5737_v32 = vld [vmem:[%s8165_s14 + $0x30] ss:$8 sps:$4 sm:$0xff]  }
 0x6a6   : > { %v2334_v36 = vpop.xlane.xlu1 %2333  ;;  %v2311_v37 = vpop.xlane.xlu0 %2310 }
 0x6a7   : > { %v2317_v39 = vmul.f32 %v2315_v29, %v2311_v37  ;;  %v2340_v42 = vmul.f32 %v2338_v35, %v2334_v36  ;;  %v2341_v48 = vadd.f32 %v2339_v41, %v2324_v38  ;;  %v5736_v29 = vld [vmem:[%s8165_s14 + $0x24] ss:$8 sps:$4 sm:$0xff]   ;;  %v5740_v35 = vld [vmem:[%s8165_s14 + $0x40] ss:$8 sps:$4 sm:$0xff]   ;;  %v5745_v36 = vld [vmem:[%s8165_s14 + $0x54] ss:$8 sps:$4 sm:$0xff]  }
 0x6a8   : > { %2675 = vmatprep.subr.bf16.mxu0 %v5736_v29  ;;  %v5743_v37 = vld [vmem:[%s8165_s14 + $0x50] ss:$8 sps:$4 sm:$0xff]   ;;  %v5748_v38 = vld [vmem:[%s8165_s14 + $0x64] ss:$8 sps:$4 sm:$0xff]  }
 0x6a9   : > { %v2325_v43 = vadd.f32 %v4968_v34, %v2317_v39  ;;  %2676 = vmatpush1.bf16.msra.mxu0 %v5734_v30  ;;  %v5742_v34 = vld [vmem:[%s8165_s14 + $0x44] ss:$8 sps:$4 sm:$0xff]   ;;  %v5746_v39 = vld [vmem:[%s8165_s14 + $0x60] ss:$8 sps:$4 sm:$0xff]   ;;  %v5749_v41 = vld [vmem:[%s8165_s14 + $0x70] ss:$8 sps:$4 sm:$0xff]  }
 0x6aa   : > { %v2351_v44 = vpop.xlane.xlu1 %2350  ;;  %v2349_v45 = vpop.xlane.xlu0 %2348  ;;  %2677 = vmatprep.subr.bf16.mxu0 %v5739_v31  ;;  %v5761_v29 = vld [vmem:[#allocation25 + $0x28] ss:$16 sps:$4 sm:$0xff]   ;;  %v5766_v30 = vld [vmem:[#allocation25 + $0x44] ss:$16 sps:$4 sm:$0xff]   ;;  %v5769_v31 = vld [vmem:[#allocation25 + $0x4c] ss:$16 sps:$4 sm:$0xff]  }
 0x6ab   : > { %v2342_v46 = vadd.f32 %v2340_v42, %v2325_v43  ;;  %v2357_v47 = vmul.f32 %v2355_v40, %v2351_v44  ;;  %v2356_v49 = vmul.f32 %v2355_v40, %v2349_v45  ;;  %v5751_v40 = vld [vmem:[%s8165_s14 + $0x74] ss:$8 sps:$4 sm:$0xff]   ;;  %v4975_v42 = vld [vmem:[#allocation16] ss:$0 sm:$0xff] }
 0x6ad   : > { %v2359_v50 = vadd.f32 %v2357_v47, %v2342_v46  ;;  %v2358_v51 = vadd.f32 %v2356_v49, %v2341_v48  ;;  %2678 = vmatpush1.bf16.msra.mxu0 %v5737_v32  ;;  %v5764_v32 = vld [vmem:[#allocation25 + $0x40] ss:$16 sps:$4 sm:$0xff]  }
 0x6ae   : > { %2679 = vmatprep.subr.bf16.mxu0 %v5742_v34  ;;  %v5767_v34 = vld [vmem:[#allocation25 + $0x48] ss:$16 sps:$4 sm:$0xff]  }
 0x6af   : > { %v2362_v52 = vadd.f32 %v2359_v50, %v2358_v51 }
 0x6b1   : > { %v2363_v3 = vrot.slane %v2362_v52, 4  ;;  %2680 = vmatpush1.bf16.msra.mxu0 %v5740_v35  ;;  %v5772_v35 = vld [vmem:[#allocation25 + $0x64] ss:$16 sps:$4 sm:$0xff]  }
 0x6b2   : > { %2681 = vmatprep.subr.bf16.mxu0 %v5745_v36  ;;  %v5775_v36 = vld [vmem:[#allocation25 + $0x6c] ss:$16 sps:$4 sm:$0xff]  }
 0x6b3   : > { %v2364_v53 = vadd.f32 %v2363_v3, %v2362_v52 }
 0x6b5   : > { %v2365_v54 = vrot.slane %v2364_v53, 2  ;;  %2682 = vmatpush1.bf16.msra.mxu0 %v5743_v37  ;;  %v5770_v37 = vld [vmem:[#allocation25 + $0x60] ss:$16 sps:$4 sm:$0xff]  }
 0x6b6   : > { %2683 = vmatprep.subr.bf16.mxu0 %v5748_v38  ;;  %v5773_v38 = vld [vmem:[#allocation25 + $0x68] ss:$16 sps:$4 sm:$0xff]  }
 0x6b7   : > { %v2366_v55 = vadd.f32 %v2365_v54, %v2364_v53 }
 0x6b9   : > { %v2367_v56 = vrot.slane %v2366_v55, 1  ;;  %2684 = vmatpush1.bf16.msra.mxu0 %v5746_v39  ;;  %v5778_v39 = vld [vmem:[#allocation25 + $0x84] ss:$16 sps:$4 sm:$0xff]  }
 0x6ba   : > { %2685 = vmatprep.subr.bf16.mxu0 %v5751_v40  ;;  %v5781_v40 = vld [vmem:[#allocation25 + $0x8c] ss:$16 sps:$4 sm:$0xff]  }
 0x6bb   : > { %v2368_v57 = vadd.f32 %v2367_v56, %v2366_v55 }
 0x6bd   : > { %v2370_v58 = vmul.f32 0.0625, %v2368_v57  ;;  %2686 = vmatpush1.bf16.msra.mxu0 %v5749_v41  ;;  %v5776_v41 = vld [vmem:[#allocation25 + $0x80] ss:$16 sps:$4 sm:$0xff]  }
 0x6bf   : > { %v2371_v59 = vsub.f32 %v2358_v51, %v2370_v58  ;;  %v2372_v60 = vsub.f32 %v2359_v50, %v2370_v58 }
 0x6c1   : > { %v2373_v61 = vmul.f32 %v2371_v59, %v2371_v59  ;;  %v2374_v62 = vmul.f32 %v2372_v60, %v2372_v60 }
 0x6c3   : > { %v2375_v63 = vadd.f32 %v2374_v62, %v2373_v61 }
 0x6c5   : > { %v2376_v0 = vrot.slane %v2375_v63, 4 }
 0x6c7   : > { %v2377_v1 = vadd.f32 %v2376_v0, %v2375_v63 }
 0x6c9   : > { %v2378_v2 = vrot.slane %v2377_v1, 2 }
 0x6cb   : > { %v2379_v4 = vadd.f32 %v2378_v2, %v2377_v1 }
 0x6cd   : > { %v2380_v5 = vrot.slane %v2379_v4, 1 }
 0x6cf   : > { %v2381_v6 = vadd.f32 %v2380_v5, %v2379_v4 }
 0x6d1   : > { %v2382_v7 = vmul.f32 0.0625, %v2381_v6 }
 0x6d3   : > { %v2383_v8 = vadd.f32 1e-05, %v2382_v7  ;;  %v4984_v7 = vld [vmem:[#allocation17] ss:$0 sm:$0xff] }
 0x6d5   : > { %5968 = vrsqrt.f32 %v2383_v8 }
 0x6df   : > { %v5969_v9 = vpop.eup %5968 }
 0x6e0   : > { %v2385_v11 = vmul.f32 %v5969_v9, %v2371_v59  ;;  %v2386_v12 = vmul.f32 %v5969_v9, %v2372_v60 }
 0x6e2   : > { %v2393_v14 = vmul.f32 %v4973_v10, %v2385_v11  ;;  %v2394_v15 = vmul.f32 %v4973_v10, %v2386_v12  ;;  %v4985_v10 = vld [vmem:[#allocation19] ss:$0 sm:$0xff] }
 0x6e4   : > { %v2401_v16 = vadd.f32 %v4974_v13, %v2393_v14  ;;  %v2402_v18 = vadd.f32 %v4974_v13, %v2394_v15 }
 0x6e6   : > { %v2403_v19 = vmax.f32 %v2401_v16, 0.0  ;;  %v2404_v22 = vmax.f32 %v2402_v18, 0.0 }
 0x6e8   : > { %v2421_v24 = vpack.c.bf16 %v2404_v22, %v2403_v19  ;;  %v5754_v19 = vld [vmem:[#allocation25 + $0x4] ss:$16 sps:$4 sm:$0xff]   ;;  %v5757_v22 = vld [vmem:[#allocation25 + $0xc] ss:$16 sps:$4 sm:$0xff]  }
 0x6e9   : > { %3206 = vmatprep.subr.bf16.mxu1 %v5754_v19  ;;  %3249 = vmatprep.subr.bf16.mxu0 %v5757_v22  ;;  %v5839_v19 = vld [vmem:[#allocation25 + $0x1c8] ss:$16 sps:$4 sm:$0xff]   ;;  %v5842_v22 = vld [vmem:[#allocation25 + $0x1e0] ss:$16 sps:$4 sm:$0xff]  }
 0x6ea   : > { %5244 = vmatmul.mubr.bf16.vlgmr.msra.gmra.mrb[8].mxu1 %v2421_v24  ;;  %v5752_v24 = vld [vmem:[#allocation25] ss:$16 sps:$4 sm:$0xff]  }
 0x6eb   : > { %3207 = vmatpush1.bf16.msra.mxu1 %v5752_v24  ;;  %v5844_v24 = vld [vmem:[#allocation25 + $0x1e4] ss:$16 sps:$4 sm:$0xff]  }
 0x6ec   : > { %3208 = vmatprep.subr.bf16.mxu1 %v5760_v26  ;;  %v5847_v26 = vld [vmem:[#allocation25 + $0x1ec] ss:$16 sps:$4 sm:$0xff]  }
 0x6ef   : > { %3209 = vmatpush1.bf16.msra.mxu1 %v5758_v28 }
 0x6f0   : > { %3210 = vmatprep.subr.bf16.mxu1 %v5766_v30 }
 0x6f3   : > { %3211 = vmatpush1.bf16.msra.mxu1 %v5764_v32 }
 0x6f4   : > { %3212 = vmatprep.subr.bf16.mxu1 %v5772_v35 }
 0x6f7   : > { %3213 = vmatpush1.bf16.msra.mxu1 %v5770_v37 }
 0x6f8   : > { %3214 = vmatprep.subr.bf16.mxu1 %v5778_v39 }
 0x6fb   : > { %3215 = vmatpush1.bf16.msra.mxu1 %v5776_v41 }
 0x7bd   : > { %v2511_v43 = vpop.f32.mrb[8].mxu1 }
 0x7be   : > { %v5245_v44 = vpop.f32.mrb[9].mxu1  ;;  %v2512_v46 = vadd.f32 %v4975_v42, %v2511_v43  ;;  %v5784_v43 = vld [vmem:[#allocation25 + $0xa4] ss:$16 sps:$4 sm:$0xff]  }
 0x7bf   : > { %v2514_v45 = vpop.f32.mrb[10].mxu1  ;;  %v5787_v44 = vld [vmem:[#allocation25 + $0xac] ss:$16 sps:$4 sm:$0xff]   ;;  %3216 = vmatprep.subr.bf16.mxu1 %v5784_v43 }
 0x7c0   : > { %v2515_v47 = vadd.f32 %v4975_v42, %v2514_v45  ;;  %v5246_v48 = vpop.f32.mrb[11].mxu1  ;;  %v5779_v42 = vld [vmem:[#allocation25 + $0x88] ss:$16 sps:$4 sm:$0xff]   ;;  %v5782_v45 = vld [vmem:[#allocation25 + $0xa0] ss:$16 sps:$4 sm:$0xff]  }
 0x7c1   : > { %3217 = vmatpush1.bf16.msra.mxu1 %v5782_v45  ;;  %v5793_v48 = vld [vmem:[#allocation25 + $0xcc] ss:$16 sps:$4 sm:$0xff]  }
 0x7c2   : > { %v2520_v49 = vadd.f32 %v2515_v47, %v2512_v46 }
 0x7c4   : > { %v2521_v50 = vrot.slane %v2520_v49, 4 }
 0x7c6   : > { %v2522_v51 = vadd.f32 %v2521_v50, %v2520_v49  ;;  %v5788_v49 = vld [vmem:[#allocation25 + $0xc0] ss:$16 sps:$4 sm:$0xff]   ;;  %v5791_v50 = vld [vmem:[#allocation25 + $0xc8] ss:$16 sps:$4 sm:$0xff]  }
 0x7c8   : > { %v2523_v52 = vrot.slane %v2522_v51, 2 }
 0x7ca   : > { %v2524_v3 = vadd.f32 %v2523_v52, %v2522_v51  ;;  %v5796_v51 = vld [vmem:[#allocation25 + $0xe4] ss:$16 sps:$4 sm:$0xff]   ;;  %v5799_v52 = vld [vmem:[#allocation25 + $0xec] ss:$16 sps:$4 sm:$0xff]  }
 0x7cc   : > { %v2525_v53 = vrot.slane %v2524_v3, 1 }
 0x7ce   : > { %v2526_v54 = vadd.f32 %v2525_v53, %v2524_v3  ;;  %v5794_v3 = vld [vmem:[#allocation25 + $0xe0] ss:$16 sps:$4 sm:$0xff]   ;;  %v5797_v53 = vld [vmem:[#allocation25 + $0xe8] ss:$16 sps:$4 sm:$0xff]  }
 0x7d0   : > { %v2527_v55 = vmul.f32 0.0625, %v2526_v54  ;;  %v5802_v54 = vld [vmem:[#allocation25 + $0x104] ss:$16 sps:$4 sm:$0xff]  }
 0x7d2   : > { %v2528_v56 = vsub.f32 %v2512_v46, %v2527_v55  ;;  %v2529_v57 = vsub.f32 %v2515_v47, %v2527_v55  ;;  %v5785_v46 = vld [vmem:[#allocation25 + $0xa8] ss:$16 sps:$4 sm:$0xff]   ;;  %v5790_v47 = vld [vmem:[#allocation25 + $0xc4] ss:$16 sps:$4 sm:$0xff]   ;;  %v5805_v55 = vld [vmem:[#allocation25 + $0x10c] ss:$16 sps:$4 sm:$0xff]  }
 0x7d3   : > { %3218 = vmatprep.subr.bf16.mxu1 %v5790_v47 }
 0x7d4   : > { %v2530_v58 = vmul.f32 %v2528_v56, %v2528_v56  ;;  %v2531_v59 = vmul.f32 %v2529_v57, %v2529_v57  ;;  %3219 = vmatpush1.bf16.msra.mxu1 %v5788_v49 }
 0x7d5   : > { %3220 = vmatprep.subr.bf16.mxu1 %v5796_v51 }
 0x7d6   : > { %v2532_v60 = vadd.f32 %v2531_v59, %v2530_v58  ;;  %v5808_v58 = vld [vmem:[#allocation25 + $0x124] ss:$16 sps:$4 sm:$0xff]   ;;  %v5811_v59 = vld [vmem:[#allocation25 + $0x12c] ss:$16 sps:$4 sm:$0xff]  }
 0x7d8   : > { %v2533_v61 = vrot.slane %v2532_v60, 4  ;;  %3221 = vmatpush1.bf16.msra.mxu1 %v5794_v3 }
 0x7d9   : > { %3222 = vmatprep.subr.bf16.mxu1 %v5802_v54 }
 0x7da   : > { %v2534_v62 = vadd.f32 %v2533_v61, %v2532_v60  ;;  %v5806_v60 = vld [vmem:[#allocation25 + $0x120] ss:$16 sps:$4 sm:$0xff]   ;;  %v5809_v61 = vld [vmem:[#allocation25 + $0x128] ss:$16 sps:$4 sm:$0xff]  }
 0x7dc   : > { %v2535_v63 = vrot.slane %v2534_v62, 2 }
 0x7de   : > { %v2536_v0 = vadd.f32 %v2535_v63, %v2534_v62  ;;  %v5814_v62 = vld [vmem:[#allocation25 + $0x144] ss:$16 sps:$4 sm:$0xff]   ;;  %v5817_v63 = vld [vmem:[#allocation25 + $0x14c] ss:$16 sps:$4 sm:$0xff]  }
 0x7e0   : > { %v2537_v1 = vrot.slane %v2536_v0, 1 }
 0x7e2   : > { %v2538_v2 = vadd.f32 %v2537_v1, %v2536_v0  ;;  %v5812_v0 = vld [vmem:[#allocation25 + $0x140] ss:$16 sps:$4 sm:$0xff]   ;;  %v5815_v1 = vld [vmem:[#allocation25 + $0x148] ss:$16 sps:$4 sm:$0xff]  }
 0x7e4   : > { %v2539_v4 = vmul.f32 0.0625, %v2538_v2  ;;  %v5820_v2 = vld [vmem:[#allocation25 + $0x164] ss:$16 sps:$4 sm:$0xff]  }
 0x7e6   : > { %v2540_v5 = vadd.f32 1e-05, %v2539_v4  ;;  %v5823_v4 = vld [vmem:[#allocation25 + $0x16c] ss:$16 sps:$4 sm:$0xff]  }
 0x7e8   : > { %5970 = vrsqrt.f32 %v2540_v5  ;;  %v5818_v5 = vld [vmem:[#allocation25 + $0x160] ss:$16 sps:$4 sm:$0xff]  }
 0x7f2   : > { %v5971_v6 = vpop.eup %5970 }
 0x7f3   : > { %v2542_v8 = vmul.f32 %v5971_v6, %v2528_v56  ;;  %v2543_v9 = vmul.f32 %v5971_v6, %v2529_v57  ;;  %v5800_v56 = vld [vmem:[#allocation25 + $0x100] ss:$16 sps:$4 sm:$0xff]   ;;  %v5803_v57 = vld [vmem:[#allocation25 + $0x108] ss:$16 sps:$4 sm:$0xff]  }
 0x7f4   : > { %3223 = vmatpush1.bf16.msra.mxu1 %v5800_v56  ;;  %v5821_v6 = vld [vmem:[#allocation25 + $0x168] ss:$16 sps:$4 sm:$0xff]  }
 0x7f5   : > { %v2550_v11 = vmul.f32 %v4984_v7, %v2542_v8  ;;  %v2551_v12 = vmul.f32 %v4984_v7, %v2543_v9  ;;  %3224 = vmatprep.subr.bf16.mxu1 %v5808_v58  ;;  %v5826_v7 = vld [vmem:[#allocation25 + $0x184] ss:$16 sps:$4 sm:$0xff]   ;;  %v5829_v8 = vld [vmem:[#allocation25 + $0x18c] ss:$16 sps:$4 sm:$0xff]   ;;  %v5824_v9 = vld [vmem:[#allocation25 + $0x180] ss:$16 sps:$4 sm:$0xff]  }
 0x7f7   : > { %v2559_v13 = vadd.f32 %v4985_v10, %v2551_v12  ;;  %v2558_v14 = vadd.f32 %v4985_v10, %v2550_v11  ;;  %v5827_v10 = vld [vmem:[#allocation25 + $0x188] ss:$16 sps:$4 sm:$0xff]   ;;  %v5832_v11 = vld [vmem:[#allocation25 + $0x1a4] ss:$16 sps:$4 sm:$0xff]   ;;  %v5835_v12 = vld [vmem:[#allocation25 + $0x1ac] ss:$16 sps:$4 sm:$0xff]  }
 0x7f8   : > { %3225 = vmatpush1.bf16.msra.mxu1 %v5806_v60 }
 0x7f9   : > { %v2561_v15 = vmax.f32 %v2559_v13, 0.0  ;;  %v2560_v16 = vmax.f32 %v2558_v14, 0.0  ;;  %3226 = vmatprep.subr.bf16.mxu1 %v5814_v62  ;;  %v5830_v13 = vld [vmem:[#allocation25 + $0x1a0] ss:$16 sps:$4 sm:$0xff]   ;;  %v5833_v14 = vld [vmem:[#allocation25 + $0x1a8] ss:$16 sps:$4 sm:$0xff]  }
 0x7fb   : > { %v2578_v18 = vpack.c.bf16 %v2561_v15, %v2560_v16  ;;  %v5838_v15 = vld [vmem:[#allocation25 + $0x1c4] ss:$16 sps:$4 sm:$0xff]   ;;  %v5841_v16 = vld [vmem:[#allocation25 + $0x1cc] ss:$16 sps:$4 sm:$0xff]  }
 0x7fc   : > { %3227 = vmatpush1.bf16.msra.mxu1 %v5812_v0 }
 0x7fd   : > { %2704 = vmatmul.mubr.bf16.vlgmr.msra.gmra.mrb[8].mxu0 %v2578_v18  ;;  %3228 = vmatprep.subr.bf16.mxu1 %v5820_v2  ;;  %v5836_v18 = vld [vmem:[#allocation25 + $0x1c0] ss:$16 sps:$4 sm:$0xff]  }
 0x7fe   : > { %3250 = vmatpush1.bf16.msra.mxu0 %v5755_v25  ;;  %v5845_v25 = vld [vmem:[#allocation25 + $0x1e8] ss:$16 sps:$4 sm:$0xff]  }
 0x7ff   : > { %3251 = vmatprep.subr.bf16.mxu0 %v5763_v27  ;;  %v2579_v27 = vld [vmem:[#allocation20] sm:$0x3] }
 0x800   : > { %3229 = vmatpush1.bf16.msra.mxu1 %v5818_v5  ;;  %v2584_v28 = vrot.slane %v2579_v27, %v7822_v21  ;;  %v2588_v30 = vrot.slane %v2579_v27, %v7826_v23 }
 0x801   : > { %3230 = vmatprep.subr.bf16.mxu1 %v5826_v7 }
 0x802   : > { %3252 = vmatpush1.bf16.msra.mxu0 %v5761_v29 }
 0x803   : > { %3253 = vmatprep.subr.bf16.mxu0 %v5769_v31 }
 0x804   : > { %3231 = vmatpush1.bf16.msra.mxu1 %v5824_v9 }
 0x805   : > { %3232 = vmatprep.subr.bf16.mxu1 %v5832_v11 }
 0x806   : > { %3254 = vmatpush1.bf16.msra.mxu0 %v5767_v34 }
 0x807   : > { %3255 = vmatprep.subr.bf16.mxu0 %v5775_v36 }
 0x808   : > { %3233 = vmatpush1.bf16.msra.mxu1 %v5830_v13 }
 0x809   : > { %3234 = vmatprep.subr.bf16.mxu1 %v5838_v15 }
 0x80a   : > { %3256 = vmatpush1.bf16.msra.mxu0 %v5773_v38 }
 0x80b   : > { %3257 = vmatprep.subr.bf16.mxu0 %v5781_v40 }
 0x80c   : > { %3235 = vmatpush1.bf16.msra.mxu1 %v5836_v18  ;;  %v2714_v18 = vld [vmem:[#allocation22] sm:$0x3] }
 0x80d   : > { %3236 = vmatprep.subr.bf16.mxu1 %v5844_v24 }
 0x80e   : > { %3258 = vmatpush1.bf16.msra.mxu0 %v5779_v42 }
 0x80f   : > { %3259 = vmatprep.subr.bf16.mxu0 %v5787_v44 }
 0x810   : > { %3237 = vmatpush1.bf16.msra.mxu1 %v5842_v22  ;;  %v2768_v22 = vrot.slane %v2714_v18, %v7822_v21 }
 0x812   : > { %3260 = vmatpush1.bf16.msra.mxu0 %v5785_v46 }
 0x813   : > { %3261 = vmatprep.subr.bf16.mxu0 %v5793_v48 }
 0x816   : > { %3262 = vmatpush1.bf16.msra.mxu0 %v5791_v50 }
 0x817   : > { %3263 = vmatprep.subr.bf16.mxu0 %v5799_v52 }
 0x81a   : > { %3264 = vmatpush1.bf16.msra.mxu0 %v5797_v53 }
 0x81b   : > { %3265 = vmatprep.subr.bf16.mxu0 %v5805_v55 }
 0x81e   : > { %3266 = vmatpush1.bf16.msra.mxu0 %v5803_v57 }
 0x81f   : > { %3267 = vmatprep.subr.bf16.mxu0 %v5811_v59 }
 0x822   : > { %3268 = vmatpush1.bf16.msra.mxu0 %v5809_v61 }
 0x823   : > { %3269 = vmatprep.subr.bf16.mxu0 %v5817_v63 }
 0x826   : > { %3270 = vmatpush1.bf16.msra.mxu0 %v5815_v1 }
 0x827   : > { %3271 = vmatprep.subr.bf16.mxu0 %v5823_v4 }
 0x82a   : > { %3272 = vmatpush1.bf16.msra.mxu0 %v5821_v6 }
 0x82b   : > { %3273 = vmatprep.subr.bf16.mxu0 %v5829_v8 }
 0x82e   : > { %3274 = vmatpush1.bf16.msra.mxu0 %v5827_v10 }
 0x82f   : > { %3275 = vmatprep.subr.bf16.mxu0 %v5835_v12 }
 0x832   : > { %3276 = vmatpush1.bf16.msra.mxu0 %v5833_v14 }
 0x833   : > { %3277 = vmatprep.subr.bf16.mxu0 %v5841_v16 }
 0x836   : > { %3278 = vmatpush1.bf16.msra.mxu0 %v5839_v19  ;;  %v2715_v19 = vld [vmem:[#allocation23] sm:$0x3] }
 0x837   : > { %3279 = vmatprep.subr.bf16.mxu0 %v5847_v26 }
 0x83a   : > { %3280 = vmatpush1.bf16.msra.mxu0 %v5845_v25  ;;  %v2772_v25 = vrot.slane %v2714_v18, %v7826_v23  ;;  %v2864_v18 = vld [vmem:[#allocation26] sm:$0xf] }
 0x8d0   : > { %v2705_v29 = vpop.f32.mrb[8].mxu0 }
 0x8d1   : > { %v2707_v31 = vpop.f32.mrb[9].mxu0  ;;  %v2706_v34 = vadd.f32 %v2705_v29, %v2584_v28  ;;  %v2783_v29 = vrot.slane %v2715_v19, %v7822_v21 }
 0x8d2   : > { %v2709_v32 = vpop.f32.mrb[10].mxu0  ;;  %v2708_v37 = vadd.f32 %v2707_v31, %v2588_v30 }
 0x8d3   : > { %v2710_v35 = vadd.f32 %v2709_v32, %v2584_v28  ;;  %v2711_v36 = vpop.f32.mrb[11].mxu0  ;;  %v2787_v32 = vrot.slane %v2715_v19, %v7826_v23  ;;  %v7898_v19 = vsub.s32 3, %v7819_v20 }
 0x8d4   : > { %v2712_v38 = vadd.f32 %v2711_v36, %v2588_v30 }
 0x8d5   : > { %v2716_v39 = vadd.f32 %v2710_v35, %v2706_v34 }
 0x8d6   : > { %v2723_v40 = vadd.f32 %v2712_v38, %v2708_v37 }
 0x8d7   : > { %v2717_v41 = vrot.slane %v2716_v39, 4 }
 0x8d8   : > { %v2724_v42 = vrot.slane %v2723_v40, 4 }
 0x8d9   : > { %v2718_v43 = vadd.f32 %v2717_v41, %v2716_v39 }
 0x8da   : > { %v2725_v44 = vadd.f32 %v2724_v42, %v2723_v40 }
 0x8db   : > { %v2719_v45 = vrot.slane %v2718_v43, 2 }
 0x8dc   : > { %v2726_v46 = vrot.slane %v2725_v44, 2 }
 0x8dd   : > { %v2720_v47 = vadd.f32 %v2719_v45, %v2718_v43 }
 0x8de   : > { %v2727_v48 = vadd.f32 %v2726_v46, %v2725_v44 }
 0x8df   : > { %v2721_v49 = vrot.slane %v2720_v47, 1 }
 0x8e0   : > { %v2728_v50 = vrot.slane %v2727_v48, 1 }
 0x8e1   : > { %v2722_v51 = vadd.f32 %v2721_v49, %v2720_v47  ;;  %v5848_v49 = vld [vmem:[#allocation31] ss:$8 sps:$4 sm:$0xff]  }
 0x8e2   : > { %v2729_v52 = vadd.f32 %v2728_v50, %v2727_v48  ;;  %v5850_v48 = vld [vmem:[#allocation31 + $0x4] ss:$8 sps:$4 sm:$0xff]   ;;  %v5853_v50 = vld [vmem:[#allocation31 + $0x14] ss:$8 sps:$4 sm:$0xff]  }
 0x8e3   : > { %v2730_v3 = vmul.f32 0.0625, %v2722_v51  ;;  %3901 = vmatprep.subr.bf16.mxu1 %v5850_v48  ;;  %v5851_v51 = vld [vmem:[#allocation31 + $0x10] ss:$8 sps:$4 sm:$0xff]  }
 0x8e4   : > { %v2731_v53 = vmul.f32 0.0625, %v2729_v52  ;;  %v5856_v52 = vld [vmem:[#allocation31 + $0x24] ss:$8 sps:$4 sm:$0xff]  }
 0x8e5   : > { %v2732_v54 = vsub.f32 %v2706_v34, %v2730_v3  ;;  %v2734_v55 = vsub.f32 %v2710_v35, %v2730_v3  ;;  %v5854_v3 = vld [vmem:[#allocation31 + $0x20] ss:$8 sps:$4 sm:$0xff]  }
 0x8e6   : > { %v2733_v56 = vsub.f32 %v2708_v37, %v2731_v53  ;;  %v2735_v57 = vsub.f32 %v2712_v38, %v2731_v53  ;;  %v5859_v53 = vld [vmem:[#allocation31 + $0x34] ss:$8 sps:$4 sm:$0xff]  }
 0x8e7   : > { %v2736_v58 = vmul.f32 %v2732_v54, %v2732_v54  ;;  %v2738_v59 = vmul.f32 %v2734_v55, %v2734_v55 }
 0x8e8   : > { %v2737_v60 = vmul.f32 %v2733_v56, %v2733_v56  ;;  %v2739_v61 = vmul.f32 %v2735_v57, %v2735_v57 }
 0x8e9   : > { %v2740_v62 = vadd.f32 %v2738_v59, %v2736_v58  ;;  %v5863_v58 = vld [vmem:[#allocation31 + $0x50] ss:$8 sps:$4 sm:$0xff]   ;;  %v5868_v59 = vld [vmem:[#allocation31 + $0x64] ss:$8 sps:$4 sm:$0xff]  }
 0x8ea   : > { %v2747_v63 = vadd.f32 %v2739_v61, %v2737_v60  ;;  %v5866_v60 = vld [vmem:[#allocation31 + $0x60] ss:$8 sps:$4 sm:$0xff]   ;;  %v5871_v61 = vld [vmem:[#allocation31 + $0x74] ss:$8 sps:$4 sm:$0xff]  }
 0x8eb   : > { %v2741_v0 = vrot.slane %v2740_v62, 4 }
 0x8ec   : > { %v2748_v1 = vrot.slane %v2747_v63, 4 }
 0x8ed   : > { %v2742_v2 = vadd.f32 %v2741_v0, %v2740_v62  ;;  %v5869_v62 = vld [vmem:[#allocation31 + $0x70] ss:$8 sps:$4 sm:$0xff]   ;;  %v5872_v0 = vld [vmem:[#allocation31 + $0x80] ss:$8 sps:$4 sm:$0xff]  }
 0x8ee   : > { %v2749_v4 = vadd.f32 %v2748_v1, %v2747_v63  ;;  %v5874_v63 = vld [vmem:[#allocation31 + $0x84] ss:$8 sps:$4 sm:$0xff]   ;;  %v5877_v1 = vld [vmem:[#allocation31 + $0x94] ss:$8 sps:$4 sm:$0xff]  }
 0x8ef   : > { %v2743_v5 = vrot.slane %v2742_v2, 2 }
 0x8f0   : > { %v2750_v6 = vrot.slane %v2749_v4, 2 }
 0x8f1   : > { %v2744_v7 = vadd.f32 %v2743_v5, %v2742_v2  ;;  %v5875_v2 = vld [vmem:[#allocation31 + $0x90] ss:$8 sps:$4 sm:$0xff]   ;;  %v5878_v5 = vld [vmem:[#allocation31 + $0xa0] ss:$8 sps:$4 sm:$0xff]  }
 0x8f2   : > { %v2751_v8 = vadd.f32 %v2750_v6, %v2749_v4  ;;  %v5880_v4 = vld [vmem:[#allocation31 + $0xa4] ss:$8 sps:$4 sm:$0xff]   ;;  %v5883_v6 = vld [vmem:[#allocation31 + $0xb4] ss:$8 sps:$4 sm:$0xff]  }
 0x8f3   : > { %v2745_v9 = vrot.slane %v2744_v7, 1 }
 0x8f4   : > { %v2752_v10 = vrot.slane %v2751_v8, 1 }
 0x8f5   : > { %v2746_v11 = vadd.f32 %v2745_v9, %v2744_v7  ;;  %v5881_v7 = vld [vmem:[#allocation31 + $0xb0] ss:$8 sps:$4 sm:$0xff]   ;;  %v5884_v9 = vld [vmem:[#allocation31 + $0xc0] ss:$8 sps:$4 sm:$0xff]  }
 0x8f6   : > { %v2753_v12 = vadd.f32 %v2752_v10, %v2751_v8  ;;  %v5886_v8 = vld [vmem:[#allocation31 + $0xc4] ss:$8 sps:$4 sm:$0xff]   ;;  %v5889_v10 = vld [vmem:[#allocation31 + $0xd4] ss:$8 sps:$4 sm:$0xff]  }
 0x8f7   : > { %v2754_v13 = vmul.f32 0.0625, %v2746_v11  ;;  %v5887_v11 = vld [vmem:[#allocation31 + $0xd0] ss:$8 sps:$4 sm:$0xff]  }
 0x8f8   : > { %v2755_v14 = vmul.f32 0.0625, %v2753_v12  ;;  %v5890_v12 = vld [vmem:[#allocation31 + $0xe0] ss:$8 sps:$4 sm:$0xff]  }
 0x8f9   : > { %v2756_v15 = vadd.f32 1e-05, %v2754_v13  ;;  %v5892_v13 = vld [vmem:[#allocation31 + $0xe4] ss:$8 sps:$4 sm:$0xff]  }
 0x8fa   : > { %v2757_v16 = vadd.f32 1e-05, %v2755_v14  ;;  %v5895_v14 = vld [vmem:[#allocation31 + $0xf4] ss:$8 sps:$4 sm:$0xff]  }
 0x8fb   : > { %5972 = vrsqrt.f32 %v2756_v15  ;;  %v5893_v15 = vld [vmem:[#allocation31 + $0xf0] ss:$8 sps:$4 sm:$0xff]  }
 0x8fc   : > { %5974 = vrsqrt.f32 %v2757_v16  ;;  %v5898_v16 = vld [vmem:[#allocation31 + $0x104] ss:$8 sps:$4 sm:$0xff]  }
 0x905   : > { %v5973_v24 = vpop.eup %5972 }
 0x906   : > { %v5975_v26 = vpop.eup %5974  ;;  %v2760_v27 = vmul.f32 %v5973_v24, %v2732_v54  ;;  %v2762_v28 = vmul.f32 %v5973_v24, %v2734_v55  ;;  %v5857_v54 = vld [vmem:[#allocation31 + $0x30] ss:$8 sps:$4 sm:$0xff]   ;;  %v5862_v55 = vld [vmem:[#allocation31 + $0x44] ss:$8 sps:$4 sm:$0xff]   ;;  %v2877_v24 = vrot.slane %v2864_v18, %v7870_v33 }
 0x907   : > { %v2761_v30 = vmul.f32 %v5975_v26, %v2733_v56  ;;  %v2763_v31 = vmul.f32 %v5975_v26, %v2735_v57  ;;  %v5860_v56 = vld [vmem:[#allocation31 + $0x40] ss:$8 sps:$4 sm:$0xff]   ;;  %v5865_v57 = vld [vmem:[#allocation31 + $0x54] ss:$8 sps:$4 sm:$0xff]  }
 0x908   : > { %v2775_v34 = vmul.f32 %v2768_v22, %v2760_v27  ;;  %v2777_v35 = vmul.f32 %v2768_v22, %v2762_v28  ;;  %v2869_v22 = vrot.slane %v2864_v18, %v7822_v21  ;;  %v2873_v27 = vrot.slane %v2864_v18, %v7826_v23 }
 0x909   : > { %v2778_v36 = vmul.f32 %v2772_v25, %v2763_v31  ;;  %v2776_v37 = vmul.f32 %v2772_v25, %v2761_v30  ;;  %v2881_v28 = vrot.slane %v2864_v18, %v7898_v19 }
 0x90a   : > { %v2792_v38 = vadd.f32 %v2783_v29, %v2777_v35  ;;  %v2790_v39 = vadd.f32 %v2783_v29, %v2775_v34 }
 0x90b   : > { %v2791_v40 = vadd.f32 %v2787_v32, %v2776_v37  ;;  %v2793_v41 = vadd.f32 %v2787_v32, %v2778_v36 }
 0x90c   : > { %v2796_v42 = vmax.f32 %v2792_v38, 0.0  ;;  %v2794_v43 = vmax.f32 %v2790_v39, 0.0 }
 0x90d   : > { %v2795_v44 = vmax.f32 %v2791_v40, 0.0  ;;  %v2797_v45 = vmax.f32 %v2793_v41, 0.0 }
 0x90e   : > { %v2862_v46 = vpack.c.bf16 %v2796_v42, %v2794_v43 }
 0x90f   : > { %v2863_v47 = vpack.c.bf16 %v2797_v45, %v2795_v44 }
 0x911   : > { %3238 = vmatprep.mubr.bf16.mxu1 %v2863_v47  ;;  %3281 = vmatprep.mubr.bf16.mxu0 %v2863_v47 }
 0x912   : > { %3239 = vmatmul.mubr.bf16.vlgmr.msra.gmra.mrb[12].mxu1 %v2862_v46  ;;  %3282 = vmatmul.mubr.bf16.vlgmr.msra.gmra.mrb[12].mxu0 %v2862_v46 }
 0x913   : > { %3902 = vmatpush1.bf16.msra.mxu1 %v5848_v49 }
 0x914   : > { %3903 = vmatprep.subr.bf16.mxu1 %v5853_v50 }
 0x917   : > { %3904 = vmatpush1.bf16.msra.mxu1 %v5851_v51 }
 0x918   : > { %3905 = vmatprep.subr.bf16.mxu1 %v5856_v52 }
 0x91b   : > { %3906 = vmatpush1.bf16.msra.mxu1 %v5854_v3 }
 0x91c   : > { %3907 = vmatprep.subr.bf16.mxu1 %v5859_v53 }
 0x91f   : > { %3908 = vmatpush1.bf16.msra.mxu1 %v5857_v54 }
 0x920   : > { %3909 = vmatprep.subr.bf16.mxu1 %v5862_v55 }
 0x923   : > { %3910 = vmatpush1.bf16.msra.mxu1 %v5860_v56 }
 0x924   : > { %3911 = vmatprep.subr.bf16.mxu1 %v5865_v57 }
 0x927   : > { %3912 = vmatpush1.bf16.msra.mxu1 %v5863_v58 }
 0x928   : > { %3913 = vmatprep.subr.bf16.mxu1 %v5868_v59 }
 0x92b   : > { %3914 = vmatpush1.bf16.msra.mxu1 %v5866_v60 }
 0x92c   : > { %3915 = vmatprep.subr.bf16.mxu1 %v5871_v61 }
 0x92f   : > { %3916 = vmatpush1.bf16.msra.mxu1 %v5869_v62 }
 0x930   : > { %3917 = vmatprep.subr.bf16.mxu1 %v5874_v63 }
 0x933   : > { %3918 = vmatpush1.bf16.msra.mxu1 %v5872_v0 }
 0x934   : > { %3919 = vmatprep.subr.bf16.mxu1 %v5877_v1 }
 0x937   : > { %3920 = vmatpush1.bf16.msra.mxu1 %v5875_v2 }
 0x938   : > { %3921 = vmatprep.subr.bf16.mxu1 %v5880_v4 }
 0x93b   : > { %3922 = vmatpush1.bf16.msra.mxu1 %v5878_v5 }
 0x93c   : > { %3923 = vmatprep.subr.bf16.mxu1 %v5883_v6 }
 0x93f   : > { %3924 = vmatpush1.bf16.msra.mxu1 %v5881_v7 }
 0x940   : > { %3925 = vmatprep.subr.bf16.mxu1 %v5886_v8 }
 0x943   : > { %3926 = vmatpush1.bf16.msra.mxu1 %v5884_v9 }
 0x944   : > { %3927 = vmatprep.subr.bf16.mxu1 %v5889_v10 }
 0x947   : > { %3928 = vmatpush1.bf16.msra.mxu1 %v5887_v11 }
 0x948   : > { %3929 = vmatprep.subr.bf16.mxu1 %v5892_v13 }
 0x94b   : > { %3930 = vmatpush1.bf16.msra.mxu1 %v5890_v12 }
 0x94c   : > { %3931 = vmatprep.subr.bf16.mxu1 %v5895_v14 }
 0x94f   : > { %3932 = vmatpush1.bf16.msra.mxu1 %v5893_v15 }
 0x950   : > { %3942 = vmatprep.subr.bf16.mxu1 %v5898_v16 }
 0x9e5   : > { %v3240_v25 = vpop.f32.mrb[12].mxu1  ;;  %v3283_v26 = vpop.f32.mrb[12].mxu0 }
 0x9e6   : > { %v3242_v29 = vpop.f32.mrb[13].mxu1  ;;  %v3285_v30 = vpop.f32.mrb[13].mxu0  ;;  %v3241_v34 = vadd.f32 %v3240_v25, %v2869_v22  ;;  %v3284_v35 = vadd.f32 %v3283_v26, %v2877_v24 }
 0x9e7   : > { %v3244_v31 = vpop.f32.mrb[14].mxu1  ;;  %v3287_v32 = vpop.f32.mrb[14].mxu0  ;;  %v3243_v39 = vadd.f32 %v3242_v29, %v2873_v27  ;;  %v3286_v40 = vadd.f32 %v3285_v30, %v2881_v28 }
 0x9e8   : > { %v3245_v36 = vadd.f32 %v3244_v31, %v2869_v22  ;;  %v3288_v37 = vadd.f32 %v3287_v32, %v2877_v24  ;;  %v3246_v20 = vpop.f32.mrb[15].mxu1  ;;  %v3289_v38 = vpop.f32.mrb[15].mxu0 }
 0x9e9   : > { %v3247_v41 = vadd.f32 %v3246_v20, %v2873_v27  ;;  %v3290_v42 = vadd.f32 %v3289_v38, %v2881_v28 }
 0x9ea   : > { %v3294_v43 = vadd.f32 %v3245_v36, %v3241_v34  ;;  %v3308_v44 = vadd.f32 %v3288_v37, %v3284_v35 }
 0x9eb   : > { %v3301_v45 = vadd.f32 %v3247_v41, %v3243_v39  ;;  %v3315_v46 = vadd.f32 %v3290_v42, %v3286_v40 }
 0x9ec   : > { %v3295_v47 = vrot.slane %v3294_v43, 4  ;;  %v3309_v48 = vrot.slane %v3308_v44, 4 }
 0x9ed   : > { %v3302_v49 = vrot.slane %v3301_v45, 4  ;;  %v3316_v50 = vrot.slane %v3315_v46, 4 }
 0x9ee   : > { %v3296_v51 = vadd.f32 %v3295_v47, %v3294_v43  ;;  %v3310_v52 = vadd.f32 %v3309_v48, %v3308_v44 }
 0x9ef   : > { %v3303_v3 = vadd.f32 %v3302_v49, %v3301_v45  ;;  %v3317_v53 = vadd.f32 %v3316_v50, %v3315_v46 }
 0x9f0   : > { %v3297_v54 = vrot.slane %v3296_v51, 2  ;;  %v3311_v55 = vrot.slane %v3310_v52, 2 }
 0x9f1   : > { %v3304_v56 = vrot.slane %v3303_v3, 2  ;;  %v3318_v57 = vrot.slane %v3317_v53, 2 }
 0x9f2   : > { %v3298_v58 = vadd.f32 %v3297_v54, %v3296_v51  ;;  %v3312_v59 = vadd.f32 %v3311_v55, %v3310_v52 }
 0x9f3   : > { %v3305_v60 = vadd.f32 %v3304_v56, %v3303_v3  ;;  %v3319_v61 = vadd.f32 %v3318_v57, %v3317_v53 }
 0x9f4   : > { %v3299_v62 = vrot.slane %v3298_v58, 1  ;;  %v3313_v63 = vrot.slane %v3312_v59, 1 }
 0x9f5   : > { %v3306_v0 = vrot.slane %v3305_v60, 1  ;;  %v3320_v1 = vrot.slane %v3319_v61, 1 }
 0x9f6   : > { %v3300_v2 = vadd.f32 %v3299_v62, %v3298_v58  ;;  %v3314_v4 = vadd.f32 %v3313_v63, %v3312_v59 }
 0x9f7   : > { %v3307_v5 = vadd.f32 %v3306_v0, %v3305_v60  ;;  %v3321_v6 = vadd.f32 %v3320_v1, %v3319_v61 }
 0x9f8   : > { %v3322_v7 = vmul.f32 0.0625, %v3300_v2  ;;  %v3324_v8 = vmul.f32 0.0625, %v3314_v4  ;;  %v3292_v4 = vld [vmem:[#allocation28] sm:$0xf] }
 0x9f9   : > { %v3323_v9 = vmul.f32 0.0625, %v3307_v5  ;;  %v3325_v10 = vmul.f32 0.0625, %v3321_v6  ;;  %v3293_v5 = vld [vmem:[#allocation29] sm:$0xf]  ;;  %v3394_v6 = vrot.slane %v3292_v4, %v7822_v21 }
 0x9fa   : > { %v7904_v11 = vsub.f32 %v3241_v34, %v3322_v7  ;;  %v7906_v12 = vsub.f32 %v3245_v36, %v3322_v7  ;;  %v7908_v13 = vsub.f32 %v3284_v35, %v3324_v8  ;;  %v7910_v14 = vsub.f32 %v3288_v37, %v3324_v8 }
 0x9fb   : > { %v7912_v15 = vsub.f32 %v3243_v39, %v3323_v9  ;;  %v7914_v16 = vsub.f32 %v3247_v41, %v3323_v9  ;;  %v7916_v18 = vsub.f32 %v3286_v40, %v3325_v10  ;;  %v7918_v22 = vsub.f32 %v3290_v42, %v3325_v10 }
 0x9fc   : > { %v3334_v24 = vmul.f32 %v7904_v11, %v7904_v11  ;;  %v3338_v25 = vmul.f32 %v7906_v12, %v7906_v12  ;;  %v3336_v26 = vmul.f32 %v7908_v13, %v7908_v13  ;;  %v3340_v27 = vmul.f32 %v7910_v14, %v7910_v14 }
 0x9fd   : > { %v3335_v28 = vmul.f32 %v7912_v15, %v7912_v15  ;;  %v3339_v29 = vmul.f32 %v7914_v16, %v7914_v16  ;;  %v3337_v30 = vmul.f32 %v7916_v18, %v7916_v18  ;;  %v3341_v31 = vmul.f32 %v7918_v22, %v7918_v22 }
 0x9fe   : > { %v3342_v32 = vadd.f32 %v3338_v25, %v3334_v24  ;;  %v3356_v34 = vadd.f32 %v3340_v27, %v3336_v26  ;;  %v3423_v8 = vrot.slane %v3293_v5, %v7822_v21  ;;  %v3402_v9 = vrot.slane %v3292_v4, %v7870_v33 }
 0x9ff   : > { %v3349_v35 = vadd.f32 %v3339_v29, %v3335_v28  ;;  %v3363_v36 = vadd.f32 %v3341_v31, %v3337_v30  ;;  %v3398_v10 = vrot.slane %v3292_v4, %v7826_v23  ;;  %v3431_v27 = vrot.slane %v3293_v5, %v7870_v33 }
 0xa00   : > { %v3343_v37 = vrot.slane %v3342_v32, 4  ;;  %v3357_v20 = vrot.slane %v3356_v34, 4  ;;  %v3406_v28 = vrot.slane %v3292_v4, %v7898_v19 }
 0xa01   : > { %v3350_v38 = vrot.slane %v3349_v35, 4  ;;  %v3364_v39 = vrot.slane %v3363_v36, 4 }
 0xa02   : > { %v3344_v40 = vadd.f32 %v3343_v37, %v3342_v32  ;;  %v3358_v41 = vadd.f32 %v3357_v20, %v3356_v34  ;;  %v3427_v32 = vrot.slane %v3293_v5, %v7826_v23  ;;  %v3435_v34 = vrot.slane %v3293_v5, %v7898_v19 }
 0xa03   : > { %v3351_v42 = vadd.f32 %v3350_v38, %v3349_v35  ;;  %v3365_v43 = vadd.f32 %v3364_v39, %v3363_v36 }
 0xa04   : > { %v3345_v44 = vrot.slane %v3344_v40, 2  ;;  %v3359_v45 = vrot.slane %v3358_v41, 2 }
 0xa05   : > { %v3352_v46 = vrot.slane %v3351_v42, 2  ;;  %v3366_v47 = vrot.slane %v3365_v43, 2 }
 0xa06   : > { %v3346_v48 = vadd.f32 %v3345_v44, %v3344_v40  ;;  %v3360_v49 = vadd.f32 %v3359_v45, %v3358_v41 }
 0xa07   : > { %v3353_v50 = vadd.f32 %v3352_v46, %v3351_v42  ;;  %v3367_v51 = vadd.f32 %v3366_v47, %v3365_v43 }
 0xa08   : > { %v3347_v52 = vrot.slane %v3346_v48, 1  ;;  %v3361_v3 = vrot.slane %v3360_v49, 1 }
 0xa09   : > { %v3354_v53 = vrot.slane %v3353_v50, 1  ;;  %v3368_v54 = vrot.slane %v3367_v51, 1 }
 0xa0a   : > { %v3348_v55 = vadd.f32 %v3347_v52, %v3346_v48  ;;  %v3362_v56 = vadd.f32 %v3361_v3, %v3360_v49 }
 0xa0b   : > { %v3355_v57 = vadd.f32 %v3354_v53, %v3353_v50  ;;  %v3369_v58 = vadd.f32 %v3368_v54, %v3367_v51 }
 0xa0c   : > { %v3370_v59 = vmul.f32 0.0625, %v3348_v55  ;;  %v3372_v60 = vmul.f32 0.0625, %v3362_v56 }
 0xa0d   : > { %v3371_v61 = vmul.f32 0.0625, %v3355_v57  ;;  %v3373_v62 = vmul.f32 0.0625, %v3369_v58 }
 0xa0e   : > { %v3374_v63 = vadd.f32 1e-05, %v3370_v59  ;;  %v3376_v0 = vadd.f32 1e-05, %v3372_v60 }
 0xa0f   : > { %v3375_v1 = vadd.f32 1e-05, %v3371_v61  ;;  %v3377_v2 = vadd.f32 1e-05, %v3373_v62 }
 0xa10   : > { %5976 = vrsqrt.f32 %v3374_v63 }
 0xa11   : > { %5978 = vrsqrt.f32 %v3376_v0 }
 0xa12   : > { %5980 = vrsqrt.f32 %v3375_v1 }
 0xa13   : > { %5982 = vrsqrt.f32 %v3377_v2 }
 0xa1a   : > { %v5977_v7 = vpop.eup %5976 }
 0xa1b   : > { %v5979_v24 = vpop.eup %5978  ;;  %v3382_v25 = vmul.f32 %v5977_v7, %v7904_v11  ;;  %v3386_v26 = vmul.f32 %v5977_v7, %v7906_v12 }
 0xa1c   : > { %v5981_v29 = vpop.eup %5980  ;;  %v3384_v30 = vmul.f32 %v5979_v24, %v7908_v13  ;;  %v3388_v31 = vmul.f32 %v5979_v24, %v7910_v14 }
 0xa1d   : > { %v5983_v35 = vpop.eup %5982  ;;  %v3411_v36 = vmul.f32 %v3394_v6, %v3382_v25  ;;  %v3415_v37 = vmul.f32 %v3394_v6, %v3386_v26  ;;  %v3383_v11 = vmul.f32 %v5981_v29, %v7912_v15  ;;  %v3387_v12 = vmul.f32 %v5981_v29, %v7914_v16 }
 0xa1e   : > { %v3413_v20 = vmul.f32 %v3402_v9, %v3384_v30  ;;  %v3417_v33 = vmul.f32 %v3402_v9, %v3388_v31  ;;  %v3385_v38 = vmul.f32 %v5983_v35, %v7916_v18  ;;  %v3389_v39 = vmul.f32 %v5983_v35, %v7918_v22 }
 0xa1f   : > { %v3440_v13 = vadd.f32 %v3423_v8, %v3411_v36  ;;  %v3444_v40 = vadd.f32 %v3423_v8, %v3415_v37  ;;  %v3412_v14 = vmul.f32 %v3398_v10, %v3383_v11  ;;  %v3416_v41 = vmul.f32 %v3398_v10, %v3387_v12 }
 0xa20   : > { %v3442_v42 = vadd.f32 %v3431_v27, %v3413_v20  ;;  %v3446_v43 = vadd.f32 %v3431_v27, %v3417_v33  ;;  %v3414_v19 = vmul.f32 %v3406_v28, %v3385_v38  ;;  %v3418_v44 = vmul.f32 %v3406_v28, %v3389_v39 }
 0xa21   : > { %v3448_v45 = vrot.slane %v3440_v13, 4  ;;  %v3472_v46 = vrot.slane %v3444_v40, 4  ;;  %v3441_v47 = vadd.f32 %v3427_v32, %v3412_v14  ;;  %v3445_v15 = vadd.f32 %v3427_v32, %v3416_v41  ;;  %v5896_v41 = vld [vmem:[#allocation31 + $0x100] ss:$8 sps:$4 sm:$0xff]  }
 0xa22   : > { %v3460_v48 = vrot.slane %v3442_v42, 4  ;;  %v3484_v16 = vrot.slane %v3446_v43, 4  ;;  %v3443_v49 = vadd.f32 %v3435_v34, %v3414_v19  ;;  %v3447_v50 = vadd.f32 %v3435_v34, %v3418_v44  ;;  %v5901_v19 = vld [vmem:[#allocation31 + $0x114] ss:$8 sps:$4 sm:$0xff]  }
 0xa23   : > { %v3449_v18 = vmax.f32 %v3440_v13, %v3448_v45  ;;  %v3473_v51 = vmax.f32 %v3444_v40, %v3472_v46  ;;  %v3454_v22 = vrot.slane %v3441_v47, 4  ;;  %v3478_v52 = vrot.slane %v3445_v15, 4  ;;  %v5899_v45 = vld [vmem:[#allocation31 + $0x110] ss:$8 sps:$4 sm:$0xff]   ;;  %v5904_v46 = vld [vmem:[#allocation31 + $0x124] ss:$8 sps:$4 sm:$0xff]  }
 0xa24   : > { %v3461_v3 = vmax.f32 %v3442_v42, %v3460_v48  ;;  %v3485_v53 = vmax.f32 %v3446_v43, %v3484_v16  ;;  %v3466_v54 = vrot.slane %v3443_v49, 4  ;;  %v3490_v55 = vrot.slane %v3447_v50, 4  ;;  %v5905_v48 = vld [vmem:[#allocation31 + $0x130] ss:$8 sps:$4 sm:$0xff]   ;;  %v5910_v16 = vld [vmem:[#allocation31 + $0x144] ss:$8 sps:$4 sm:$0xff]  }
 0xa25   : > { %v3474_v56 = vrot.slane %v3473_v51, 2  ;;  %v3479_v57 = vmax.f32 %v3445_v15, %v3478_v52  ;;  %v3455_v58 = vmax.f32 %v3441_v47, %v3454_v22  ;;  %v3450_v59 = vrot.slane %v3449_v18, 2  ;;  %v5902_v47 = vld [vmem:[#allocation31 + $0x120] ss:$8 sps:$4 sm:$0xff]   ;;  %v5907_v15 = vld [vmem:[#allocation31 + $0x134] ss:$8 sps:$4 sm:$0xff]  }
 0xa26   : > { %v3486_v60 = vrot.slane %v3485_v53, 2  ;;  %v3491_v61 = vmax.f32 %v3447_v50, %v3490_v55  ;;  %v3467_v62 = vmax.f32 %v3443_v49, %v3466_v54  ;;  %v3462_v63 = vrot.slane %v3461_v3, 2  ;;  %v5908_v49 = vld [vmem:[#allocation31 + $0x140] ss:$8 sps:$4 sm:$0xff]   ;;  %v5913_v50 = vld [vmem:[#allocation31 + $0x154] ss:$8 sps:$4 sm:$0xff]  }
 0xa27   : > { %v3475_v0 = vmax.f32 %v3473_v51, %v3474_v56  ;;  %v3480_v1 = vrot.slane %v3479_v57, 2  ;;  %v3456_v2 = vrot.slane %v3455_v58, 2  ;;  %v3451_v4 = vmax.f32 %v3449_v18, %v3450_v59  ;;  %v5911_v18 = vld [vmem:[#allocation31 + $0x150] ss:$8 sps:$4 sm:$0xff]   ;;  %v5916_v51 = vld [vmem:[#allocation31 + $0x164] ss:$8 sps:$4 sm:$0xff]  }
 0xa28   : > { %v3487_v5 = vmax.f32 %v3485_v53, %v3486_v60  ;;  %v3492_v6 = vrot.slane %v3491_v61, 2  ;;  %v3468_v7 = vrot.slane %v3467_v62, 2  ;;  %v3463_v8 = vmax.f32 %v3461_v3, %v3462_v63  ;;  %v5914_v22 = vld [vmem:[#allocation31 + $0x160] ss:$8 sps:$4 sm:$0xff]   ;;  %v5919_v52 = vld [vmem:[#allocation31 + $0x174] ss:$8 sps:$4 sm:$0xff]  }
 0xa29   : > { %v3457_v9 = vmax.f32 %v3455_v58, %v3456_v2  ;;  %v3481_v10 = vmax.f32 %v3479_v57, %v3480_v1  ;;  %v3452_v24 = vrot.slane %v3451_v4, 1  ;;  %v3476_v25 = vrot.slane %v3475_v0, 1  ;;  %v5917_v3 = vld [vmem:[#allocation31 + $0x170] ss:$8 sps:$4 sm:$0xff]   ;;  %v5922_v53 = vld [vmem:[#allocation31 + $0x184] ss:$8 sps:$4 sm:$0xff]  }
 0xa2a   : > { %v3469_v26 = vmax.f32 %v3467_v62, %v3468_v7  ;;  %v3493_v27 = vmax.f32 %v3491_v61, %v3492_v6  ;;  %v3464_v28 = vrot.slane %v3463_v8, 1  ;;  %v3488_v29 = vrot.slane %v3487_v5, 1  ;;  %v5920_v54 = vld [vmem:[#allocation31 + $0x180] ss:$8 sps:$4 sm:$0xff]   ;;  %v5925_v55 = vld [vmem:[#allocation31 + $0x194] ss:$8 sps:$4 sm:$0xff]  }
 0xa2b   : > { %v3458_v30 = vrot.slane %v3457_v9, 1  ;;  %v3482_v31 = vrot.slane %v3481_v10, 1  ;;  %v3453_v32 = vmax.f32 %v3451_v4, %v3452_v24  ;;  %v3477_v34 = vmax.f32 %v3475_v0, %v3476_v25  ;;  %v5923_v56 = vld [vmem:[#allocation31 + $0x190] ss:$8 sps:$4 sm:$0xff]   ;;  %v5928_v57 = vld [vmem:[#allocation31 + $0x1a4] ss:$8 sps:$4 sm:$0xff]  }
 0xa2c   : > { %v3470_v35 = vrot.slane %v3469_v26, 1  ;;  %v3494_v36 = vrot.slane %v3493_v27, 1  ;;  %v3465_v37 = vmax.f32 %v3463_v8, %v3464_v28  ;;  %v3489_v11 = vmax.f32 %v3487_v5, %v3488_v29  ;;  %v5926_v58 = vld [vmem:[#allocation31 + $0x1a0] ss:$8 sps:$4 sm:$0xff]   ;;  %v5931_v59 = vld [vmem:[#allocation31 + $0x1b4] ss:$8 sps:$4 sm:$0xff]  }
 0xa2d   : > { %v3459_v12 = vmax.f32 %v3457_v9, %v3458_v30  ;;  %v3483_v20 = vmax.f32 %v3481_v10, %v3482_v31  ;;  %v3497_v33 = vsel %vm3496_vm1, %v3453_v32, %v3477_v34  ;;  %v5929_v60 = vld [vmem:[#allocation31 + $0x1b0] ss:$8 sps:$4 sm:$0xff]   ;;  %v5934_v61 = vld [vmem:[#allocation31 + $0x1c4] ss:$8 sps:$4 sm:$0xff]   ;;  %v5932_v62 = vld [vmem:[#allocation31 + $0x1c0] ss:$8 sps:$4 sm:$0xff]  }
 0xa2e   : > { %v3471_v38 = vmax.f32 %v3469_v26, %v3470_v35  ;;  %v3495_v39 = vmax.f32 %v3493_v27, %v3494_v36  ;;  %v7954_v13 = vsel %vm3496_vm1, %v3465_v37, %v3489_v11  ;;  %v3565_v43 = vpack.c.bf16 %v3497_v33, %v3497_v33  ;;  %v5937_v63 = vld [vmem:[#allocation31 + $0x1d4] ss:$8 sps:$4 sm:$0xff]   ;;  %v5935_v0 = vld [vmem:[#allocation31 + $0x1d0] ss:$8 sps:$4 sm:$0xff]   ;;  %v5940_v1 = vld [vmem:[#allocation31 + $0x1e4] ss:$8 sps:$4 sm:$0xff]  }
 0xa2f   : > { %v3498_v40 = vsel %vm3496_vm1, %v3459_v12, %v3483_v20  ;;  %v5938_v2 = vld [vmem:[#allocation31 + $0x1e0] ss:$8 sps:$4 sm:$0xff]   ;;  %v5943_v4 = vld [vmem:[#allocation31 + $0x1f4] ss:$8 sps:$4 sm:$0xff]   ;;  %v5941_v5 = vld [vmem:[#allocation31 + $0x1f0] ss:$8 sps:$4 sm:$0xff]   ;;  %v3567_v6 = vpack.c.bf16 %v7954_v13, %v7954_v13 }
 0xa30   : > { %v3566_v14 = vpack.c.bf16 %v3498_v40, %v3498_v40  ;;  %v3500_v42 = vsel %vm3496_vm1, %v3471_v38, %v3495_v39  ;;  %v5944_v7 = vld [vmem:[#allocation37 + $0x40] sm:$0xff]   ;;  %v5946_v9 = vld [vmem:[#allocation37 + $0x48] sm:$0xff]   ;;  %v5948_v24 = vld [vmem:[#allocation37 + $0x50] sm:$0xff]  }
 0xa31   : > { %v3568_v44 = vpack.c.bf16 %v3500_v42, %v3500_v42  ;;  %v5945_v8 = vld [vmem:[#allocation37] sm:$0xff]   ;;  %5196 = vmatprep.subr.bf16.mxu0 %v5944_v7  ;;  %v5947_v10 = vld [vmem:[#allocation37 + $0x8] sm:$0xff]   ;;  %v5949_v25 = vld [vmem:[#allocation37 + $0x10] sm:$0xff]  }
 0xa32   : > { %3933 = vmatprep.mubr.bf16.mxu1 %v3566_v14  ;;  %5197 = vmatpush3.bf16.msra.mxu0 %v5945_v8  ;;  %v5950_v26 = vld [vmem:[#allocation37 + $0x58] sm:$0xff]   ;;  %v5952_v28 = vld [vmem:[#allocation37 + $0x60] sm:$0xff]   ;;  %v5954_v30 = vld [vmem:[#allocation37 + $0x68] sm:$0xff]  }
 0xa33   : > { %3934 = vmatmul.mubr.bf16.vlgmr.msra.gmra.mrb[16].mxu1 %v3565_v43  ;;  %5198 = vmatprep.subr.bf16.mxu0 %v5946_v9  ;;  %v5951_v27 = vld [vmem:[#allocation37 + $0x18] sm:$0xff]   ;;  %v5953_v29 = vld [vmem:[#allocation37 + $0x20] sm:$0xff]   ;;  %v5955_v31 = vld [vmem:[#allocation37 + $0x28] sm:$0xff]  }
 0xa34   : > { %3943 = vmatpush1.bf16.msra.mxu1 %v5896_v41  ;;  %3974 = vmatprep.mubr.bf16.mxu1 %v3568_v44  ;;  %v5956_v32 = vld [vmem:[#allocation37 + $0x70] sm:$0xff]   ;;  %v5958_v35 = vld [vmem:[#allocation37 + $0x78] sm:$0xff]  }
 0xa35   : > { %3944 = vmatprep.subr.bf16.mxu1 %v5901_v19  ;;  %v5957_v34 = vld [vmem:[#allocation37 + $0x30] sm:$0xff]   ;;  %v5959_v36 = vld [vmem:[#allocation37 + $0x38] sm:$0xff]  }
 0xa36   : > { %5199 = vmatpush3.bf16.msra.mxu0 %v5947_v10  ;;  %v3569_v37 = vld [vmem:[#allocation32] sm:$0x3]  ;;  %v3983_v9 = vld [vmem:[#allocation34] sm:$0x3]  ;;  %v3984_v10 = vld [vmem:[#allocation35] sm:$0x3] }
 0xa37   : > { %5200 = vmatprep.subr.bf16.mxu0 %v5948_v24  ;;  %v3574_v11 = vrot.slane %v3569_v37, %v7822_v21  ;;  %v3578_v12 = vrot.slane %v3569_v37, %v7826_v23  ;;  %v4033_v24 = vrot.slane %v3983_v9, %v7822_v21 }
 0xa38   : > { %3945 = vmatpush1.bf16.msra.mxu1 %v5899_v45 }
 0xa39   : > { %3946 = vmatprep.subr.bf16.mxu1 %v5904_v46 }
 0xa3a   : > { %5201 = vmatpush3.bf16.msra.mxu0 %v5949_v25 }
 0xa3b   : > { %5202 = vmatprep.subr.bf16.mxu0 %v5950_v26  ;;  %v4037_v26 = vrot.slane %v3983_v9, %v7826_v23 }
 0xa3c   : > { %3947 = vmatpush1.bf16.msra.mxu1 %v5902_v47 }
 0xa3d   : > { %3948 = vmatprep.subr.bf16.mxu1 %v5907_v15 }
 0xa3e   : > { %5203 = vmatpush3.bf16.msra.mxu0 %v5951_v27 }
 0xa3f   : > { %5204 = vmatprep.subr.bf16.mxu0 %v5952_v28 }
 0xa40   : > { %3949 = vmatpush1.bf16.msra.mxu1 %v5905_v48 }
 0xa41   : > { %3950 = vmatprep.subr.bf16.mxu1 %v5910_v16 }
 0xa42   : > { %5205 = vmatpush3.bf16.msra.mxu0 %v5953_v29  ;;  %v4046_v29 = vrot.slane %v3984_v10, %v7822_v21  ;;  %v5961_v21 = vld [vmem:[#allocation43 + $0x8] sm:$0xff]  }
 0xa43   : > { %5206 = vmatprep.subr.bf16.mxu0 %v5954_v30 }
 0xa44   : > { %3951 = vmatpush1.bf16.msra.mxu1 %v5908_v49 }
 0xa45   : > { %3952 = vmatprep.subr.bf16.mxu1 %v5913_v50 }
 0xa46   : > { %5207 = vmatpush3.bf16.msra.mxu0 %v5955_v31  ;;  %v4050_v31 = vrot.slane %v3984_v10, %v7826_v23  ;;  %v5962_v23 = vld [vmem:[#allocation43 + $0x10] sm:$0xff]  }
 0xa47   : > { %5208 = vmatprep.subr.bf16.mxu0 %v5956_v32 }
 0xa48   : > { %3953 = vmatpush1.bf16.msra.mxu1 %v5911_v18 }
 0xa49   : > { %3954 = vmatprep.subr.bf16.mxu1 %v5916_v51 }
 0xa4a   : > { %5209 = vmatpush3.bf16.msra.mxu0 %v5957_v34 }
 0xa4b   : > { %5210 = vmatprep.subr.bf16.mxu0 %v5958_v35 }
 0xa4c   : > { %3955 = vmatpush1.bf16.msra.mxu1 %v5914_v22 }
 0xa4d   : > { %3956 = vmatprep.subr.bf16.mxu1 %v5919_v52 }
 0xa4e   : > { %5211 = vmatpush3.bf16.msra.mxu0 %v5959_v36 }
 0xa4f   : > { %5247 = vmatprep.subr.bf16.mxu0 %v6947_v17 }
 0xa50   : > { %3957 = vmatpush1.bf16.msra.mxu1 %v5917_v3 }
 0xa51   : > { %3958 = vmatprep.subr.bf16.mxu1 %v5922_v53 }
 0xa54   : > { %3959 = vmatpush1.bf16.msra.mxu1 %v5920_v54 }
 0xa55   : > { %3960 = vmatprep.subr.bf16.mxu1 %v5925_v55 }
 0xa58   : > { %3961 = vmatpush1.bf16.msra.mxu1 %v5923_v56 }
 0xa59   : > { %3962 = vmatprep.subr.bf16.mxu1 %v5928_v57 }
 0xa5c   : > { %3963 = vmatpush1.bf16.msra.mxu1 %v5926_v58 }
 0xa5d   : > { %3964 = vmatprep.subr.bf16.mxu1 %v5931_v59 }
 0xa60   : > { %3965 = vmatpush1.bf16.msra.mxu1 %v5929_v60 }
 0xa61   : > { %3966 = vmatprep.subr.bf16.mxu1 %v5934_v61 }
 0xa64   : > { %3967 = vmatpush1.bf16.msra.mxu1 %v5932_v62 }
 0xa65   : > { %3968 = vmatprep.subr.bf16.mxu1 %v5937_v63 }
 0xa68   : > { %3969 = vmatpush1.bf16.msra.mxu1 %v5935_v0 }
 0xa69   : > { %3970 = vmatprep.subr.bf16.mxu1 %v5940_v1 }
 0xa6c   : > { %3971 = vmatpush1.bf16.msra.mxu1 %v5938_v2 }
 0xa6d   : > { %3972 = vmatprep.subr.bf16.mxu1 %v5943_v4 }
 0xa70   : > { %3973 = vmatpush1.bf16.msra.mxu1 %v5941_v5 }
 0xa73   : > { %3975 = vmatmul.mubr.bf16.vlgmr.msra.gmra.mrb[16].mxu1 %v3567_v6 }
 0xb46   : > { %v3976_v20 = vpop.f32.mrb[16].mxu1 }
 0xb47   : > { %v5267_v33 = vadd.f32 %v3976_v20, %v3574_v11  ;;  %v3978_v38 = vpop.f32.mrb[17].mxu1 }
 0xb48   : > { %v5268_v39 = vadd.f32 %v3978_v38, %v3578_v12  ;;  %v3980_v13 = vpop.f32.mrb[18].mxu1  ;;  %v5963_v38 = vld [vmem:[#allocation43 + $0x18] sm:$0xff]  }
 0xb49   : > { %v3986_v40 = vsel %vm3985_vm2, %v5267_v33, 0.0  ;;  %v3981_v14 = vpop.f32.mrb[19].mxu1  ;;  %v5965_v13 = vld [vmem:[#allocation43 + $0x28] sm:$0xff]  }
 0xb4a   : > { %v3987_v41 = vrot.slane %v3986_v40, 4  ;;  %v3993_v42 = vsel %vm3985_vm2, %v5268_v39, 0.0  ;;  %v5967_v14 = vld [vmem:[#allocation43 + $0x38] sm:$0xff]  }
 0xb4b   : > { %v3994_v43 = vrot.slane %v3993_v42, 4 }
 0xb4c   : > { %v3988_v19 = vadd.f32 %v3987_v41, %v3986_v40  ;;  %v5966_v40 = vld [vmem:[#allocation43 + $0x30] sm:$0xff]  }
 0xb4d   : > { %v3995_v44 = vadd.f32 %v3994_v43, %v3993_v42  ;;  %v5130_v42 = vld [vmem:[#allocation38] ss:$0 sm:$0xff] }
 0xb4e   : > { %v3989_v45 = vrot.slane %v3988_v19, 2 }
 0xb4f   : > { %v3996_v46 = vrot.slane %v3995_v44, 2 }
 0xb50   : > { %v3990_v47 = vadd.f32 %v3989_v45, %v3988_v19 }
 0xb51   : > { %v3997_v15 = vadd.f32 %v3996_v46, %v3995_v44 }
 0xb52   : > { %v3991_v48 = vrot.slane %v3990_v47, 1 }
 0xb53   : > { %v3998_v16 = vrot.slane %v3997_v15, 1 }
 0xb54   : > { %v3992_v49 = vadd.f32 %v3991_v48, %v3990_v47 }
 0xb55   : > { %v3999_v50 = vadd.f32 %v3998_v16, %v3997_v15 }
 0xb56   : > { %v4001_v18 = vmul.f32 0.5, %v3992_v49 }
 0xb57   : > { %v4002_v51 = vmul.f32 0.5, %v3999_v50 }
 0xb58   : > { %v4003_v22 = vsub.f32 %v5267_v33, %v4001_v18  ;;  %v5960_v33 = vld [vmem:[#allocation43] sm:$0xff]  }
 0xb59   : > { %v4004_v52 = vsub.f32 %v5268_v39, %v4002_v51  ;;  %v5964_v39 = vld [vmem:[#allocation43 + $0x20] sm:$0xff]  }
 0xb5a   : > { %v4005_v3 = vmul.f32 %v4003_v22, %v4003_v22 }
 0xb5b   : > { %v4006_v53 = vmul.f32 %v4004_v52, %v4004_v52 }
 0xb5c   : > { %v4007_v54 = vsel %vm3985_vm2, %v4005_v3, 0.0 }
 0xb5d   : > { %v4008_v55 = vrot.slane %v4007_v54, 4  ;;  %v4014_v56 = vsel %vm3985_vm2, %v4006_v53, 0.0 }
 0xb5e   : > { %v4015_v57 = vrot.slane %v4014_v56, 4 }
 0xb5f   : > { %v4009_v58 = vadd.f32 %v4008_v55, %v4007_v54 }
 0xb60   : > { %v4016_v59 = vadd.f32 %v4015_v57, %v4014_v56 }
 0xb61   : > { %v4010_v60 = vrot.slane %v4009_v58, 2 }
 0xb62   : > { %v4017_v61 = vrot.slane %v4016_v59, 2 }
 0xb63   : > { %v4011_v62 = vadd.f32 %v4010_v60, %v4009_v58 }
 0xb64   : > { %v4018_v63 = vadd.f32 %v4017_v61, %v4016_v59  ;;  %v5147_v61 = vld [vmem:[#allocation40] ss:$0 sm:$0xff] }
 0xb65   : > { %v4012_v0 = vrot.slane %v4011_v62, 1 }
 0xb66   : > { %v4019_v1 = vrot.slane %v4018_v63, 1 }
 0xb67   : > { %v4013_v2 = vadd.f32 %v4012_v0, %v4011_v62 }
 0xb68   : > { %v4020_v4 = vadd.f32 %v4019_v1, %v4018_v63  ;;  %v5148_v63 = vld [vmem:[#allocation41] ss:$0 sm:$0xff] }
 0xb69   : > { %v4021_v5 = vmul.f32 0.5, %v4013_v2 }
 0xb6a   : > { %v4022_v6 = vmul.f32 0.5, %v4020_v4 }
 0xb6b   : > { %v4023_v7 = vadd.f32 1e-05, %v4021_v5  ;;  %v5149_v5 = vld [vmem:[#allocation44] ss:$0 sm:$0xff] }
 0xb6c   : > { %v4024_v8 = vadd.f32 1e-05, %v4022_v6 }
 0xb6d   : > { %5984 = vrsqrt.f32 %v4023_v7  ;;  %v4385_v7 = vld [vmem:[#allocation2] sm:$0x3] }
 0xb6e   : > { %5986 = vrsqrt.f32 %v4024_v8 }
 0xb77   : > { %v5985_v25 = vpop.eup %5984 }
 0xb78   : > { %v5987_v27 = vpop.eup %5986  ;;  %v4027_v28 = vmul.f32 %v5985_v25, %v4003_v22 }
 0xb79   : > { %v4028_v30 = vmul.f32 %v5987_v27, %v4004_v52 }
 0xb7a   : > { %v4040_v32 = vmul.f32 %v4033_v24, %v4027_v28 }
 0xb7b   : > { %v4041_v34 = vmul.f32 %v4037_v26, %v4028_v30 }
 0xb7c   : > { %v4053_v35 = vadd.f32 %v4046_v29, %v4040_v32 }
 0xb7d   : > { %v4054_v36 = vadd.f32 %v4050_v31, %v4041_v34 }
 0xb7e   : > { %v4055_v37 = vmax.f32 %v4053_v35, 0.0 }
 0xb7f   : > { %v4056_v11 = vmax.f32 %v4054_v36, 0.0 }
 0xb80   : > { %v4089_v20 = vpack.c.bf16 %v4055_v37, %v4055_v37 }
 0xb81   : > { %v4090_v12 = vpack.c.bf16 %v4056_v11, %v4056_v11 }
 0xb83   : > { %4226 = vmatprep.mubr.bf16.mxu0 %v4090_v12 }
 0xb84   : > { %4227 = vmatmul.mubr.bf16.vlgmr.msra.gmra.mrb[16].mxu0 %v4089_v20 }
 0xb85   : > { %5263 = vmatprep.mubr.msk.bf16.mxu0 %vm6948_vm0, %v6947_v17  ;;  %5248 = vmatpush3.bf16.msra.mxu0 %v5960_v33 }
 0xb86   : > { %5249 = vmatprep.subr.bf16.mxu0 %v6947_v17 }
 0xb89   : > { %5250 = vmatpush3.bf16.msra.mxu0 %v5961_v21 }
 0xb8a   : > { %5251 = vmatprep.subr.bf16.mxu0 %v6947_v17 }
 0xb8d   : > { %5252 = vmatpush3.bf16.msra.mxu0 %v5962_v23 }
 0xb8e   : > { %5253 = vmatprep.subr.bf16.mxu0 %v6947_v17 }
 0xb91   : > { %5254 = vmatpush3.bf16.msra.mxu0 %v5963_v38 }
 0xb92   : > { %5255 = vmatprep.subr.bf16.mxu0 %v6947_v17 }
 0xb95   : > { %5256 = vmatpush3.bf16.msra.mxu0 %v5964_v39 }
 0xb96   : > { %5257 = vmatprep.subr.bf16.mxu0 %v6947_v17 }
 0xb99   : > { %5258 = vmatpush3.bf16.msra.mxu0 %v5965_v13 }
 0xb9a   : > { %5259 = vmatprep.subr.bf16.mxu0 %v6947_v17 }
 0xb9d   : > { %5260 = vmatpush3.bf16.msra.mxu0 %v5966_v40 }
 0xb9e   : > { %5261 = vmatprep.subr.bf16.mxu0 %v6947_v17 }
 0xba1   : > { %5262 = vmatpush3.bf16.msra.mxu0 %v5967_v14 }
 0xc57   : > { %v5212_v41 = vpop.f32.mrb[16].mxu0 }
 0xc58   : > { %v5213_v43 = vpop.f32.mrb[17].mxu0 }
 0xc59   : > { %v5214_v19 = vadd.f32 %v5213_v43, %v5212_v41  ;;  %v5215_v44 = vpop.f32.mrb[18].mxu0 }
 0xc5a   : > { %v5216_v45 = vpop.f32.mrb[19].mxu0 }
 0xc5b   : > { %v4229_v46 = vadd.f32 %v5214_v19, %v5130_v42 }
 0xc5d   : > { %v4236_v47 = vsel %vm3985_vm2, %v4229_v46, 0.0 }
 0xc5e   : > { %v4237_v15 = vrot.slane %v4236_v47, 4 }
 0xc60   : > { %v4238_v48 = vadd.f32 %v4237_v15, %v4236_v47 }
 0xc62   : > { %v4239_v16 = vrot.slane %v4238_v48, 2 }
 0xc64   : > { %v4240_v49 = vadd.f32 %v4239_v16, %v4238_v48 }
 0xc66   : > { %v4241_v50 = vrot.slane %v4240_v49, 1 }
 0xc68   : > { %v4242_v18 = vadd.f32 %v4241_v50, %v4240_v49 }
 0xc6a   : > { %v4243_v51 = vmul.f32 0.5, %v4242_v18 }
 0xc6c   : > { %v4244_v22 = vsub.f32 %v4229_v46, %v4243_v51 }
 0xc6e   : > { %v4245_v52 = vmul.f32 %v4244_v22, %v4244_v22 }
 0xc70   : > { %v4246_v17 = vsel %vm3985_vm2, %v4245_v52, 0.0 }
 0xc71   : > { %v4247_v3 = vrot.slane %v4246_v17, 4 }
 0xc73   : > { %v4248_v53 = vadd.f32 %v4247_v3, %v4246_v17 }
 0xc75   : > { %v4249_v54 = vrot.slane %v4248_v53, 2 }
 0xc77   : > { %v4250_v55 = vadd.f32 %v4249_v54, %v4248_v53 }
 0xc79   : > { %v4251_v56 = vrot.slane %v4250_v55, 1 }
 0xc7b   : > { %v4252_v57 = vadd.f32 %v4251_v56, %v4250_v55 }
 0xc7d   : > { %v4253_v58 = vmul.f32 0.5, %v4252_v57 }
 0xc7f   : > { %v4254_v59 = vadd.f32 1e-05, %v4253_v58 }
 0xc81   : > { %5988 = vrsqrt.f32 %v4254_v59 }
 0xc8b   : > { %v5989_v60 = vpop.eup %5988 }
 0xc8c   : > { %v4256_v62 = vmul.f32 %v5989_v60, %v4244_v22 }
 0xc8e   : > { %v4263_v0 = vmul.f32 %v5147_v61, %v4256_v62 }
 0xc90   : > { %v4270_v1 = vadd.f32 %v5148_v63, %v4263_v0 }
 0xc92   : > { %v4271_v2 = vmax.f32 %v4270_v1, 0.0 }
 0xc94   : > { %v4288_v4 = vpack.c.bf16 %v4271_v2, %v4271_v2 }
 0xc96   : > { %5264 = vmatmul.mubr.bf16.vlgmr.msra.gmra.mrb[20].mxu0 %v4288_v4 }
 0xd69   : > { %v4378_v6 = vpop.f32.mrb[20].mxu0 }
 0xd6a   : > { %v4379_v8 = vadd.f32 %v5149_v5, %v4378_v6  ;;  %v5265_v9 = vpop.f32.mrb[21].mxu0 }
 0xd6b   : > { %v4381_v10 = vpop.f32.mrb[22].mxu0 }
 0xd6c   : > { %v4386_v24 = vadd.f32 %v4385_v7, %v4379_v8  ;;  %v5266_v25 = vpop.f32.mrb[23].mxu0 }
 0xd6e   : > { %4387 = vst [vmem:[#allocation2] sm:$0x3] %v4386_v24 }
 0xd6f PF: > { %s8166_s30 = sld [smem:[#allocation96_spill]]  ;;  %p99_p3 = scmp.ge.s32.totalorder %s7316_s16, 10  }
 0xd70   : > { %s8167_s0 = smov %s6866_s22  ;;  %s8168_s22 = smov %s6870_s23 }
 0xd71   : > { %s8170_s26 = smov %s7316_s16  ;;  %101 = sbr.rel (!%p99_p3) target bundleno = 95 (0x5f), region = 387 }
 0xd75   : > { %s8169_s23 = smov %s8166_s30 }
 0xd78   :  { %4407 = vsyncpa [#allocation4], 1 }
 0xd79   :  { %4409 = vsyncpa [#allocation4 + $0x1], 1 }
 0xd7a   :  { %4410 = vsyncpa [#allocation6], 1 }
 0xd7b   :  { %4412 = vsyncpa [#allocation6 + $0x1], 1 }
 0xd7c   :  { %4413 = vsyncpa [#allocation9], 1 }
 0xd7d   :  { %4415 = vsyncpa [#allocation9 + $0x1], 1 }
 0xd7e   :  { %4416 = vsyncpa [#allocation12], 1 }
 0xd7f   :  { %4417 = vsyncpa [#allocation15], 1 }
 0xd80   :  { %4418 = vsyncpa [#allocation18], 1 }
 0xd81   :  { %4419 = vsyncpa [#allocation21], 1 }
 0xd82   :  { %4420 = vsyncpa [#allocation24], 1 }
 0xd83   :  { %4421 = vsyncpa [#allocation27], 1 }
 0xd84   :  { %4422 = vsyncpa [#allocation30], 1 }
 0xd85   :  { %4423 = vsyncpa [#allocation33], 1 }
 0xd86   :  { %4424 = vsyncpa [#allocation36], 1 }
 0xd87   :  { %4425 = vsyncpa [#allocation39], 1 }
 0xd88   :  { %4426 = vsyncpa [#allocation42], 1 }
 0xd89   :  { %4427 = vsyncpa [#allocation45], 1 }

</bundles_post_ra>
